<compile_context>
chip_gen: v7x
topology: tpu7x:2x2x1
jax: 0.10.0
libtpu: 0.0.40
codegen_flags: <defaults>
</compile_context>

<pallas_src>
import jax
import jax.numpy as jnp
from jax.experimental import pallas as pl
from jax.experimental.pallas import tpu as pltpu


# ------------------------------ helpers ------------------------------------

_SQRT_2_OVER_PI = 0.7978845608028654


def _gelu_tanh(x):
    """tanh-form GELU: cubic on the VPU, tanh on the EUP (frees the vector-ALU slot)."""
    return 0.5 * x * (1.0 + jnp.tanh(_SQRT_2_OVER_PI * (x + 0.044715 * (x * x * x))))


def _device_budgets():
    """(tile working-set budget, vmem_limit_bytes) -- generation aware."""
    kind = ""
    try:
        kind = jax.devices()[0].device_kind.lower()
    except Exception:
        pass
    if "v7" in kind or "7x" in kind:                   # 64 MiB physical VMEM per TC
        return 24 * 1024 * 1024, 48 * 1024 * 1024
    return 48 * 1024 * 1024, 80 * 1024 * 1024          # v5e / v6e: 128 MiB physical VMEM


def _resident_bytes(tn, dim, hidden, csz, osz):
    """VMEM working set of the resident-weights kernel (BlockSpecs double-buffered)."""
    dbuf = 2
    weights = dbuf * 2 * hidden * dim * csz            # W1 + W2 blocks
    biases = dbuf * (hidden + dim) * 128 * 4           # (N,1) columns pad to 128 lanes
    io = dbuf * dim * tn * (csz + osz)                 # x block + out block
    inter = hidden * tn * (4 + csz)                    # f32 hidden intermediate + cast copy
    y = dim * tn * 4                                   # f32 output before the store cast
    return weights + biases + io + inter + y


def _chunked_bytes(tn, tk, dim, csz, osz):
    """VMEM working set of the streamed-hidden fallback kernel."""
    dbuf = 2
    weights = dbuf * 2 * tk * dim * csz
    biases = dbuf * (tk + dim) * 128 * 4
    io = dbuf * dim * tn * (csz + osz)
    inter = tk * tn * (4 + csz)
    acc = dim * tn * 4                                 # f32 accumulator scratch
    return weights + biases + io + inter + acc


def _pick_token_tile(hw, batch, fits):
    """Largest lane-dense tile (multiple of 128) dividing H*W that fits the VMEM budget."""
    if hw % 128 != 0:
        return hw                                      # full-extent block, no padding needed
    cands = [m for m in range(128, hw + 1, 128) if hw % m == 0]
    good = [m for m in cands if fits(m)]
    tn = max(good) if good else 128
    # Keep >= 2 total grid steps so both v7x TensorCores get work (no effect on v5e/v6e).
    if batch * (hw // tn) < 2:
        smaller = [m for m in good if m < tn]
        if smaller:
            tn = max(smaller)
    return tn


# ------------------------------ kernels -------------------------------------

def _ffn_resident_kernel(x_ref, w1_ref, b1_ref, w2_ref, b2_ref, o_ref):
    # Both weight slabs are VMEM-resident (constant block index); no accumulator needed.
    x = x_ref[0]                                                          # (dim, tn)
    h = jnp.dot(w1_ref[...], x, preferred_element_type=jnp.float32)      # (hidden, tn)
    h = _gelu_tanh(h + b1_ref[...].astype(jnp.float32))                  # bias bcast over lanes
    y = jnp.dot(w2_ref[...], h.astype(w2_ref.dtype),
                preferred_element_type=jnp.float32)                      # (dim, tn)
    o_ref[0] = (y + b2_ref[...].astype(jnp.float32)).astype(o_ref.dtype)


def _ffn_chunked_kernel(x_ref, w1_ref, b1_ref, w2_ref, b2_ref, o_ref, acc_ref):
    # Fallback: hidden dimension streamed over the last (reduction) grid axis.
    k = pl.program_id(2)

    @pl.when(k == 0)
    def _init():
        acc_ref[...] = jnp.zeros_like(acc_ref)

    x = x_ref[0]                                                          # (dim, tn)
    h = jnp.dot(w1_ref[...], x, preferred_element_type=jnp.float32)      # (tk, tn)
    h = _gelu_tanh(h + b1_ref[...].astype(jnp.float32))
    acc_ref[...] += jnp.dot(w2_ref[...], h.astype(w2_ref.dtype),
                            preferred_element_type=jnp.float32)          # (dim, tn)

    @pl.when(k == pl.num_programs(2) - 1)
    def _flush():
        o_ref[0] = (acc_ref[...] + b2_ref[...].astype(jnp.float32)).astype(o_ref.dtype)


# ------------------------------ wrapper --------------------------------------

def feed_forward_1x1(x_nchw, params, *, compute_dtype=None):
    """FeedForward forward pass.  x_nchw: (B, dim, H, W), channels-first like PyTorch.

    params: w1 (hidden, dim) = conv1.weight[:, :, 0, 0]; b1 (hidden,);
            w2 (dim, hidden) = conv2.weight[:, :, 0, 0]; b2 (dim,).
    """
    w1, b1, w2, b2 = params["w1"], params["b1"], params["w2"], params["b2"]
    B, C, H, W = x_nchw.shape
    hidden, dim = w1.shape
    assert C == dim and w2.shape == (dim, hidden)
    assert b1.size == hidden and b2.size == dim

    out_dtype = x_nchw.dtype
    cdt = jnp.dtype(compute_dtype) if compute_dtype is not None else jnp.dtype(w1.dtype)
    csz, osz = cdt.itemsize, jnp.dtype(out_dtype).itemsize

    hw = H * W
    x = x_nchw.reshape(B, dim, hw).astype(cdt)          # pure view (+ optional cast)
    w1 = w1.astype(cdt)
    w2 = w2.astype(cdt)
    b1 = jnp.asarray(b1).reshape(hidden, 1)             # column -> broadcasts over lanes
    b2 = jnp.asarray(b2).reshape(dim, 1)

    budget, vmem_limit = _device_budgets()
    min_tn = 128 if hw % 128 == 0 else hw

    if _resident_bytes(min_tn, dim, hidden, csz, osz) <= budget:
        # ---- common case: weights resident in VMEM, flat (batch, token-tile) grid -----
        tn = _pick_token_tile(
            hw, B, lambda m: _resident_bytes(m, dim, hidden, csz, osz) <= budget)
        grid = (B, hw // tn)
        out = pl.pallas_call(
            _ffn_resident_kernel,
            out_shape=jax.ShapeDtypeStruct((B, dim, hw), out_dtype),
            grid_spec=pltpu.PrefetchScalarGridSpec(
                num_scalar_prefetch=0,
                grid=grid,
                in_specs=[
                    pl.BlockSpec((1, dim, tn), lambda b, j: (b, 0, j)),    # x tokens
                    pl.BlockSpec((hidden, dim), lambda b, j: (0, 0)),      # W1 (resident)
                    pl.BlockSpec((hidden, 1), lambda b, j: (0, 0)),        # b1
                    pl.BlockSpec((dim, hidden), lambda b, j: (0, 0)),      # W2 (resident)
                    pl.BlockSpec((dim, 1), lambda b, j: (0, 0)),           # b2
                ],
                out_specs=pl.BlockSpec((1, dim, tn), lambda b, j: (b, 0, j)),
            ),
            compiler_params=pltpu.CompilerParams(
                dimension_semantics=("parallel", "parallel"),
                vmem_limit_bytes=vmem_limit,
            ),
        )(x, w1, b1, w2, b2)
    else:
        # ---- fallback: hidden streamed (reduction axis last) with f32 accumulator -----
        if hidden % 512 == 0:
            tk = 512
        elif hidden % 256 == 0:
            tk = 256                       # keep the 256-wide MXU of v6e/v7x filled
        elif hidden % 128 == 0:
            tk = 128
        else:
            tk = hidden
        tn = _pick_token_tile(
            hw, B, lambda m: _chunked_bytes(m, tk, dim, csz, osz) <= budget)
        grid = (B, hw // tn, hidden // tk)
        out = pl.pallas_call(
            _ffn_chunked_kernel,
            out_shape=jax.ShapeDtypeStruct((B, dim, hw), out_dtype),
            grid_spec=pltpu.PrefetchScalarGridSpec(
                num_scalar_prefetch=0,
                grid=grid,
                in_specs=[
                    pl.BlockSpec((1, dim, tn), lambda b, j, k: (b, 0, j)),  # x (reused over k)
                    pl.BlockSpec((tk, dim), lambda b, j, k: (k, 0)),        # W1 hidden slab
                    pl.BlockSpec((tk, 1), lambda b, j, k: (k, 0)),          # b1 hidden slab
                    pl.BlockSpec((dim, tk), lambda b, j, k: (0, k)),        # W2 hidden slab
                    pl.BlockSpec((dim, 1), lambda b, j, k: (0, 0)),         # b2
                ],
                out_specs=pl.BlockSpec((1, dim, tn), lambda b, j, k: (b, 0, j)),
                scratch_shapes=[pltpu.VMEM((dim, tn), jnp.float32)],
            ),
            compiler_params=pltpu.CompilerParams(
                dimension_semantics=("parallel", "parallel", "arbitrary"),
                vmem_limit_bytes=vmem_limit,
            ),
        )(x, w1, b1, w2, b2)

    return out.reshape(B, dim, H, W)                     # pure view, no transpose


# --------------------------------- main -------------------------------------

if __name__ == "__main__":
    B, dim, H, W, mlp_mult = 2, 128, 16, 16, 4
    hidden = dim * mlp_mult

    key = jax.random.PRNGKey(0)
    kx, k1, k2, k3, k4 = jax.random.split(key, 5)
    x = jax.random.normal(kx, (B, dim, H, W), dtype=jnp.float32)
    # Conv2d weights with the 1x1 spatial dims squeezed: conv1.weight -> (hidden, dim), etc.
    params = dict(
        w1=(0.05 * jax.random.normal(k1, (hidden, dim))).astype(jnp.float32),
        b1=(0.02 * jax.random.normal(k2, (hidden,))).astype(jnp.float32),
        w2=(0.05 * jax.random.normal(k3, (dim, hidden))).astype(jnp.float32),
        b2=(0.02 * jax.random.normal(k4, (dim,))).astype(jnp.float32),
    )

    fwd = jax.jit(feed_forward_1x1)
    out = jax.block_until_ready(fwd(x, params))
    assert out.shape == (B, dim, H, W), out.shape

    # Pure-JAX references: 1x1 convs == per-pixel Linear.
    xt = x.transpose(0, 2, 3, 1).reshape(-1, dim)
    pre = xt @ params["w1"].T + params["b1"]
    ref_tanh = jax.nn.gelu(pre, approximate=True) @ params["w2"].T + params["b2"]
    ref_erf = jax.nn.gelu(pre, approximate=False) @ params["w2"].T + params["b2"]
    ref_tanh = ref_tanh.reshape(B, H, W, dim).transpose(0, 3, 1, 2)
    ref_erf = ref_erf.reshape(B, H, W, dim).transpose(0, 3, 1, 2)

    err_kernel = float(jnp.max(jnp.abs(out - ref_tanh)))     # kernel mechanics (same GELU form)
    err_module = float(jnp.max(jnp.abs(out - ref_erf)))      # vs nn.GELU() exact erf
    assert err_kernel < 2e-3, f"max abs err vs tanh-GELU reference: {err_kernel}"
    assert err_module < 5e-3, f"max abs err vs exact-erf reference: {err_module}"

    # bf16 compute path (full-rate MXU + halved weight DMA on v5e/v6e/v7x), f32 accumulation.
    fwd_bf16 = jax.jit(lambda xx, pp: feed_forward_1x1(xx, pp, compute_dtype=jnp.bfloat16))
    out_bf16 = jax.block_until_ready(fwd_bf16(x, params))
    assert out_bf16.shape == (B, dim, H, W)
    assert float(jnp.max(jnp.abs(out_bf16 - ref_erf))) < 0.1

    print("KERNEL_OK")
</pallas_src>

<mosaic_0001>
module attributes {stable_mosaic.version = 11 : i64} {
  func.func @_ffn_resident_kernel(%arg0: i32, %arg1: i32, %arg2: memref<1x128x256xf32, #tpu.memory_space<vmem>>, %arg3: memref<512x128xf32, #tpu.memory_space<vmem>>, %arg4: memref<512x1xf32, #tpu.memory_space<vmem>>, %arg5: memref<128x512xf32, #tpu.memory_space<vmem>>, %arg6: memref<128x1xf32, #tpu.memory_space<vmem>>, %arg7: memref<1x128x256xf32, #tpu.memory_space<vmem>>) attributes {dimension_semantics = [#tpu.dimension_semantics<parallel>, #tpu.dimension_semantics<parallel>], iteration_bounds = array<i64: 2, 1>, scalar_prefetch = 0 : i64, scratch_operands = 0 : i64, tpu.core_type = #tpu.core_type<tc>, window_params = [{transform_indices = @transform_0, window_bounds = array<i64: 1, 128, 256>}, {pipeline_mode = #tpu.pipeline_mode<synchronous>, transform_indices = @transform_1, window_bounds = array<i64: 512, 128>}, {pipeline_mode = #tpu.pipeline_mode<synchronous>, transform_indices = @transform_2, window_bounds = array<i64: 512, 1>}, {pipeline_mode = #tpu.pipeline_mode<synchronous>, transform_indices = @transform_3, window_bounds = array<i64: 128, 512>}, {pipeline_mode = #tpu.pipeline_mode<synchronous>, transform_indices = @transform_4, window_bounds = array<i64: 128, 1>}, {transform_indices = @transform_5, window_bounds = array<i64: 1, 128, 256>}]} {
    %c0 = arith.constant 0 : index
    %c0_0 = arith.constant 0 : index
    %c0_1 = arith.constant 0 : index
    %0 = vector.load %arg2[%c0, %c0_0, %c0_1] : memref<1x128x256xf32, #tpu.memory_space<vmem>>, vector<1x128x256xf32>
    %1 = vector.shape_cast %0 : vector<1x128x256xf32> to vector<128x256xf32>
    %c0_2 = arith.constant 0 : index
    %c0_3 = arith.constant 0 : index
    %2 = vector.load %arg3[%c0_2, %c0_3] : memref<512x128xf32, #tpu.memory_space<vmem>>, vector<512x128xf32>
    %cst = arith.constant dense<0.000000e+00> : vector<512x256xf32>
    %3 = tpu.matmul %2, %1, %cst {dimension_numbers = #tpu.dot_dimension_numbers<[1], [0], [0], [1], [0, 0, 1, 1], [], []>} : vector<512x128xf32>, vector<128x256xf32>, vector<512x256xf32> -> vector<512x256xf32>
    %c0_4 = arith.constant 0 : index
    %c0_5 = arith.constant 0 : index
    %4 = vector.load %arg4[%c0_4, %c0_5] : memref<512x1xf32, #tpu.memory_space<vmem>>, vector<512x1xf32>
    %5 = vector.broadcast %4 : vector<512x1xf32> to vector<512x256xf32>
    %6 = arith.addf %3, %5 : vector<512x256xf32>
    %cst_6 = arith.constant 5.000000e-01 : f32
    %7 = vector.broadcast %cst_6 : f32 to vector<512x256xf32>
    %8 = arith.mulf %7, %6 : vector<512x256xf32>
    %9 = arith.mulf %6, %6 : vector<512x256xf32>
    %10 = arith.mulf %9, %6 : vector<512x256xf32>
    %cst_7 = arith.constant 4.471500e-02 : f32
    %11 = vector.broadcast %cst_7 : f32 to vector<512x256xf32>
    %12 = arith.mulf %11, %10 : vector<512x256xf32>
    %13 = arith.addf %6, %12 : vector<512x256xf32>
    %cst_8 = arith.constant 0.797884583 : f32
    %14 = vector.broadcast %cst_8 : f32 to vector<512x256xf32>
    %15 = arith.mulf %14, %13 : vector<512x256xf32>
    %16 = math.tanh %15 : vector<512x256xf32>
    %cst_9 = arith.constant 1.000000e+00 : f32
    %17 = vector.broadcast %cst_9 : f32 to vector<512x256xf32>
    %18 = arith.addf %17, %16 : vector<512x256xf32>
    %19 = arith.mulf %8, %18 : vector<512x256xf32>
    %c0_10 = arith.constant 0 : index
    %c0_11 = arith.constant 0 : index
    %20 = vector.load %arg5[%c0_10, %c0_11] : memref<128x512xf32, #tpu.memory_space<vmem>>, vector<128x512xf32>
    %cst_12 = arith.constant dense<0.000000e+00> : vector<128x256xf32>
    %21 = tpu.matmul %20, %19, %cst_12 {dimension_numbers = #tpu.dot_dimension_numbers<[1], [0], [0], [1], [0, 0, 1, 1], [], []>} : vector<128x512xf32>, vector<512x256xf32>, vector<128x256xf32> -> vector<128x256xf32>
    %c0_13 = arith.constant 0 : index
    %c0_14 = arith.constant 0 : index
    %22 = vector.load %arg6[%c0_13, %c0_14] : memref<128x1xf32, #tpu.memory_space<vmem>>, vector<128x1xf32>
    %23 = vector.broadcast %22 : vector<128x1xf32> to vector<128x256xf32>
    %24 = arith.addf %21, %23 : vector<128x256xf32>
    %c0_15 = arith.constant 0 : index
    %c0_16 = arith.constant 0 : index
    %c0_17 = arith.constant 0 : index
    %25 = vector.load %arg7[%c0_15, %c0_16, %c0_17] : memref<1x128x256xf32, #tpu.memory_space<vmem>>, vector<1x128x256xf32>
    %26 = vector.shape_cast %25 : vector<1x128x256xf32> to vector<128x256xf32>
    %27 = vector.shape_cast %24 : vector<128x256xf32> to vector<1x128x256xf32>
    tpu.vector_store %arg7[%c0_15, %c0_16, %c0_17], %27 {strides = array<i32>} : memref<1x128x256xf32, #tpu.memory_space<vmem>>, vector<1x128x256xf32>,
    return
  }
  func.func @transform_0(%arg0: i32, %arg1: i32) -> (i32, i32, i32) {
    %c0_i32 = arith.constant 0 : i32
    %c0_i32_0 = arith.constant 0 : i32
    return %arg0, %c0_i32, %arg1 : i32, i32, i32
  }
  func.func @transform_1(%arg0: i32, %arg1: i32) -> (i32, i32) {
    %c0_i32 = arith.constant 0 : i32
    %c0_i32_0 = arith.constant 0 : i32
    %c0_i32_1 = arith.constant 0 : i32
    return %c0_i32, %c0_i32_0 : i32, i32
  }
  func.func @transform_2(%arg0: i32, %arg1: i32) -> (i32, i32) {
    %c0_i32 = arith.constant 0 : i32
    %c0_i32_0 = arith.constant 0 : i32
    %c0_i32_1 = arith.constant 0 : i32
    return %c0_i32, %c0_i32_0 : i32, i32
  }
  func.func @transform_3(%arg0: i32, %arg1: i32) -> (i32, i32) {
    %c0_i32 = arith.constant 0 : i32
    %c0_i32_0 = arith.constant 0 : i32
    %c0_i32_1 = arith.constant 0 : i32
    return %c0_i32, %c0_i32_0 : i32, i32
  }
  func.func @transform_4(%arg0: i32, %arg1: i32) -> (i32, i32) {
    %c0_i32 = arith.constant 0 : i32
    %c0_i32_0 = arith.constant 0 : i32
    %c0_i32_1 = arith.constant 0 : i32
    return %c0_i32, %c0_i32_0 : i32, i32
  }
  func.func @transform_5(%arg0: i32, %arg1: i32) -> (i32, i32, i32) {
    %c0_i32 = arith.constant 0 : i32
    %c0_i32_0 = arith.constant 0 : i32
    return %arg0, %c0_i32, %arg1 : i32, i32, i32
  }
}

</mosaic_0001>

<bundles_post_ra>
// kernel: feed_forward_1x1.1
= control target key start
LH: loop header
LB: loop body
LE: loop exit
PB: predicated region body
PF: predicated region fallthrough
CT: control target
= control target key end

     0   :  { %s5963_s0 = inlined_call_operand.hbm [shape: f32[2,128,256], index: 0, kind: input, shape index: {}]   ;;  %s5964_s1 = inlined_call_operand.hbm [shape: f32[512,128], index: 1, kind: input, shape index: {}]   ;;  %s5965_s2 = inlined_call_operand.hbm [shape: f32[512,1], index: 2, kind: input, shape index: {}]   ;;  %s5966_s3 = inlined_call_operand.hbm [shape: f32[128,512], index: 3, kind: input, shape index: {}]   ;;  %s5967_s4 = inlined_call_operand.hbm [shape: f32[128,1], index: 4, kind: input, shape index: {}]   ;;  %s5968_s5 = inlined_call_operand.hbm [shape: f32[2,128,256], index: 5, kind: output, shape index: {}]  }
   0x1   :  { %6032 = sst [smem:[#allocation131_spill]] %s5964_s1 }
   0x2   :  { %10 = vsyncpa [#allocation3], 0 }
   0x3   :  { %12 = vsyncpa [#allocation3 + $0x1], 0 }
   0x4   :  { %13 = vsyncpa [#allocation6], 0 }
   0x5   :  { %14 = vsyncpa [#allocation9], 0 }
   0x6   :  { %15 = vsyncpa [#allocation4], 0 }
   0x7   :  { %17 = vsyncpa [#allocation4 + $0x1], 0  ;;  %s3973_s18 = smov 0   ;;  %s3975_s19 = smov 0  }
   0x8   :  { %s3977_s20 = smov 0   ;;  %s3979_s21 = smov 0  }
   0x9   :  { %s3981_s22 = smov 0   ;;  %s3983_s23 = smov 0  }
   0xa LB: > { %s3057_s24 = sadd.s32 4294967295, %s3925_s23   ;;  %s3058_s25 = sadd.s32 4294967294, %s3925_s23   ;;  %s3925_s23 = sphi %s3983_s23, %s23_s23   ;;  %s3921_s22 = sphi %s3981_s22, %s6361_s22   ;;  %s3917_s21 = sphi %s3979_s21, %s6360_s21   ;;  %s3913_s20 = sphi %s3977_s20, %s6359_s20   ;;  %s3909_s19 = sphi %s3975_s19, %s6358_s19   ;;  %s3905_s18 = sphi %s3973_s18, %s6357_s18  }
   0xb   : > { %p57_p0 = scmp.ne.s32.totalorder %s3909_s19, %s3905_s18  ;;  %p4007_p1 = scmp.eq.s32.totalorder %s3057_s24, 0 }
   0xc   : > { %p4011_p2 = scmp.eq.s32.totalorder %s3057_s24, 1  ;;  %p173_p3 = scmp.eq.s32.totalorder %s3058_s25, 1 }
   0xd   : > { %s6033_s26 = scalar_select %p4007_p1, 1, 0 }
   0xe   : > { %s6034_s27 = scalar_select %p4011_p2, 1, 0 }
   0xf   : > { %p4017_p4 = por %p4007_p1, %p57_p0  ;;  %p3059_p5 = scmp.ge.s32.totalorder %s3925_s23, 1 }
  0x10   : > { %p4022_p6 = por %p173_p3, %p57_p0  ;;  %p180_p7 = scmp.lt.s32.totalorder %s3925_s23, 3 }
  0x11   : > { %s6035_s28 = scalar_select %p4017_p4, 1, 0 }
  0x12   : > { %s6036_s29 = scalar_select %p4022_p6, 1, 0 }
  0x13   : > { %p4027_p8 = pnand %p3059_p5, %p180_p7  ;;  %s3927_s6 = smov [#allocation5]  }
  0x14   : > { %6037 = sst [smem:[#allocation16_spill]] %s6036_s29  ;;  %s192_s7 = sshll.u32 %s3927_s6, 4  ;;  %s4031_s7 = int_to_ptr.vmem [resolvable:$true] %s192_s7 }
  0x15   : > { %s6038_s30 = scalar_select %p4027_p8, 1, 0 }
  0x16   : > { %p3342_p9 = pneg %p4027_p8  ;;  %s3928_s9 = smov [#allocation8]  }
  0x17   : > { %s218_s10 = sshll.u32 %s3928_s9, 4  ;;  %s6040_s1 = sld [smem:[#allocation131_spill]]  ;;  %s4042_s10 = int_to_ptr.vmem [resolvable:$true] %s218_s10 }
  0x18   : > { %p4038_p11 = pnand %p3342_p9, %p4007_p1 }
  0x1a   : > { %p4052_p13 = pneg %p4038_p11 }
  0x1d   : > { %s3693_s13 = scalar_lea.hbm %s6040_s1, 8192 }
  0x1e   : > { %p3694_p12 = scmp.ne.s32.totalorder %s6040_s1, %s3693_s13  ;;  %p3700_p5 = scmp.lt.u32.totalorder %s3693_s13, %s6040_s1 }
  0x20   : > { %p3696_p0 = pnand %p4052_p13, %p3694_p12 }
  0x22   : > { %p3697_p3 = pneg %p3696_p0 }
  0x24   : > { %p3702_p7 = pnand %p3700_p5, %p3697_p3 }
  0x26   : > { %3705 = shalt.err (!%p3702_p7)
}
  0x27   : > { %s3706_s25 = scalar_lea.vmem %s4031_s7, 8192  ;;  %p3714_p1 = scmp.lt.s32.totalorder %s4031_s7, %s4031_s7 }
  0x28   : > { %p3707_p9 = scmp.ne.s32.totalorder %s4031_s7, %s3706_s25  ;;  %p3715_p4 = scmp.lt.s32.totalorder %s3706_s25, %s3706_s25 }
  0x2a   : > { %p3709_p10 = pnand %p3707_p9, %p4052_p13  ;;  %p3716_p12 = por %p3715_p4, %p3714_p1 }
  0x2c   : > { %p3710_p6 = pneg %p3709_p10 }
  0x2e   : > { %p3717_p0 = pnand %p3716_p12, %p3710_p6 }
  0x30   : > { %3720 = shalt.err (!%p3717_p0)
}
  0x31   : > { %s5973_s6 = smov 128   ;;  %s5975_s9 = smov 8  }
  0x32   : > { %3345 = dma.hbm_to_vmem [thread:$0]  (!%p4038_p11), %s6040_s1, 8192, %s4031_s7, [#allocation6], %s5973_s6, %s5973_s6, %s5975_s9  }
  0x33   : > { %s3721_s15 = scalar_lea.hbm %s5966_s3, 8192 }
  0x34   : > { %p3722_p1 = scmp.ne.s32.totalorder %s5966_s3, %s3721_s15  ;;  %p3728_p10 = scmp.lt.u32.totalorder %s3721_s15, %s5966_s3 }
  0x36   : > { %p3724_p4 = pnand %p3722_p1, %p4052_p13 }
  0x38   : > { %p3725_p6 = pneg %p3724_p4 }
  0x3a   : > { %p3730_p3 = pnand %p3728_p10, %p3725_p6 }
  0x3c   : > { %3733 = shalt.err (!%p3730_p3)
}
  0x3d   : > { %s3734_s7 = scalar_lea.vmem %s4042_s10, 8192  ;;  %p3742_p12 = scmp.lt.s32.totalorder %s4042_s10, %s4042_s10 }
  0x3e   : > { %p3735_p5 = scmp.ne.s32.totalorder %s4042_s10, %s3734_s7  ;;  %p3743_p0 = scmp.lt.s32.totalorder %s3734_s7, %s3734_s7 }
  0x40   : > { %p3737_p7 = pnand %p3735_p5, %p4052_p13  ;;  %p3744_p1 = por %p3743_p0, %p3742_p12 }
  0x42   : > { %p3738_p9 = pneg %p3737_p7 }
  0x44   : > { %p3745_p4 = pnand %p3744_p1, %p3738_p9 }
  0x46   : > { %3748 = shalt.err (!%p3745_p4)
}
  0x47   : > { %s3931_s11 = smov 512   ;;  %s3932_s29 = smov 32  }
  0x48   : > { %3351 = dma.hbm_to_vmem [thread:$0]  (!%p4038_p11), %s5966_s3, 8192, %s4042_s10, [#allocation9], %s3931_s11, %s3931_s11, %s3932_s29  }
  0x49   : > { %s3933_s14 = smov [#allocation7]   ;;  %s3934_s17 = smov [#allocation10]  }
  0x4a   : > { %s205_s15 = sshll.u32 %s3933_s14, 4  ;;  %s231_s24 = sshll.u32 %s3934_s17, 4  ;;  %s206_s15 = int_to_ptr.vmem [resolvable:$true] %s205_s15  ;;  %s4099_s24 = int_to_ptr.vmem [resolvable:$true] %s231_s24 }
  0x4b   : > { %s3749_s6 = scalar_lea.hbm %s5965_s2, 8192 }
  0x4c   : > { %p3750_p6 = scmp.ne.s32.totalorder %s5965_s2, %s3749_s6  ;;  %p3756_p5 = scmp.lt.u32.totalorder %s3749_s6, %s5965_s2 }
  0x4e   : > { %p3752_p10 = pnand %p3750_p6, %p4052_p13 }
  0x50   : > { %p3753_p3 = pneg %p3752_p10 }
  0x52   : > { %p3758_p7 = pnand %p3756_p5, %p3753_p3 }
  0x54   : > { %3761 = shalt.err (!%p3758_p7)
}
  0x55   : > { %s3762_s11 = scalar_lea.vmem %s206_s15, 8192  ;;  %p3770_p1 = scmp.lt.s32.totalorder %s206_s15, %s206_s15 }
  0x56   : > { %p3763_p9 = scmp.ne.s32.totalorder %s206_s15, %s3762_s11  ;;  %p3771_p4 = scmp.lt.s32.totalorder %s3762_s11, %s3762_s11 }
  0x58   : > { %p3765_p12 = pnand %p3763_p9, %p4052_p13  ;;  %p3772_p8 = por %p3771_p4, %p3770_p1 }
  0x5a   : > { %p3766_p0 = pneg %p3765_p12 }
  0x5c   : > { %p3773_p2 = pnand %p3772_p8, %p3766_p0 }
  0x5e   : > { %3776 = shalt.err (!%p3773_p2)
}
  0x5f   : > { %s6042_s1 = smov 8   ;;  %s6043_s9 = smov 128  }
  0x60   : > { %3348 = dma.hbm_to_vmem [thread:$0]  (!%p4038_p11), %s5965_s2, 8192, %s206_s15, [#allocation6], %s6043_s9, %s6043_s9, %s6042_s1  }
  0x61   : > { %s3777_s17 = scalar_lea.hbm %s5967_s4, 2048 }
  0x62   : > { %p3778_p6 = scmp.ne.s32.totalorder %s5967_s4, %s3777_s17  ;;  %p3784_p10 = scmp.lt.u32.totalorder %s3777_s17, %s5967_s4 }
  0x64   : > { %p3780_p2 = pnand %p3778_p6, %p4052_p13 }
  0x66   : > { %p3781_p8 = pneg %p3780_p2 }
  0x68   : > { %p3786_p3 = pnand %p3784_p10, %p3781_p8 }
  0x6a   : > { %3789 = shalt.err (!%p3786_p3)
}
  0x6b   : > { %s3790_s15 = scalar_lea.vmem %s4099_s24, 2048  ;;  %p3798_p12 = scmp.lt.s32.totalorder %s4099_s24, %s4099_s24 }
  0x6c   : > { %p3791_p5 = scmp.ne.s32.totalorder %s4099_s24, %s3790_s15  ;;  %p3799_p0 = scmp.lt.s32.totalorder %s3790_s15, %s3790_s15 }
  0x6e   : > { %p3793_p7 = pnand %p3791_p5, %p4052_p13  ;;  %p3800_p1 = por %p3799_p0, %p3798_p12 }
  0x70   : > { %p3794_p9 = pneg %p3793_p7 }
  0x72   : > { %p3801_p4 = pnand %p3800_p1, %p3794_p9 }
  0x74   : > { %3804 = shalt.err (!%p3801_p4)
}
  0x75   : > { %3354 = dma.hbm_to_vmem [thread:$0]  (!%p4038_p11), %s5967_s4, 2048, %s4099_s24, [#allocation9], %s6043_s9, %s6043_s9, %s6042_s1  }
  0x76   : > { %s35_s8 = sadd.s32 1, %s3921_s22  ;;  %s44_s16 = sadd.s32 1, %s3913_s20 }
  0x77   : > { %p37_p13 = scmp.ge.s32.totalorder %s35_s8, 2  ;;  %p51_p6 = scmp.ne.s32.totalorder %s3913_s20, %s3909_s19 }
  0x78   : > { %p52_p2 = scmp.eq.s32.totalorder %s3925_s23, 0  ;;  %p3367_p8 = scmp.lt.s32.totalorder %s3925_s23, 2 }
  0x79   : > { %s6363_s8 = smov (%p37_p13, %s35_s8), 0  ;;  %p6044_p3 = scmp.ne.s32.totalorder %s6034_s27, 0 }
  0x7a   : > { %p53_p10 = por %p52_p2, %p51_p6  ;;  %s39_s13 = ssub.s32 %s3921_s22, %s6363_s8 }
  0x7b   : > { %p4158_p5 = por %p6044_p3, %p51_p6  ;;  %s245_s14 = sand.u32 1, %s3913_s20  }
  0x7c   : > { %p42_p7 = scmp.eq.s32.totalorder %s39_s13, 0  ;;  %s3065_s24 = sshll.u32 %s245_s14, 8 }
  0x7d   : > { %s3080_s1 = sshll.u32 %s3921_s22, 12  ;;  %s249_s27 = scalar_lea.vmem [#allocation2], %s3065_s24 }
  0x7e   : > { %s4167_s9 = scalar_select %p42_p7, %s3913_s20, %s44_s16  }
  0x7f   : > { %s4172_s7 = scalar_lea.hbm %s5963_s0, %s3080_s1  ;;  %s258_s12 = sshll.u32 %s249_s27, 4  ;;  %s4180_s12 = int_to_ptr.vmem [resolvable:$true] %s258_s12 }
  0x80   : > { %p4176_p11 = pnand %p3367_p8, %p53_p10  ;;  %s4182_s15 = scalar_lea.sflag [#allocation3], %s245_s14 }
  0x81   : > { %s3805_s11 = scalar_lea.hbm %s4172_s7, 4096  ;;  %s3810_s13 = scalar_lea.hbm %s5963_s0, 8192 }
  0x82   : > { %p3806_p9 = scmp.ne.s32.totalorder %s4172_s7, %s3805_s11  ;;  %p3807_p12 = pneg %p4176_p11 }
  0x83   : > { %p3811_p4 = scmp.lt.u32.totalorder %s4172_s7, %s5963_s0  ;;  %p3812_p13 = scmp.lt.u32.totalorder %s3810_s13, %s3805_s11 }
  0x84   : > { %p3808_p0 = pnand %p3807_p12, %p3806_p9  ;;  %p3814_p2 = scmp.lt.u32.totalorder %s3805_s11, %s4172_s7 }
  0x85   : > { %p3813_p6 = por %p3812_p13, %p3811_p4 }
  0x86   : > { %p3809_p1 = pneg %p3808_p0 }
  0x87   : > { %p3815_p8 = por %p3814_p2, %p3813_p6 }
  0x89   : > { %p3816_p10 = pnand %p3815_p8, %p3809_p1 }
  0x8b   : > { %3819 = shalt.err (!%p3816_p10)
}
  0x8c   : > { %s3820_s14 = scalar_lea.vmem %s4180_s12, 4096  ;;  %s3935_s17 = smov [#allocation2]  }
  0x8d   : > { %p3821_p3 = scmp.ne.s32.totalorder %s4180_s12, %s3820_s14  ;;  %s3825_s25 = sshll.u32 %s3935_s17, 4  ;;  %s3826_s25 = int_to_ptr.vmem [resolvable:$false] %s3825_s25 }
  0x8e   : > { %s3827_s27 = scalar_lea.vmem %s3826_s25, 8192  ;;  %p3828_p0 = scmp.lt.s32.totalorder %s4180_s12, %s3826_s25 }
  0x8f   : > { %p3823_p7 = pnand %p3821_p3, %p3807_p12  ;;  %p3829_p4 = scmp.lt.s32.totalorder %s3827_s27, %s3820_s14 }
  0x91   : > { %p3824_p9 = pneg %p3823_p7  ;;  %p3830_p13 = por %p3829_p4, %p3828_p0 }
  0x93   : > { %p3831_p6 = pnand %p3830_p13, %p3824_p9 }
  0x95   : > { %3834 = shalt.err (!%p3831_p6)
}
  0x96   : > { %s3936_s11 = smov 256   ;;  %s3937_s29 = smov 16  }
  0x97   : > { %3358 = dma.hbm_to_vmem [thread:$0]  (!%p4176_p11), %s4172_s7, 4096, %s4180_s12, %s4182_s15, %s3936_s11, %s3936_s11, %s3937_s29  }
  0x98   : > { %p6047_p12 = scmp.ne.s32.totalorder %s6038_s30, 0 }
  0x9a   : > { %270 = sbr.rel (%p6047_p12) target bundleno = 1070 (0x42e), region = 40 }
  0xa1   : > { %s4213_s16 = sand.u32 1, %s3909_s19   ;;  %p6048_p1 = scmp.ne.s32.totalorder %s6035_s28, 0 }
  0xa2   : > { %s3069_s13 = sshll.u32 %s4213_s16, 8  ;;  %s273_s24 = scalar_lea.sflag [#allocation3], %s4213_s16 }
  0xa3   : > { %s4219_s1 = scalar_lea.vmem [#allocation2], %s3069_s13 }
  0xa4   : > { %3888 = dma.done.wait (%p6048_p1), %s273_s24, 4096  }
  0xa5   : > { %3890 = vsyncadd (%p6048_p1), %s273_s24, 4294963200  ;;  %p6049_p11 = scmp.ne.s32.totalorder %s6033_s26, 0 }
  0xa7   : > { %3892 = dma.done.wait (%p6049_p11), [#allocation6], 16384  }
  0xa8   : > { %3894 = vsyncadd (%p6049_p11), [#allocation6], 4294950912 }
  0xa9   : > { %3896 = dma.done.wait (%p6049_p11), [#allocation9], 10240  }
  0xaa   : > { %3898 = vsyncadd (%p6049_p11), [#allocation9], 4294957056  ;;  %v3938_v0 = vmov 0.0   ;;  %v3939_v1 = vmov 0   ;;  %v322_v2 = vld [vmem:[%s4219_s1 + $0x8] sm:$0xff]  ;;  %v324_v3 = vld [vmem:[%s4219_s1 + $0x18] sm:$0xff] }
  0xab   : > { %865 = vmatprep.mubr.f32.mxu0 %v3938_v0  ;;  %1153 = vmatprep.mubr.f32.mxu1 %v3938_v0  ;;  %v321_v4 = vld [vmem:[%s4219_s1] sm:$0xff]  ;;  %v3082_v5 = vpack.c.bf16 %v324_v3, %v322_v2  ;;  %v323_v6 = vld [vmem:[%s4219_s1 + $0x10] sm:$0xff]  ;;  %v326_v7 = vld [vmem:[%s4219_s1 + $0x28] sm:$0xff]  ;;  %s5873_s26 = scalar_lea.vmem [#allocation11], %s3069_s13  ;;  %s3081_s28 = sshll.u32 %s3917_s21, 12 }
  0xac   : > { %3435 = vset.pattern.permute.xlu0 %v3939_v1  ;;  %3436 = vset.pattern.permute.xlu1 %v3939_v1  ;;  %v328_v8 = vld [vmem:[%s4219_s1 + $0x38] sm:$0xff]  ;;  %v3084_v9 = vpack.c.bf16 %v323_v6, %v321_v4  ;;  %v325_v11 = vld [vmem:[%s4219_s1 + $0x20] sm:$0xff]  ;;  %v327_v12 = vld [vmem:[%s4219_s1 + $0x30] sm:$0xff]  ;;  %s2932_s30 = sshll.u32 %s5873_s26, 4  ;;  %s5910_s10 = scalar_lea.hbm %s5968_s5, %s3081_s28  ;;  %s5912_s30 = int_to_ptr.vmem [resolvable:$true] %s2932_s30 }
  0xad   : > { %v3086_v10 = vpack.c.bf16 %v328_v8, %v326_v7  ;;  %v330_v13 = vld [vmem:[%s4219_s1 + $0x48] sm:$0xff]  ;;  %3083 = vmatprep.subr.bf16.mxu0 %v3082_v5  ;;  %v332_v14 = vld [vmem:[%s4219_s1 + $0x58] sm:$0xff]  ;;  %3242 = vmatprep.subr.bf16.mxu1 %v3082_v5  ;;  %v3088_v15 = vpack.c.bf16 %v327_v12, %v325_v11  ;;  %v329_v17 = vld [vmem:[%s4219_s1 + $0x40] sm:$0xff]  ;;  %s2917_s21 = scalar_lea.sflag [#allocation4], %s4213_s16  ;;  %s3835_s15 = scalar_lea.vmem %s5912_s30, 4096 }
  0xae   : > { %3085 = vmatpush1.bf16.msra.mxu0 %v3084_v9  ;;  %3250 = vmatpush1.bf16.msra.mxu1 %v3084_v9  ;;  %v3090_v16 = vpack.c.bf16 %v332_v14, %v330_v13  ;;  %v331_v18 = vld [vmem:[%s4219_s1 + $0x50] sm:$0xff]  ;;  %v334_v19 = vld [vmem:[%s4219_s1 + $0x68] sm:$0xff]  ;;  %v336_v20 = vld [vmem:[%s4219_s1 + $0x78] sm:$0xff]  ;;  %p3836_p2 = scmp.ne.s32.totalorder %s5912_s30, %s3835_s15  ;;  %s3940_s14 = smov [#allocation11]  }
  0xaf   : > { %3087 = vmatprep.subr.bf16.mxu0 %v3086_v10  ;;  %3243 = vmatprep.subr.bf16.mxu1 %v3086_v10  ;;  %v3092_v21 = vpack.c.bf16 %v331_v18, %v329_v17  ;;  %v3094_v22 = vpack.c.bf16 %v336_v20, %v334_v19  ;;  %v333_v23 = vld [vmem:[%s4219_s1 + $0x60] sm:$0xff]  ;;  %v335_v24 = vld [vmem:[%s4219_s1 + $0x70] sm:$0xff]  ;;  %v338_v25 = vld [vmem:[%s4219_s1 + $0x88] sm:$0xff]  ;;  %s3839_s17 = sshll.u32 %s3940_s14, 4  ;;  %s3840_s17 = int_to_ptr.vmem [resolvable:$false] %s3839_s17 }
  0xb0   : > { %v340_v26 = vld [vmem:[%s4219_s1 + $0x98] sm:$0xff]  ;;  %v3096_v27 = vpack.c.bf16 %v335_v24, %v333_v23  ;;  %v337_v29 = vld [vmem:[%s4219_s1 + $0x80] sm:$0xff]  ;;  %v339_v30 = vld [vmem:[%s4219_s1 + $0x90] sm:$0xff]  ;;  %p3837_p8 = pnand %p3836_p2, %p4158_p5  ;;  %s3841_s25 = scalar_lea.vmem %s3840_s17, 8192 }
  0xb1   : > { %v3098_v28 = vpack.c.bf16 %v340_v26, %v338_v25  ;;  %v417_v31 = vld [vmem:[#allocation7] sm:$0xff]  ;;  %v342_v32 = vld [vmem:[%s4219_s1 + $0xa8] sm:$0xff]  ;;  %v344_v33 = vld [vmem:[%s4219_s1 + $0xb8] sm:$0xff]  ;;  %v3100_v36 = vpack.c.bf16 %v339_v30, %v337_v29  ;;  %p3842_p3 = scmp.lt.s32.totalorder %s5912_s30, %s3840_s17  ;;  %p3843_p7 = scmp.lt.s32.totalorder %s3841_s25, %s3835_s15 }
  0xb2   : > { %3089 = vmatpush1.bf16.msra.mxu0 %v3088_v15  ;;  %3251 = vmatpush1.bf16.msra.mxu1 %v3088_v15  ;;  %v419_v34 = vld [vmem:[#allocation7 + $0x10] sm:$0xff]  ;;  %v418_v35 = vld [vmem:[#allocation7 + $0x8] sm:$0xff]  ;;  %v420_v37 = vld [vmem:[#allocation7 + $0x18] sm:$0xff]  ;;  %v3102_v38 = vpack.c.bf16 %v344_v33, %v342_v32  ;;  %p3838_p10 = pneg %p3837_p8 }
  0xb3   : > { %3091 = vmatprep.subr.bf16.mxu0 %v3090_v16  ;;  %3244 = vmatprep.subr.bf16.mxu1 %v3090_v16  ;;  %v341_v39 = vld [vmem:[%s4219_s1 + $0xa0] sm:$0xff]  ;;  %v343_v40 = vld [vmem:[%s4219_s1 + $0xb0] sm:$0xff]  ;;  %v346_v41 = vld [vmem:[%s4219_s1 + $0xc8] sm:$0xff]  ;;  %p3844_p9 = por %p3843_p7, %p3842_p3 }
  0xb4   : > { %483 = vperm.xlu0 %3435, %v417_v31   ;;  %493 = vperm.xlu1 %3436, %v419_v34   ;;  %v348_v42 = vld [vmem:[%s4219_s1 + $0xd8] sm:$0xff]  ;;  %v421_v43 = vld [vmem:[#allocation7 + $0x20] sm:$0xff]  ;;  %v3104_v44 = vpack.c.bf16 %v343_v40, %v341_v39  ;;  %v422_v45 = vld [vmem:[#allocation7 + $0x28] sm:$0xff] }
  0xb5   : > { %v3106_v46 = vpack.c.bf16 %v348_v42, %v346_v41  ;;  %v345_v47 = vld [vmem:[%s4219_s1 + $0xc0] sm:$0xff]  ;;  %v347_v48 = vld [vmem:[%s4219_s1 + $0xd0] sm:$0xff]  ;;  %v350_v49 = vld [vmem:[%s4219_s1 + $0xe8] sm:$0xff]  ;;  %p3845_p0 = pnand %p3844_p9, %p3838_p10 }
  0xb6   : > { %3093 = vmatpush1.bf16.msra.mxu0 %v3092_v21  ;;  %3252 = vmatpush1.bf16.msra.mxu1 %v3092_v21  ;;  %v352_v50 = vld [vmem:[%s4219_s1 + $0xf8] sm:$0xff]  ;;  %v423_v51 = vld [vmem:[#allocation7 + $0x30] sm:$0xff]  ;;  %v3108_v52 = vpack.c.bf16 %v347_v48, %v345_v47  ;;  %v349_v55 = vld [vmem:[%s4219_s1 + $0xe0] sm:$0xff] }
  0xb7   : > { %3095 = vmatprep.subr.bf16.mxu0 %v3094_v22  ;;  %3245 = vmatprep.subr.bf16.mxu1 %v3094_v22  ;;  %v424_v53 = vld [vmem:[#allocation7 + $0x38] sm:$0xff]  ;;  %v3110_v54 = vpack.c.bf16 %v352_v50, %v350_v49  ;;  %v351_v56 = vld [vmem:[%s4219_s1 + $0xf0] sm:$0xff]  ;;  %v425_v57 = vld [vmem:[#allocation7 + $0x40] sm:$0xff] }
  0xb8   : > { %488 = vperm.xlu0 %3435, %v418_v35   ;;  %498 = vperm.xlu1 %3436, %v420_v37   ;;  %v3112_v58 = vpack.c.bf16 %v351_v56, %v349_v55  ;;  %v426_v59 = vld [vmem:[#allocation7 + $0x48] sm:$0xff]  ;;  %v427_v60 = vld [vmem:[#allocation7 + $0x50] sm:$0xff]  ;;  %v353_v61 = vld [vmem:[#allocation5] sm:$0xff] }
  0xb9   : > { %v401_v62 = vld [vmem:[#allocation5 + $0x180] sm:$0xff]  ;;  %v428_v63 = vld [vmem:[#allocation7 + $0x58] sm:$0xff]  ;;  %v354_v2 = vld [vmem:[#allocation5 + $0x8] sm:$0xff] }
  0xba   : > { %3097 = vmatpush1.bf16.msra.mxu0 %v3096_v27  ;;  %3253 = vmatpush1.bf16.msra.mxu1 %v3096_v27  ;;  %v429_v1 = vld [vmem:[#allocation7 + $0x60] sm:$0xff]  ;;  %v402_v3 = vld [vmem:[#allocation5 + $0x188] sm:$0xff]  ;;  %v431_v5 = vld [vmem:[#allocation7 + $0x70] sm:$0xff] }
  0xbb   : > { %3099 = vmatprep.subr.bf16.mxu0 %v3098_v28  ;;  %3246 = vmatprep.subr.bf16.mxu1 %v3098_v28  ;;  %v430_v4 = vld [vmem:[#allocation7 + $0x68] sm:$0xff]  ;;  %v355_v6 = vld [vmem:[#allocation5 + $0x10] sm:$0xff]  ;;  %v432_v8 = vld [vmem:[#allocation7 + $0x78] sm:$0xff] }
  0xbc   : > { %503 = vperm.xlu0 %3435, %v421_v43   ;;  %508 = vperm.xlu1 %3436, %v422_v45   ;;  %v403_v7 = vld [vmem:[#allocation5 + $0x190] sm:$0xff]  ;;  %v433_v9 = vld [vmem:[#allocation7 + $0x80] sm:$0xff]  ;;  %v356_v10 = vld [vmem:[#allocation5 + $0x18] sm:$0xff] }
  0xbd   : > { %v404_v11 = vld [vmem:[#allocation5 + $0x198] sm:$0xff]  ;;  %v434_v12 = vld [vmem:[#allocation7 + $0x88] sm:$0xff]  ;;  %v435_v13 = vld [vmem:[#allocation7 + $0x90] sm:$0xff] }
  0xbe   : > { %3101 = vmatpush1.bf16.msra.mxu0 %v3100_v36  ;;  %3254 = vmatpush1.bf16.msra.mxu1 %v3100_v36  ;;  %v357_v14 = vld [vmem:[#allocation5 + $0x20] sm:$0xff]  ;;  %v436_v16 = vld [vmem:[#allocation7 + $0x98] sm:$0xff]  ;;  %v358_v18 = vld [vmem:[#allocation5 + $0x28] sm:$0xff] }
  0xbf   : > { %3103 = vmatprep.subr.bf16.mxu0 %v3102_v38  ;;  %3247 = vmatprep.subr.bf16.mxu1 %v3102_v38  ;;  %v405_v15 = vld [vmem:[#allocation5 + $0x1a0] sm:$0xff]  ;;  %v406_v19 = vld [vmem:[#allocation5 + $0x1a8] sm:$0xff]  ;;  %v439_v21 = vld [vmem:[#allocation7 + $0xb0] sm:$0xff] }
  0xc0   : > { %513 = vperm.xlu0 %3435, %v423_v51   ;;  %518 = vperm.xlu1 %3436, %v424_v53   ;;  %v437_v17 = vld [vmem:[#allocation7 + $0xa0] sm:$0xff]  ;;  %v438_v20 = vld [vmem:[#allocation7 + $0xa8] sm:$0xff]  ;;  %v359_v22 = vld [vmem:[#allocation5 + $0x30] sm:$0xff] }
  0xc1   : > { %v407_v23 = vld [vmem:[#allocation5 + $0x1b0] sm:$0xff]  ;;  %v440_v24 = vld [vmem:[#allocation7 + $0xb8] sm:$0xff]  ;;  %v441_v25 = vld [vmem:[#allocation7 + $0xc0] sm:$0xff] }
  0xc2   : > { %3105 = vmatpush1.bf16.msra.mxu0 %v3104_v44  ;;  %3255 = vmatpush1.bf16.msra.mxu1 %v3104_v44  ;;  %v360_v26 = vld [vmem:[#allocation5 + $0x38] sm:$0xff]  ;;  %v442_v28 = vld [vmem:[#allocation7 + $0xc8] sm:$0xff]  ;;  %v443_v29 = vld [vmem:[#allocation7 + $0xd0] sm:$0xff] }
  0xc3   : > { %3107 = vmatprep.subr.bf16.mxu0 %v3106_v46  ;;  %3248 = vmatprep.subr.bf16.mxu1 %v3106_v46  ;;  %v408_v27 = vld [vmem:[#allocation5 + $0x1b8] sm:$0xff]  ;;  %v361_v30 = vld [vmem:[#allocation5 + $0x40] sm:$0xff]  ;;  %v362_v34 = vld [vmem:[#allocation5 + $0x48] sm:$0xff] }
  0xc4   : > { %523 = vperm.xlu0 %3435, %v425_v57   ;;  %528 = vperm.xlu1 %3436, %v426_v59   ;;  %v409_v31 = vld [vmem:[#allocation5 + $0x1c0] sm:$0xff]  ;;  %v444_v32 = vld [vmem:[#allocation7 + $0xd8] sm:$0xff]  ;;  %v410_v35 = vld [vmem:[#allocation5 + $0x1c8] sm:$0xff] }
  0xc5   : > { %v445_v33 = vld [vmem:[#allocation7 + $0xe0] sm:$0xff]  ;;  %v446_v36 = vld [vmem:[#allocation7 + $0xe8] sm:$0xff]  ;;  %v447_v37 = vld [vmem:[#allocation7 + $0xf0] sm:$0xff] }
  0xc6   : > { %3109 = vmatpush1.bf16.msra.mxu0 %v3108_v52  ;;  %3256 = vmatpush1.bf16.msra.mxu1 %v3108_v52  ;;  %v363_v38 = vld [vmem:[#allocation5 + $0x50] sm:$0xff]  ;;  %v448_v40 = vld [vmem:[#allocation7 + $0xf8] sm:$0xff]  ;;  %v449_v41 = vld [vmem:[#allocation7 + $0x100] sm:$0xff] }
  0xc7   : > { %3111 = vmatprep.subr.bf16.mxu0 %v3110_v54  ;;  %3249 = vmatprep.subr.bf16.mxu1 %v3110_v54  ;;  %v411_v39 = vld [vmem:[#allocation5 + $0x1d0] sm:$0xff]  ;;  %v364_v42 = vld [vmem:[#allocation5 + $0x58] sm:$0xff]  ;;  %v450_v44 = vld [vmem:[#allocation7 + $0x108] sm:$0xff] }
  0xc8   : > { %533 = vperm.xlu0 %3435, %v427_v60   ;;  %538 = vperm.xlu1 %3436, %v428_v63   ;;  %v412_v43 = vld [vmem:[#allocation5 + $0x1d8] sm:$0xff]  ;;  %v451_v45 = vld [vmem:[#allocation7 + $0x110] sm:$0xff]  ;;  %v365_v46 = vld [vmem:[#allocation5 + $0x60] sm:$0xff] }
  0xc9   : > { %v413_v47 = vld [vmem:[#allocation5 + $0x1e0] sm:$0xff]  ;;  %v452_v48 = vld [vmem:[#allocation7 + $0x118] sm:$0xff]  ;;  %v366_v50 = vld [vmem:[#allocation5 + $0x68] sm:$0xff] }
  0xca   : > { %3113 = vmatpush1.bf16.msra.mxu0 %v3112_v58  ;;  %3257 = vmatpush1.bf16.msra.mxu1 %v3112_v58  ;;  %v453_v49 = vld [vmem:[#allocation7 + $0x120] sm:$0xff]  ;;  %v414_v51 = vld [vmem:[#allocation5 + $0x1e8] sm:$0xff]  ;;  %v455_v53 = vld [vmem:[#allocation7 + $0x130] sm:$0xff] }
  0xcb   : > { %v454_v52 = vld [vmem:[#allocation7 + $0x128] sm:$0xff]  ;;  %v367_v54 = vld [vmem:[#allocation5 + $0x70] sm:$0xff]  ;;  %v456_v56 = vld [vmem:[#allocation7 + $0x138] sm:$0xff] }
  0xcc   : > { %543 = vperm.xlu0 %3435, %v429_v1   ;;  %548 = vperm.xlu1 %3436, %v430_v4   ;;  %v415_v55 = vld [vmem:[#allocation5 + $0x1f0] sm:$0xff]  ;;  %v457_v57 = vld [vmem:[#allocation7 + $0x140] sm:$0xff]  ;;  %v368_v58 = vld [vmem:[#allocation5 + $0x78] sm:$0xff] }
  0xcd   : > { %866 = vmatmul.mubr.f32.vlgmr.msra.gmra.mrb[0].mxu0 %v353_v61  ;;  %1154 = vmatmul.mubr.f32.vlgmr.msra.gmra.mrb[0].mxu1 %v401_v62  ;;  %v416_v59 = vld [vmem:[#allocation5 + $0x1f8] sm:$0xff]  ;;  %v458_v60 = vld [vmem:[#allocation7 + $0x148] sm:$0xff]  ;;  %v459_v61 = vld [vmem:[#allocation7 + $0x150] sm:$0xff] }
  0xce   : > { %871 = vmatprep.mubr.f32.mxu0 %v3938_v0  ;;  %1159 = vmatprep.mubr.f32.mxu1 %v3938_v0  ;;  %v369_v62 = vld [vmem:[#allocation5 + $0x80] sm:$0xff]  ;;  %v460_v63 = vld [vmem:[#allocation7 + $0x158] sm:$0xff]  ;;  %v463_v4 = vld [vmem:[#allocation7 + $0x170] sm:$0xff] }
  0xcf   : > { %v461_v1 = vld [vmem:[#allocation7 + $0x160] sm:$0xff] }
  0xd0   : > { %553 = vperm.xlu0 %3435, %v431_v5   ;;  %558 = vperm.xlu1 %3436, %v432_v8   ;;  %v371_v5 = vld [vmem:[#allocation5 + $0x90] sm:$0xff]  ;;  %v372_v8 = vld [vmem:[#allocation5 + $0x98] sm:$0xff] }
  0xd1   : > { %872 = vmatmul.mubr.f32.gmra.mrb[2].mxu0 %v354_v2  ;;  %1160 = vmatmul.mubr.f32.gmra.mrb[2].mxu1 %v402_v3  ;;  %v370_v2 = vld [vmem:[#allocation5 + $0x88] sm:$0xff] }
  0xd2   : > { %877 = vmatprep.mubr.f32.mxu0 %v3938_v0  ;;  %1165 = vmatprep.mubr.f32.mxu1 %v3938_v0  ;;  %v462_v3 = vld [vmem:[#allocation7 + $0x168] sm:$0xff] }
  0xd4   : > { %563 = vperm.xlu0 %3435, %v433_v9   ;;  %568 = vperm.xlu1 %3436, %v434_v12   ;;  %v466_v9 = vld [vmem:[#allocation7 + $0x188] sm:$0xff]  ;;  %v468_v12 = vld [vmem:[#allocation7 + $0x198] sm:$0xff] }
  0xd5   : > { %878 = vmatmul.mubr.f32.gmra.mrb[4].mxu0 %v355_v6  ;;  %1166 = vmatmul.mubr.f32.gmra.mrb[4].mxu1 %v403_v7  ;;  %v464_v6 = vld [vmem:[#allocation7 + $0x178] sm:$0xff]  ;;  %v465_v7 = vld [vmem:[#allocation7 + $0x180] sm:$0xff] }
  0xd6   : > { %883 = vmatprep.mubr.f32.mxu0 %v3938_v0  ;;  %1171 = vmatprep.mubr.f32.mxu1 %v3938_v0 }
  0xd8   : > { %573 = vperm.xlu0 %3435, %v435_v13   ;;  %578 = vperm.xlu1 %3436, %v436_v16   ;;  %v469_v13 = vld [vmem:[#allocation7 + $0x1a0] sm:$0xff]  ;;  %v471_v16 = vld [vmem:[#allocation7 + $0x1b0] sm:$0xff] }
  0xd9   : > { %884 = vmatmul.mubr.f32.gmra.mrb[6].mxu0 %v356_v10  ;;  %1172 = vmatmul.mubr.f32.gmra.mrb[6].mxu1 %v404_v11  ;;  %v467_v10 = vld [vmem:[#allocation7 + $0x190] sm:$0xff]  ;;  %v373_v11 = vld [vmem:[#allocation5 + $0xa0] sm:$0xff] }
  0xda   : > { %889 = vmatprep.mubr.f32.mxu0 %v3938_v0  ;;  %1177 = vmatprep.mubr.f32.mxu1 %v3938_v0 }
  0xdc   : > { %583 = vperm.xlu0 %3435, %v437_v17   ;;  %588 = vperm.xlu1 %3436, %v438_v20   ;;  %v375_v17 = vld [vmem:[#allocation5 + $0xb0] sm:$0xff]  ;;  %v376_v20 = vld [vmem:[#allocation5 + $0xb8] sm:$0xff] }
  0xdd   : > { %890 = vmatmul.mubr.f32.gmra.mrb[8].mxu0 %v357_v14  ;;  %1178 = vmatmul.mubr.f32.gmra.mrb[8].mxu1 %v405_v15  ;;  %v374_v14 = vld [vmem:[#allocation5 + $0xa8] sm:$0xff] }
  0xde   : > { %895 = vmatprep.mubr.f32.mxu0 %v3938_v0  ;;  %1183 = vmatprep.mubr.f32.mxu1 %v3938_v0  ;;  %v470_v15 = vld [vmem:[#allocation7 + $0x1a8] sm:$0xff] }
  0xe0   : > { %593 = vperm.xlu0 %3435, %v439_v21   ;;  %598 = vperm.xlu1 %3436, %v440_v24   ;;  %v474_v21 = vld [vmem:[#allocation7 + $0x1c8] sm:$0xff]  ;;  %v476_v24 = vld [vmem:[#allocation7 + $0x1d8] sm:$0xff] }
  0xe1   : > { %896 = vmatmul.mubr.f32.gmra.mrb[10].mxu0 %v358_v18  ;;  %1184 = vmatmul.mubr.f32.gmra.mrb[10].mxu1 %v406_v19  ;;  %v472_v18 = vld [vmem:[#allocation7 + $0x1b8] sm:$0xff]  ;;  %v473_v19 = vld [vmem:[#allocation7 + $0x1c0] sm:$0xff] }
  0xe2   : > { %901 = vmatprep.mubr.f32.mxu0 %v3938_v0  ;;  %1189 = vmatprep.mubr.f32.mxu1 %v3938_v0 }
  0xe4   : > { %603 = vperm.xlu0 %3435, %v441_v25   ;;  %608 = vperm.xlu1 %3436, %v442_v28   ;;  %v477_v25 = vld [vmem:[#allocation7 + $0x1e0] sm:$0xff]  ;;  %v479_v28 = vld [vmem:[#allocation7 + $0x1f0] sm:$0xff] }
  0xe5   : > { %902 = vmatmul.mubr.f32.gmra.mrb[12].mxu0 %v359_v22  ;;  %1190 = vmatmul.mubr.f32.gmra.mrb[12].mxu1 %v407_v23  ;;  %v475_v22 = vld [vmem:[#allocation7 + $0x1d0] sm:$0xff]  ;;  %v377_v23 = vld [vmem:[#allocation5 + $0xc0] sm:$0xff] }
  0xe6   : > { %907 = vmatprep.mubr.f32.mxu0 %v3938_v0  ;;  %1195 = vmatprep.mubr.f32.mxu1 %v3938_v0 }
  0xe8   : > { %613 = vperm.xlu0 %3435, %v443_v29   ;;  %618 = vperm.xlu1 %3436, %v444_v32   ;;  %v379_v29 = vld [vmem:[#allocation5 + $0xd0] sm:$0xff]  ;;  %v380_v32 = vld [vmem:[#allocation5 + $0xd8] sm:$0xff] }
  0xe9   : > { %908 = vmatmul.mubr.f32.gmra.mrb[14].mxu0 %v360_v26  ;;  %1196 = vmatmul.mubr.f32.gmra.mrb[14].mxu1 %v408_v27  ;;  %v378_v26 = vld [vmem:[#allocation5 + $0xc8] sm:$0xff] }
  0xea   : > { %913 = vmatprep.mubr.f32.mxu0 %v3938_v0  ;;  %1201 = vmatprep.mubr.f32.mxu1 %v3938_v0  ;;  %v478_v27 = vld [vmem:[#allocation7 + $0x1e8] sm:$0xff] }
  0xec   : > { %623 = vperm.xlu0 %3435, %v445_v33   ;;  %628 = vperm.xlu1 %3436, %v446_v36   ;;  %v2468_v36 = vld [vmem:[#allocation10 + $0x10] sm:$0xff] }
  0xed   : > { %914 = vmatmul.mubr.f32.gmra.mrb[16].mxu0 %v361_v30  ;;  %1202 = vmatmul.mubr.f32.gmra.mrb[16].mxu1 %v409_v31  ;;  %v480_v30 = vld [vmem:[#allocation7 + $0x1f8] sm:$0xff]  ;;  %v2466_v31 = vld [vmem:[#allocation10] sm:$0xff] }
  0xee   : > { %919 = vmatprep.mubr.f32.mxu0 %v3938_v0  ;;  %1207 = vmatprep.mubr.f32.mxu1 %v3938_v0 }
  0xf0   : > { %633 = vperm.xlu0 %3435, %v447_v37   ;;  %638 = vperm.xlu1 %3436, %v448_v40   ;;  %v381_v37 = vld [vmem:[#allocation5 + $0xe0] sm:$0xff]  ;;  %v2469_v40 = vld [vmem:[#allocation10 + $0x18] sm:$0xff] }
  0xf1   : > { %920 = vmatmul.mubr.f32.gmra.mrb[18].mxu0 %v362_v34  ;;  %1208 = vmatmul.mubr.f32.gmra.mrb[18].mxu1 %v410_v35  ;;  %v2467_v35 = vld [vmem:[#allocation10 + $0x8] sm:$0xff] }
  0xf2   : > { %925 = vmatprep.mubr.f32.mxu0 %v3938_v0  ;;  %1213 = vmatprep.mubr.f32.mxu1 %v3938_v0 }
  0xf4   : > { %643 = vperm.xlu0 %3435, %v449_v41   ;;  %648 = vperm.xlu1 %3436, %v450_v44   ;;  %v2470_v41 = vld [vmem:[#allocation10 + $0x20] sm:$0xff] }
  0xf5   : > { %926 = vmatmul.mubr.f32.gmra.mrb[20].mxu0 %v363_v38  ;;  %1214 = vmatmul.mubr.f32.gmra.mrb[20].mxu1 %v411_v39 }
  0xf6   : > { %931 = vmatprep.mubr.f32.mxu0 %v3938_v0  ;;  %1219 = vmatprep.mubr.f32.mxu1 %v3938_v0 }
  0xf8   : > { %653 = vperm.xlu0 %3435, %v451_v45   ;;  %658 = vperm.xlu1 %3436, %v452_v48   ;;  %v2471_v45 = vld [vmem:[#allocation10 + $0x28] sm:$0xff] }
  0xf9   : > { %932 = vmatmul.mubr.f32.gmra.mrb[22].mxu0 %v364_v42  ;;  %1220 = vmatmul.mubr.f32.gmra.mrb[22].mxu1 %v412_v43  ;;  %v382_v42 = vld [vmem:[#allocation5 + $0xe8] sm:$0xff] }
  0xfa   : > { %937 = vmatprep.mubr.f32.mxu0 %v3938_v0  ;;  %1225 = vmatprep.mubr.f32.mxu1 %v3938_v0 }
  0xfc   : > { %663 = vperm.xlu0 %3435, %v453_v49   ;;  %668 = vperm.xlu1 %3436, %v454_v52   ;;  %v384_v52 = vld [vmem:[#allocation5 + $0xf8] sm:$0xff] }
  0xfd   : > { %938 = vmatmul.mubr.f32.gmra.mrb[24].mxu0 %v365_v46  ;;  %1226 = vmatmul.mubr.f32.gmra.mrb[24].mxu1 %v413_v47  ;;  %v2472_v46 = vld [vmem:[#allocation10 + $0x30] sm:$0xff] }
  0xfe   : > { %943 = vmatprep.mubr.f32.mxu0 %v3938_v0  ;;  %1231 = vmatprep.mubr.f32.mxu1 %v3938_v0  ;;  %v383_v47 = vld [vmem:[#allocation5 + $0xf0] sm:$0xff] }
 0x100   : > { %673 = vperm.xlu0 %3435, %v455_v53   ;;  %678 = vperm.xlu1 %3436, %v456_v56   ;;  %v2476_v56 = vld [vmem:[#allocation10 + $0x50] sm:$0xff] }
 0x101   : > { %944 = vmatmul.mubr.f32.gmra.mrb[26].mxu0 %v366_v50  ;;  %1232 = vmatmul.mubr.f32.gmra.mrb[26].mxu1 %v414_v51  ;;  %v2473_v50 = vld [vmem:[#allocation10 + $0x38] sm:$0xff]  ;;  %v2474_v51 = vld [vmem:[#allocation10 + $0x40] sm:$0xff] }
 0x102   : > { %949 = vmatprep.mubr.f32.mxu0 %v3938_v0  ;;  %1237 = vmatprep.mubr.f32.mxu1 %v3938_v0 }
 0x104   : > { %683 = vperm.xlu0 %3435, %v457_v57   ;;  %688 = vperm.xlu1 %3436, %v458_v60   ;;  %v385_v57 = vld [vmem:[#allocation5 + $0x100] sm:$0xff] }
 0x105   : > { %950 = vmatmul.mubr.f32.gmra.mrb[28].mxu0 %v367_v54  ;;  %1238 = vmatmul.mubr.f32.gmra.mrb[28].mxu1 %v415_v55  ;;  %v2475_v55 = vld [vmem:[#allocation10 + $0x48] sm:$0xff]  ;;  %v2478_v60 = vld [vmem:[#allocation10 + $0x60] sm:$0xff] }
 0x106   : > { %955 = vmatprep.mubr.f32.mxu0 %v3938_v0  ;;  %1243 = vmatprep.mubr.f32.mxu1 %v3938_v0 }
 0x108   : > { %693 = vperm.xlu0 %3435, %v459_v61   ;;  %698 = vperm.xlu1 %3436, %v460_v63   ;;  %v386_v61 = vld [vmem:[#allocation5 + $0x108] sm:$0xff] }
 0x109   : > { %956 = vmatmul.mubr.f32.gmra.mrb[30].mxu0 %v368_v58  ;;  %1244 = vmatmul.mubr.f32.gmra.mrb[30].mxu1 %v416_v59  ;;  %v2477_v59 = vld [vmem:[#allocation10 + $0x58] sm:$0xff] }
 0x10a   : > { %961 = vmatprep.mubr.f32.mxu0 %v3938_v0 }
 0x10c   : > { %703 = vperm.xlu0 %3435, %v461_v1   ;;  %708 = vperm.xlu1 %3436, %v462_v3   ;;  %v2479_v1 = vld [vmem:[#allocation10 + $0x68] sm:$0xff]  ;;  %v387_v3 = vld [vmem:[#allocation5 + $0x110] sm:$0xff] }
 0x10d   : > { %962 = vmatmul.mubr.f32.gmra.mrb[32].mxu0 %v369_v62 }
 0x10e   : > { %967 = vmatprep.mubr.f32.mxu0 %v3938_v0 }
 0x110   : > { %713 = vperm.xlu0 %3435, %v463_v4   ;;  %718 = vperm.xlu1 %3436, %v464_v6   ;;  %v2481_v6 = vld [vmem:[#allocation10 + $0x78] sm:$0xff] }
 0x111   : > { %968 = vmatmul.mubr.f32.gmra.mrb[34].mxu0 %v370_v2  ;;  %v2480_v2 = vld [vmem:[#allocation10 + $0x70] sm:$0xff] }
 0x112   : > { %973 = vmatprep.mubr.f32.mxu0 %v3938_v0 }
 0x114   : > { %723 = vperm.xlu0 %3435, %v465_v7   ;;  %728 = vperm.xlu1 %3436, %v466_v9   ;;  %v388_v7 = vld [vmem:[#allocation5 + $0x118] sm:$0xff] }
 0x115   : > { %974 = vmatmul.mubr.f32.gmra.mrb[36].mxu0 %v371_v5 }
 0x116   : > { %979 = vmatprep.mubr.f32.mxu0 %v3938_v0 }
 0x118   : > { %733 = vperm.xlu0 %3435, %v467_v10   ;;  %738 = vperm.xlu1 %3436, %v468_v12   ;;  %v389_v10 = vld [vmem:[#allocation5 + $0x120] sm:$0xff] }
 0x119   : > { %980 = vmatmul.mubr.f32.gmra.mrb[38].mxu0 %v372_v8 }
 0x11a   : > { %985 = vmatprep.mubr.f32.mxu0 %v3938_v0 }
 0x11c   : > { %743 = vperm.xlu0 %3435, %v469_v13   ;;  %748 = vperm.xlu1 %3436, %v470_v15   ;;  %v390_v13 = vld [vmem:[#allocation5 + $0x128] sm:$0xff] }
 0x11d   : > { %986 = vmatmul.mubr.f32.gmra.mrb[40].mxu0 %v373_v11 }
 0x11e   : > { %991 = vmatprep.mubr.f32.mxu0 %v3938_v0 }
 0x120   : > { %753 = vperm.xlu0 %3435, %v471_v16   ;;  %758 = vperm.xlu1 %3436, %v472_v18   ;;  %v391_v16 = vld [vmem:[#allocation5 + $0x130] sm:$0xff] }
 0x121   : > { %992 = vmatmul.mubr.f32.gmra.mrb[42].mxu0 %v374_v14 }
 0x122   : > { %997 = vmatprep.mubr.f32.mxu0 %v3938_v0 }
 0x124   : > { %763 = vperm.xlu0 %3435, %v473_v19   ;;  %768 = vperm.xlu1 %3436, %v474_v21   ;;  %v392_v19 = vld [vmem:[#allocation5 + $0x138] sm:$0xff] }
 0x125   : > { %998 = vmatmul.mubr.f32.gmra.mrb[44].mxu0 %v375_v17 }
 0x126   : > { %1003 = vmatprep.mubr.f32.mxu0 %v3938_v0 }
 0x128   : > { %773 = vperm.xlu0 %3435, %v475_v22   ;;  %778 = vperm.xlu1 %3436, %v476_v24   ;;  %v393_v22 = vld [vmem:[#allocation5 + $0x140] sm:$0xff] }
 0x129   : > { %1004 = vmatmul.mubr.f32.gmra.mrb[46].mxu0 %v376_v20 }
 0x12a   : > { %1009 = vmatprep.mubr.f32.mxu0 %v3938_v0 }
 0x12c   : > { %783 = vperm.xlu0 %3435, %v477_v25   ;;  %788 = vperm.xlu1 %3436, %v478_v27   ;;  %v394_v25 = vld [vmem:[#allocation5 + $0x148] sm:$0xff] }
 0x12d   : > { %1010 = vmatmul.mubr.f32.gmra.mrb[48].mxu0 %v377_v23 }
 0x12e   : > { %1015 = vmatprep.mubr.f32.mxu0 %v3938_v0 }
 0x130   : > { %793 = vperm.xlu0 %3435, %v479_v28   ;;  %798 = vperm.xlu1 %3436, %v480_v30   ;;  %v395_v28 = vld [vmem:[#allocation5 + $0x150] sm:$0xff] }
 0x131   : > { %1016 = vmatmul.mubr.f32.gmra.mrb[50].mxu0 %v378_v26 }
 0x132   : > { %1021 = vmatprep.mubr.f32.mxu0 %v3938_v0 }
 0x133   : > { %v4309_v33 = vpop.permute.xlu0 %483  ;;  %v4311_v34 = vpop.permute.xlu1 %493 }
 0x134   : > { %2484 = vperm.xlu0 %3435, %v2466_v31   ;;  %2489 = vperm.xlu1 %3436, %v2467_v35   ;;  %v396_v31 = vld [vmem:[#allocation5 + $0x158] sm:$0xff] }
 0x135   : > { %1022 = vmatmul.mubr.f32.gmra.mrb[52].mxu0 %v379_v29 }
 0x136   : > { %1027 = vmatprep.mubr.f32.mxu0 %v3938_v0 }
 0x137   : > { %v4314_v38 = vpop.permute.xlu0 %488  ;;  %v4316_v39 = vpop.permute.xlu1 %498 }
 0x138   : > { %2494 = vperm.xlu0 %3435, %v2468_v36   ;;  %2499 = vperm.xlu1 %3436, %v2469_v40   ;;  %v397_v36 = vld [vmem:[#allocation5 + $0x160] sm:$0xff] }
 0x139   : > { %1028 = vmatmul.mubr.f32.gmra.mrb[54].mxu0 %v380_v32 }
 0x13a   : > { %1033 = vmatprep.mubr.f32.mxu0 %v3938_v0 }
 0x13b   : > { %v4319_v43 = vpop.permute.xlu0 %503  ;;  %v4321_v44 = vpop.permute.xlu1 %508 }
 0x13c   : > { %2504 = vperm.xlu0 %3435, %v2470_v41   ;;  %2509 = vperm.xlu1 %3436, %v2471_v45   ;;  %v398_v41 = vld [vmem:[#allocation5 + $0x168] sm:$0xff] }
 0x13d   : > { %1034 = vmatmul.mubr.f32.gmra.mrb[56].mxu0 %v381_v37 }
 0x13e   : > { %1039 = vmatprep.mubr.f32.mxu0 %v3938_v0 }
 0x13f   : > { %v4324_v48 = vpop.permute.xlu0 %513  ;;  %v4326_v49 = vpop.permute.xlu1 %518 }
 0x140   : > { %2514 = vperm.xlu0 %3435, %v2472_v46   ;;  %2519 = vperm.xlu1 %3436, %v2473_v50   ;;  %v399_v46 = vld [vmem:[#allocation5 + $0x170] sm:$0xff] }
 0x141   : > { %1040 = vmatmul.mubr.f32.gmra.mrb[58].mxu0 %v382_v42 }
 0x142   : > { %1045 = vmatprep.mubr.f32.mxu0 %v3938_v0 }
 0x143   : > { %v4329_v53 = vpop.permute.xlu0 %523  ;;  %v4331_v54 = vpop.permute.xlu1 %528 }
 0x144   : > { %2524 = vperm.xlu0 %3435, %v2474_v51   ;;  %2529 = vperm.xlu1 %3436, %v2475_v55   ;;  %v400_v51 = vld [vmem:[#allocation5 + $0x178] sm:$0xff] }
 0x145   : > { %1046 = vmatmul.mubr.f32.gmra.mrb[60].mxu0 %v383_v47 }
 0x146   : > { %1051 = vmatprep.mubr.f32.mxu0 %v3938_v0 }
 0x147   : > { %v4334_v58 = vpop.permute.xlu0 %533  ;;  %v4337_v62 = vpop.permute.xlu1 %538 }
 0x148   : > { %2534 = vperm.xlu0 %3435, %v2476_v56   ;;  %2539 = vperm.xlu1 %3436, %v2477_v59  }
 0x149   : > { %1052 = vmatmul.mubr.f32.gmra.mrb[62].mxu0 %v384_v52 }
 0x14a   : > { %1057 = vmatprep.mubr.f32.mxu0 %v3938_v0 }
 0x14b   : > { %v4339_v63 = vpop.permute.xlu0 %543  ;;  %v4342_v4 = vpop.permute.xlu1 %548 }
 0x14c   : > { %2544 = vperm.xlu0 %3435, %v2478_v60   ;;  %2549 = vperm.xlu1 %3436, %v2479_v1  }
 0x14d   : > { %1058 = vmatmul.mubr.f32.gmra.mrb[64].mxu0 %v385_v57 }
 0x14e   : > { %1063 = vmatprep.mubr.f32.mxu0 %v3938_v0 }
 0x14f   : > { %v4344_v5 = vpop.permute.xlu0 %553  ;;  %v4347_v8 = vpop.permute.xlu1 %558 }
 0x150   : > { %2554 = vperm.xlu0 %3435, %v2480_v2   ;;  %6050 = vst [vmem:[#allocation17_spill] sm:$0xff] %v4347_v8  ;;  %2559 = vperm.xlu1 %3436, %v2481_v6  }
 0x151   : > { %1064 = vmatmul.mubr.f32.gmra.mrb[66].mxu0 %v386_v61 }
 0x152   : > { %1069 = vmatprep.mubr.f32.mxu0 %v3938_v0 }
 0x153   : > { %v4349_v9 = vpop.permute.xlu0 %563  ;;  %v4352_v11 = vpop.permute.xlu1 %568 }
 0x154   : > { %6051 = vst [vmem:[#allocation18_spill] sm:$0xff] %v4349_v9  ;;  %6052 = vst [vmem:[#allocation19_spill] sm:$0xff] %v4352_v11 }
 0x155   : > { %1070 = vmatmul.mubr.f32.gmra.mrb[68].mxu0 %v387_v3 }
 0x156   : > { %1075 = vmatprep.mubr.f32.mxu0 %v3938_v0 }
 0x157   : > { %v4354_v12 = vpop.permute.xlu0 %573  ;;  %v4357_v14 = vpop.permute.xlu1 %578 }
 0x158   : > { %6053 = vst [vmem:[#allocation20_spill] sm:$0xff] %v4354_v12  ;;  %6054 = vst [vmem:[#allocation21_spill] sm:$0xff] %v4357_v14 }
 0x159   : > { %1076 = vmatmul.mubr.f32.gmra.mrb[70].mxu0 %v388_v7 }
 0x15a   : > { %1081 = vmatprep.mubr.f32.mxu0 %v3938_v0 }
 0x15b   : > { %v4359_v15 = vpop.permute.xlu0 %583  ;;  %v4362_v17 = vpop.permute.xlu1 %588 }
 0x15c   : > { %6055 = vst [vmem:[#allocation22_spill] sm:$0xff] %v4359_v15  ;;  %6056 = vst [vmem:[#allocation23_spill] sm:$0xff] %v4362_v17 }
 0x15d   : > { %1082 = vmatmul.mubr.f32.gmra.mrb[72].mxu0 %v389_v10 }
 0x15e   : > { %1087 = vmatprep.mubr.f32.mxu0 %v3938_v0 }
 0x15f   : > { %v4364_v18 = vpop.permute.xlu0 %593  ;;  %v4367_v20 = vpop.permute.xlu1 %598 }
 0x160   : > { %6057 = vst [vmem:[#allocation24_spill] sm:$0xff] %v4364_v18  ;;  %6058 = vst [vmem:[#allocation25_spill] sm:$0xff] %v4367_v20 }
 0x161   : > { %1088 = vmatmul.mubr.f32.gmra.mrb[74].mxu0 %v390_v13 }
 0x162   : > { %1093 = vmatprep.mubr.f32.mxu0 %v3938_v0 }
 0x163   : > { %v4369_v21 = vpop.permute.xlu0 %603  ;;  %v4372_v23 = vpop.permute.xlu1 %608 }
 0x164   : > { %6059 = vst [vmem:[#allocation26_spill] sm:$0xff] %v4369_v21  ;;  %6060 = vst [vmem:[#allocation27_spill] sm:$0xff] %v4372_v23 }
 0x165   : > { %1094 = vmatmul.mubr.f32.gmra.mrb[76].mxu0 %v391_v16 }
 0x166   : > { %1099 = vmatprep.mubr.f32.mxu0 %v3938_v0 }
 0x167   : > { %v4374_v24 = vpop.permute.xlu0 %613  ;;  %v4377_v26 = vpop.permute.xlu1 %618 }
 0x168   : > { %6061 = vst [vmem:[#allocation28_spill] sm:$0xff] %v4374_v24  ;;  %6062 = vst [vmem:[#allocation29_spill] sm:$0xff] %v4377_v26 }
 0x169   : > { %1100 = vmatmul.mubr.f32.gmra.mrb[78].mxu0 %v392_v19 }
 0x16a   : > { %1105 = vmatprep.mubr.f32.mxu0 %v3938_v0 }
 0x16b   : > { %v4379_v27 = vpop.permute.xlu0 %623  ;;  %v4382_v29 = vpop.permute.xlu1 %628 }
 0x16c   : > { %6063 = vst [vmem:[#allocation30_spill] sm:$0xff] %v4379_v27  ;;  %6064 = vst [vmem:[#allocation31_spill] sm:$0xff] %v4382_v29 }
 0x16d   : > { %1106 = vmatmul.mubr.f32.gmra.mrb[80].mxu0 %v393_v22 }
 0x16e   : > { %1111 = vmatprep.mubr.f32.mxu0 %v3938_v0 }
 0x16f   : > { %v4384_v30 = vpop.permute.xlu0 %633  ;;  %v4387_v32 = vpop.permute.xlu1 %638 }
 0x170   : > { %6065 = vst [vmem:[#allocation32_spill] sm:$0xff] %v4384_v30  ;;  %6066 = vst [vmem:[#allocation33_spill] sm:$0xff] %v4387_v32 }
 0x171   : > { %1112 = vmatmul.mubr.f32.gmra.mrb[82].mxu0 %v394_v25 }
 0x172   : > { %1117 = vmatprep.mubr.f32.mxu0 %v3938_v0 }
 0x173   : > { %v4389_v35 = vpop.permute.xlu0 %643  ;;  %v4392_v37 = vpop.permute.xlu1 %648 }
 0x174   : > { %6067 = vst [vmem:[#allocation34_spill] sm:$0xff] %v4389_v35  ;;  %6068 = vst [vmem:[#allocation35_spill] sm:$0xff] %v4392_v37 }
 0x175   : > { %1118 = vmatmul.mubr.f32.gmra.mrb[84].mxu0 %v395_v28 }
 0x176   : > { %1123 = vmatprep.mubr.f32.mxu0 %v3938_v0 }
 0x177   : > { %v4394_v40 = vpop.permute.xlu0 %653  ;;  %v4397_v42 = vpop.permute.xlu1 %658 }
 0x178   : > { %6069 = vst [vmem:[#allocation36_spill] sm:$0xff] %v4394_v40  ;;  %6070 = vst [vmem:[#allocation37_spill] sm:$0xff] %v4397_v42 }
 0x179   : > { %1124 = vmatmul.mubr.f32.gmra.mrb[86].mxu0 %v396_v31 }
 0x17a   : > { %1129 = vmatprep.mubr.f32.mxu0 %v3938_v0 }
 0x17b   : > { %v4399_v45 = vpop.permute.xlu0 %663  ;;  %v4402_v47 = vpop.permute.xlu1 %668 }
 0x17c   : > { %6071 = vst [vmem:[#allocation38_spill] sm:$0xff] %v4399_v45  ;;  %6072 = vst [vmem:[#allocation39_spill] sm:$0xff] %v4402_v47 }
 0x17d   : > { %1130 = vmatmul.mubr.f32.gmra.mrb[88].mxu0 %v397_v36 }
 0x17e   : > { %1135 = vmatprep.mubr.f32.mxu0 %v3938_v0 }
 0x17f   : > { %v4404_v50 = vpop.permute.xlu0 %673  ;;  %v4407_v52 = vpop.permute.xlu1 %678 }
 0x180   : > { %6073 = vst [vmem:[#allocation40_spill] sm:$0xff] %v4404_v50  ;;  %6074 = vst [vmem:[#allocation41_spill] sm:$0xff] %v4407_v52 }
 0x181   : > { %1136 = vmatmul.mubr.f32.gmra.mrb[90].mxu0 %v398_v41 }
 0x182   : > { %1141 = vmatprep.mubr.f32.mxu0 %v3938_v0 }
 0x183   : > { %v4409_v55 = vpop.permute.xlu0 %683  ;;  %v4411_v56 = vpop.permute.xlu1 %688 }
 0x184   : > { %6075 = vst [vmem:[#allocation42_spill] sm:$0xff] %v4409_v55  ;;  %6076 = vst [vmem:[#allocation43_spill] sm:$0xff] %v4411_v56 }
 0x185   : > { %1142 = vmatmul.mubr.f32.gmra.mrb[92].mxu0 %v399_v46 }
 0x186   : > { %1147 = vmatprep.mubr.f32.mxu0 %v3938_v0 }
 0x187   : > { %v4413_v57 = vpop.permute.xlu0 %693  ;;  %v4415_v59 = vpop.permute.xlu1 %698 }
 0x188   : > { %6077 = vst [vmem:[#allocation44_spill] sm:$0xff] %v4413_v57  ;;  %6078 = vst [vmem:[#allocation45_spill] sm:$0xff] %v4415_v59 }
 0x189   : > { %1148 = vmatmul.mubr.f32.gmra.mrb[94].mxu0 %v400_v51 }
 0x18b   : > { %v4417_v60 = vpop.permute.xlu0 %703  ;;  %v4419_v61 = vpop.permute.xlu1 %708 }
 0x18c   : > { %6079 = vst [vmem:[#allocation46_spill] sm:$0xff] %v4417_v60  ;;  %6080 = vst [vmem:[#allocation47_spill] sm:$0xff] %v4419_v61 }
 0x18f   : > { %v4421_v1 = vpop.permute.xlu0 %713  ;;  %v4423_v2 = vpop.permute.xlu1 %718 }
 0x190   : > { %6081 = vst [vmem:[#allocation48_spill] sm:$0xff] %v4421_v1  ;;  %6082 = vst [vmem:[#allocation49_spill] sm:$0xff] %v4423_v2 }
 0x193   : > { %v724_v0 = vpop.permute.xlu0 %723  ;;  %v729_v31 = vpop.permute.xlu1 %728 }
 0x1a0   : > { %v867_v3 = vpop.f32.mrb[0].mxu0  ;;  %v1155_v6 = vpop.f32.mrb[0].mxu1 }
 0x1a1   : > { %v868_v7 = vadd.f32 %v867_v3, %v4309_v33  ;;  %v869_v10 = vpop.f32.mrb[1].mxu0  ;;  %v1156_v13 = vadd.f32 %v1155_v6, %v724_v0  ;;  %v1157_v16 = vpop.f32.mrb[1].mxu1 }
 0x1a2   : > { %v870_v19 = vadd.f32 %v869_v10, %v4309_v33  ;;  %v4427_v22 = vadd.f32 %v1157_v16, %v724_v0 }
 0x1a3   : > { %v4429_v25 = vmul.f32 0.5, %v868_v7  ;;  %v1378_v28 = vmul.f32 %v868_v7, %v868_v7  ;;  %v1474_v36 = vmul.f32 %v1156_v13, %v1156_v13  ;;  %v4433_v2 = vmul.f32 0.5, %v1156_v13 }
 0x1a4   : > { %6083 = vst [vmem:[#allocation50_spill] sm:$0xff] %v4427_v22  ;;  %v1379_v41 = vmul.f32 %v870_v19, %v870_v19  ;;  %v873_v46 = vpop.f32.mrb[2].mxu0  ;;  %v4431_v51 = vmul.f32 0.5, %v870_v19  ;;  %v1475_v3 = vmul.f32 %v4427_v22, %v4427_v22  ;;  %v1161_v6 = vpop.f32.mrb[2].mxu1 }
 0x1a5   : > { %6084 = vst [vmem:[#allocation51_spill] sm:$0xff] %v4433_v2  ;;  %v1506_v1 = vmul.f32 %v1378_v28, %v868_v7  ;;  %v874_v33 = vadd.f32 %v873_v46, %v4314_v38  ;;  %v875_v0 = vpop.f32.mrb[3].mxu0  ;;  %v1602_v10 = vmul.f32 %v1474_v36, %v1156_v13  ;;  %v4438_v16 = vadd.f32 %v1161_v6, %v729_v31  ;;  %v1163_v61 = vpop.f32.mrb[3].mxu1 }
 0x1a6   : > { %v1507_v60 = vmul.f32 %v1379_v41, %v870_v19  ;;  %v876_v59 = vadd.f32 %v875_v0, %v4314_v38  ;;  %v1603_v57 = vmul.f32 %v1475_v3, %v4427_v22  ;;  %v4442_v56 = vadd.f32 %v1163_v61, %v729_v31 }
 0x1a7   : > { %v1634_v2 = vmul.f32 0.044715, %v1506_v1  ;;  %v4444_v55 = vmul.f32 0.5, %v874_v33  ;;  %v1380_v52 = vmul.f32 %v874_v33, %v874_v33  ;;  %v1730_v50 = vmul.f32 0.044715, %v1602_v10 }
 0x1a8   : > { %6085 = vst [vmem:[#allocation52_spill] sm:$0xff] %v4442_v56  ;;  %v1635_v28 = vmul.f32 0.044715, %v1507_v60  ;;  %v1381_v47 = vmul.f32 %v876_v59, %v876_v59  ;;  %v879_v46 = vpop.f32.mrb[4].mxu0  ;;  %v4446_v45 = vmul.f32 0.5, %v876_v59  ;;  %v4451_v61 = vpop.f32.mrb[4].mxu1 }
 0x1a9   : > { %v1731_v36 = vmul.f32 0.044715, %v1603_v57  ;;  %v1762_v6 = vadd.f32 %v1634_v2, %v868_v7  ;;  %v1508_v42 = vmul.f32 %v1380_v52, %v874_v33  ;;  %v880_v41 = vadd.f32 %v879_v46, %v4311_v34  ;;  %v881_v38 = vpop.f32.mrb[5].mxu0  ;;  %v4459_v10 = vpop.f32.mrb[5].mxu1 }
 0x1aa   : > { %v4449_v0 = vadd.f32 %v1730_v50, %v1156_v13  ;;  %v1763_v1 = vadd.f32 %v1635_v28, %v870_v19  ;;  %v1509_v31 = vmul.f32 %v1381_v47, %v876_v59  ;;  %v4454_v3 = vadd.f32 %v881_v38, %v4311_v34 }
 0x1ab   : > { %v4457_v60 = vadd.f32 %v1731_v36, %v4427_v22  ;;  %v1890_v57 = vmul.f32 0.7978846, %v1762_v6  ;;  %v1636_v2 = vmul.f32 0.044715, %v1508_v42  ;;  %v4461_v52 = vmul.f32 0.5, %v880_v41 }
 0x1ac   : > { %v1382_v7 = vmul.f32 %v880_v41, %v880_v41  ;;  %v1891_v46 = vmul.f32 0.7978846, %v1763_v1  ;;  %v1637_v50 = vmul.f32 0.044715, %v1509_v31  ;;  %v1383_v13 = vmul.f32 %v4454_v3, %v4454_v3  ;;  %v885_v19 = vpop.f32.mrb[6].mxu0  ;;  %v4469_v6 = vpop.f32.mrb[6].mxu1 }
 0x1ad   : > { %v4466_v47 = vmul.f32 0.5, %v4438_v16  ;;  %3437 = vtanh.f32 %v1890_v57  ;;  %v1764_v34 = vadd.f32 %v1636_v2, %v874_v33  ;;  %v886_v36 = vadd.f32 %v885_v19, %v4316_v39  ;;  %v887_v38 = vpop.f32.mrb[7].mxu0  ;;  %v4475_v22 = vpop.f32.mrb[7].mxu1 }
 0x1ae   : > { %v1510_v28 = vmul.f32 %v1382_v7, %v880_v41  ;;  %3439 = vtanh.f32 %v1891_v46  ;;  %v1765_v42 = vadd.f32 %v1637_v50, %v876_v59  ;;  %v1511_v1 = vmul.f32 %v1383_v13, %v4454_v3 }
 0x1af   : > { %6086 = vst [vmem:[#allocation53_spill] sm:$0xff] %v4466_v47  ;;  %v4473_v31 = vadd.f32 %v887_v38, %v4316_v39  ;;  %v1892_v40 = vmul.f32 0.7978846, %v1764_v34  ;;  %v4477_v47 = vmul.f32 0.5, %v886_v36  ;;  %v1384_v33 = vmul.f32 %v886_v36, %v886_v36 }
 0x1b0   : > { %v1638_v37 = vmul.f32 0.044715, %v1510_v28  ;;  %v1893_v57 = vmul.f32 0.7978846, %v1765_v42  ;;  %v1639_v2 = vmul.f32 0.044715, %v1511_v1  ;;  %v1476_v59 = vmul.f32 %v4438_v16, %v4438_v16 }
 0x1b1   : > { %v1385_v7 = vmul.f32 %v4473_v31, %v4473_v31  ;;  %v891_v19 = vpop.f32.mrb[8].mxu0  ;;  %v4483_v46 = vpop.f32.mrb[8].mxu1  ;;  %3441 = vtanh.f32 %v1892_v40  ;;  %v1512_v50 = vmul.f32 %v1384_v33, %v886_v36 }
 0x1b2   : > { %v1766_v39 = vadd.f32 %v1638_v37, %v880_v41  ;;  %v892_v13 = vadd.f32 %v891_v19, %v4319_v43  ;;  %v893_v34 = vpop.f32.mrb[9].mxu0  ;;  %v4486_v28 = vpop.f32.mrb[9].mxu1  ;;  %3443 = vtanh.f32 %v1893_v57  ;;  %v1767_v38 = vadd.f32 %v1639_v2, %v4454_v3 }
 0x1b3   : > { %v1513_v42 = vmul.f32 %v1385_v7, %v4473_v31  ;;  %v4491_v1 = vadd.f32 %v893_v34, %v4319_v43  ;;  %v1640_v32 = vmul.f32 0.044715, %v1512_v50  ;;  %v4498_v57 = vmul.f32 %v1476_v59, %v4438_v16 }
 0x1b4   : > { %v1894_v35 = vmul.f32 0.7978846, %v1766_v39  ;;  %v4493_v30 = vmul.f32 0.5, %v892_v13  ;;  %v1386_v40 = vmul.f32 %v892_v13, %v892_v13  ;;  %v1895_v37 = vmul.f32 0.7978846, %v1767_v38  ;;  %v897_v19 = vpop.f32.mrb[10].mxu0 }
 0x1b5   : > { %v1641_v41 = vmul.f32 0.044715, %v1513_v42  ;;  %v1387_v33 = vmul.f32 %v4491_v1, %v4491_v1  ;;  %v4500_v2 = vpop.f32.mrb[10].mxu1  ;;  %v1768_v7 = vadd.f32 %v1640_v32, %v886_v36  ;;  %v898_v39 = vadd.f32 %v897_v19, %v4321_v44  ;;  %v899_v50 = vpop.f32.mrb[11].mxu0 }
 0x1b6   : > { %3445 = vtanh.f32 %v1894_v35  ;;  %v1514_v43 = vmul.f32 %v1386_v40, %v892_v13  ;;  %v4503_v34 = vpop.f32.mrb[11].mxu1  ;;  %v4508_v29 = vadd.f32 %v899_v50, %v4321_v44 }
 0x1b7   : > { %3447 = vtanh.f32 %v1895_v37  ;;  %v1769_v38 = vadd.f32 %v1641_v41, %v4473_v31  ;;  %v1515_v42 = vmul.f32 %v1387_v33, %v4491_v1  ;;  %v3438_v59 = vpop.eup %3437  ;;  %v1896_v27 = vmul.f32 0.7978846, %v1768_v7 }
 0x1b8   : > { %v1642_v26 = vmul.f32 0.044715, %v1514_v43  ;;  %v4510_v24 = vmul.f32 0.5, %v898_v39  ;;  %v1388_v32 = vmul.f32 %v898_v39, %v898_v39  ;;  %v3440_v35 = vpop.eup %3439  ;;  %v1389_v19 = vmul.f32 %v4508_v29, %v4508_v29  ;;  %v903_v37 = vpop.f32.mrb[12].mxu0 }
 0x1b9   : > { %v1897_v36 = vmul.f32 0.7978846, %v1769_v38  ;;  %v1643_v40 = vmul.f32 0.044715, %v1515_v42  ;;  %v4514_v23 = vadd.f32 1.0, %v3438_v59  ;;  %3449 = vtanh.f32 %v1896_v27  ;;  %v905_v50 = vpop.f32.mrb[13].mxu0 }
 0x1ba   : > { %v1770_v41 = vadd.f32 %v1642_v26, %v892_v13  ;;  %v1516_v33 = vmul.f32 %v1388_v32, %v898_v39  ;;  %v904_v44 = vadd.f32 %v903_v37, %v4324_v48  ;;  %v4517_v7 = vpop.f32.mrb[12].mxu1  ;;  %v1517_v38 = vmul.f32 %v1389_v19, %v4508_v29 }
 0x1bb   : > { %3451 = vtanh.f32 %v1897_v36  ;;  %v1771_v43 = vadd.f32 %v1643_v40, %v4491_v1  ;;  %v4522_v42 = vadd.f32 %v905_v50, %v4324_v48  ;;  %v4524_v21 = vpop.f32.mrb[13].mxu1  ;;  %v4526_v59 = vpop.eup %3441  ;;  %v2147_v19 = vadd.f32 1.0, %v3440_v35 }
 0x1bc   : > { %v1898_v27 = vmul.f32 0.7978846, %v1770_v41  ;;  %v1644_v26 = vmul.f32 0.044715, %v1516_v33  ;;  %v4528_v13 = vmul.f32 0.5, %v904_v44  ;;  %v1390_v32 = vmul.f32 %v904_v44, %v904_v44  ;;  %v3444_v37 = vpop.eup %3443  ;;  %v909_v40 = vpop.f32.mrb[14].mxu0 }
 0x1bd   : > { %6087 = vst [vmem:[#allocation54_spill] sm:$0xff] %v4522_v42  ;;  %v1899_v20 = vmul.f32 0.7978846, %v1771_v43  ;;  %v1645_v18 = vmul.f32 0.044715, %v1517_v38  ;;  %v1391_v36 = vmul.f32 %v4522_v42, %v4522_v42  ;;  %v910_v17 = vadd.f32 %v909_v40, %v4326_v49  ;;  %v911_v15 = vpop.f32.mrb[15].mxu0 }
 0x1be   : > { %6088 = vst [vmem:[#allocation55_spill] sm:$0xff] %v4528_v13  ;;  %3453 = vtanh.f32 %v1898_v27  ;;  %v1772_v48 = vadd.f32 %v1644_v26, %v898_v39  ;;  %v1518_v50 = vmul.f32 %v1390_v32, %v904_v44  ;;  %v4533_v14 = vpop.f32.mrb[14].mxu1  ;;  %v4538_v43 = vadd.f32 %v911_v15, %v4326_v49 }
 0x1bf   : > { %3455 = vtanh.f32 %v1899_v20  ;;  %v1773_v41 = vadd.f32 %v1645_v18, %v4508_v29  ;;  %v1519_v33 = vmul.f32 %v1391_v36, %v4522_v42  ;;  %v4540_v38 = vpop.f32.mrb[15].mxu1  ;;  %v4544_v27 = vmul.f32 0.5, %v910_v17 }
 0x1c0   : > { %6089 = vst [vmem:[#allocation56_spill] sm:$0xff] %v4540_v38  ;;  %v4542_v12 = vpop.eup %3445  ;;  %v1900_v35 = vmul.f32 0.7978846, %v1772_v48  ;;  %v1646_v39 = vmul.f32 0.044715, %v1518_v50  ;;  %v1392_v26 = vmul.f32 %v910_v17, %v910_v17  ;;  %v1393_v18 = vmul.f32 %v4538_v43, %v4538_v43  ;;  %v915_v36 = vpop.f32.mrb[16].mxu0 }
 0x1c1   : > { %6090 = vst [vmem:[#allocation57_spill] sm:$0xff] %v4544_v27  ;;  %v4546_v32 = vpop.eup %3447  ;;  %v1901_v40 = vmul.f32 0.7978846, %v1773_v41  ;;  %v1647_v20 = vmul.f32 0.044715, %v1519_v33  ;;  %v2149_v11 = vadd.f32 1.0, %v3444_v37  ;;  %v916_v9 = vadd.f32 %v915_v36, %v4329_v53 }
 0x1c2   : > { %3457 = vtanh.f32 %v1900_v35  ;;  %v1774_v49 = vadd.f32 %v1646_v39, %v904_v44  ;;  %v1520_v15 = vmul.f32 %v1392_v26, %v910_v17  ;;  %v917_v13 = vpop.f32.mrb[17].mxu0  ;;  %v4551_v48 = vpop.f32.mrb[16].mxu1  ;;  %v1521_v27 = vmul.f32 %v1393_v18, %v4538_v43 }
 0x1c3   : > { %6091 = vst [vmem:[#allocation58_spill] sm:$0xff] %v4551_v48  ;;  %3459 = vtanh.f32 %v1901_v40  ;;  %v1775_v50 = vadd.f32 %v1647_v20, %v4522_v42  ;;  %v4556_v41 = vadd.f32 %v917_v13, %v4329_v53  ;;  %v4558_v33 = vpop.f32.mrb[17].mxu1  ;;  %v4560_v8 = vpop.eup %3449  ;;  %v4562_v35 = vmul.f32 0.5, %v916_v9 }
 0x1c4   : > { %6093 = vst [vmem:[#allocation60_spill] sm:$0xff] %v4558_v33  ;;  %v1902_v37 = vmul.f32 0.7978846, %v1774_v49  ;;  %v1648_v44 = vmul.f32 0.044715, %v1520_v15  ;;  %v1394_v39 = vmul.f32 %v916_v9, %v916_v9  ;;  %v2275_v18 = vmul.f32 %v2147_v19, %v4431_v51  ;;  %v921_v53 = vpop.f32.mrb[18].mxu0 }
 0x1c5   : > { %6092 = vst [vmem:[#allocation59_spill] sm:$0xff] %v4556_v41  ;;  %6094 = vst [vmem:[#allocation61_spill] sm:$0xff] %v4562_v35  ;;  %v4564_v26 = vpop.eup %3451  ;;  %v1903_v36 = vmul.f32 0.7978846, %v1775_v50  ;;  %v1649_v40 = vmul.f32 0.044715, %v1521_v27  ;;  %v1395_v20 = vmul.f32 %v4556_v41, %v4556_v41  ;;  %v2277_v49 = vmul.f32 %v2149_v11, %v4446_v45 }
 0x1c6   : > { %v4569_v13 = vpop.f32.mrb[18].mxu1  ;;  %3461 = vtanh.f32 %v1902_v37  ;;  %v1776_v42 = vadd.f32 %v1648_v44, %v910_v17  ;;  %v1522_v33 = vmul.f32 %v1394_v39, %v916_v9  ;;  %v923_v15 = vpop.f32.mrb[19].mxu0  ;;  %v922_v48 = vadd.f32 %v921_v53, %v4331_v54 }
 0x1c7   : > { %6095 = vst [vmem:[#allocation62_spill] sm:$0xff] %v4569_v13  ;;  %v4572_v35 = vpop.f32.mrb[19].mxu1  ;;  %3463 = vtanh.f32 %v1903_v36  ;;  %v1777_v50 = vadd.f32 %v1649_v40, %v4538_v43  ;;  %v1523_v27 = vmul.f32 %v1395_v20, %v4556_v41  ;;  %v3114_v13 = vpack.c.bf16 %v2277_v49, %v2275_v18 }
 0x1c8   : > { %v4577_v38 = vpop.eup %3453  ;;  %v1904_v51 = vmul.f32 0.7978846, %v1776_v42  ;;  %v1650_v19 = vmul.f32 0.044715, %v1522_v33  ;;  %v2148_v17 = vadd.f32 1.0, %v4526_v59  ;;  %v4582_v44 = vmul.f32 0.5, %v922_v48 }
 0x1c9   : > { %v4580_v37 = vpop.eup %3455  ;;  %v1905_v11 = vmul.f32 0.7978846, %v1777_v50  ;;  %v1651_v45 = vmul.f32 0.044715, %v1523_v27  ;;  %v1396_v39 = vmul.f32 %v922_v48, %v922_v48  ;;  %v927_v36 = vpop.f32.mrb[20].mxu0  ;;  %3115 = vmatprep.subr.bf16.mxu1 %v3114_v13  ;;  %v2274_v20 = vmul.f32 %v4514_v23, %v4429_v25 }
 0x1ca   : > { %6096 = vst [vmem:[#allocation63_spill] sm:$0xff] %v4582_v44  ;;  %3465 = vtanh.f32 %v1904_v51  ;;  %v1778_v40 = vadd.f32 %v1650_v19, %v916_v9  ;;  %v2276_v42 = vmul.f32 %v2148_v17, %v4444_v55  ;;  %v929_v33 = vpop.f32.mrb[21].mxu0  ;;  %v4587_v18 = vpop.f32.mrb[20].mxu1  ;;  %v4591_v49 = vadd.f32 %v923_v15, %v4331_v54 }
 0x1cb   : > { %3467 = vtanh.f32 %v1905_v11  ;;  %v1779_v59 = vadd.f32 %v1651_v45, %v4556_v41  ;;  %v1524_v53 = vmul.f32 %v1396_v39, %v922_v48  ;;  %v4593_v50 = vpop.f32.mrb[21].mxu1  ;;  %v928_v23 = vadd.f32 %v927_v36, %v4334_v58 }
 0x1cc   : > { %6097 = vst [vmem:[#allocation64_spill] sm:$0xff] %v4591_v49  ;;  %v4595_v27 = vpop.eup %3457  ;;  %v1906_v9 = vmul.f32 0.7978846, %v1778_v40  ;;  %v3116_v13 = vpack.c.bf16 %v2276_v42, %v2274_v20  ;;  %v4599_v55 = vadd.f32 %v929_v33, %v4334_v58  ;;  %v1397_v17 = vmul.f32 %v4591_v49, %v4591_v49  ;;  %v933_v39 = vpop.f32.mrb[22].mxu0 }
 0x1cd   : > { %v4601_v25 = vpop.eup %3459  ;;  %v1907_v51 = vmul.f32 0.7978846, %v1779_v59  ;;  %v1652_v19 = vmul.f32 0.044715, %v1524_v53  ;;  %v1986_v54 = vmul.f32 0.7978846, %v4449_v0  ;;  %v1398_v11 = vmul.f32 %v928_v23, %v928_v23 }
 0x1ce   : > { %6098 = vst [vmem:[#allocation65_spill] sm:$0xff] %v4599_v55  ;;  %3469 = vtanh.f32 %v1906_v9  ;;  %3117 = vmatpush1.bf16.msra.mxu1 %v3116_v13  ;;  %v4606_v15 = vmul.f32 0.5, %v928_v23  ;;  %v1399_v45 = vmul.f32 %v4599_v55, %v4599_v55  ;;  %v4610_v58 = vpop.f32.mrb[22].mxu1  ;;  %v1525_v40 = vmul.f32 %v1397_v17, %v4591_v49  ;;  %v935_v42 = vpop.f32.mrb[23].mxu0 }
 0x1cf   : > { %3471 = vtanh.f32 %v1907_v51  ;;  %v1780_v36 = vadd.f32 %v1652_v19, %v922_v48  ;;  %v1987_v20 = vmul.f32 0.7978846, %v4457_v60  ;;  %v4614_v33 = vpop.f32.mrb[23].mxu1  ;;  %v1526_v59 = vmul.f32 %v1398_v11, %v928_v23 }
 0x1d0   : > { %6099 = vst [vmem:[#allocation66_spill] sm:$0xff] %v4606_v15  ;;  %v4616_v0 = vpop.eup %3461  ;;  %v1527_v53 = vmul.f32 %v1399_v45, %v4599_v55  ;;  %3473 = vtanh.f32 %v1986_v54  ;;  %v1732_v9 = vmul.f32 0.044715, %v4498_v57  ;;  %v1653_v51 = vmul.f32 0.044715, %v1525_v40  ;;  %v4623_v19 = vpop.f32.mrb[24].mxu0 }
 0x1d1   : > { %v4620_v13 = vpop.eup %3463  ;;  %v1908_v15 = vmul.f32 0.7978846, %v1780_v36  ;;  %3475 = vtanh.f32 %v1987_v20  ;;  %v1255_v48 = vmul.f32 0.5, %v4454_v3  ;;  %v1654_v60 = vmul.f32 0.044715, %v1526_v59  ;;  %v4627_v41 = vpop.f32.mrb[25].mxu0 }
 0x1d2   : > { %v1655_v17 = vmul.f32 0.044715, %v1527_v53  ;;  %v1860_v44 = vadd.f32 %v1732_v9, %v4438_v16  ;;  %v1257_v11 = vmul.f32 0.5, %v4473_v31  ;;  %v1781_v57 = vadd.f32 %v1653_v51, %v4591_v49  ;;  %v4632_v36 = vpop.f32.mrb[24].mxu1 }
 0x1d3   : > { %3477 = vtanh.f32 %v1908_v15  ;;  %v2151_v54 = vadd.f32 1.0, %v4546_v32  ;;  %v2153_v45 = vadd.f32 1.0, %v4564_v26  ;;  %v1782_v40 = vadd.f32 %v1654_v60, %v928_v23  ;;  %v4638_v31 = vpop.f32.mrb[25].mxu1 }
 0x1d4   : > { %v4634_v3 = vpop.eup %3465  ;;  %v1783_v20 = vadd.f32 %v1655_v17, %v4599_v55  ;;  %v1988_v59 = vmul.f32 0.7978846, %v1860_v44  ;;  %v934_v16 = vadd.f32 %v933_v39, %v4337_v62  ;;  %v1909_v15 = vmul.f32 0.7978846, %v1781_v57  ;;  %v4644_v26 = vpop.f32.mrb[26].mxu0 }
 0x1d5   : > { %v4640_v53 = vpop.eup %3467  ;;  %v2279_v9 = vmul.f32 %v2151_v54, %v1255_v48  ;;  %v2281_v51 = vmul.f32 %v2153_v45, %v1257_v11  ;;  %v1477_v32 = vmul.f32 %v4442_v56, %v4442_v56  ;;  %v4646_v49 = vpop.f32.mrb[26].mxu1  ;;  %v1910_v23 = vmul.f32 0.7978846, %v1782_v40 }
 0x1d6   : > { %v1911_v60 = vmul.f32 0.7978846, %v1783_v20  ;;  %3479 = vtanh.f32 %v1988_v59  ;;  %v4648_v44 = vmul.f32 0.5, %v934_v16  ;;  %v4650_v39 = vpop.f32.mrb[27].mxu0  ;;  %v1400_v55 = vmul.f32 %v934_v16, %v934_v16  ;;  %v4653_v11 = vpop.f32.mrb[27].mxu1 }
 0x1d7   : > { %3481 = vtanh.f32 %v1909_v15  ;;  %v3118_v17 = vpack.c.bf16 %v2281_v51, %v2279_v9  ;;  %v1605_v48 = vmul.f32 %v1477_v32, %v4442_v56  ;;  %6101 = vst [vmem:[#allocation68_spill] sm:$0xff] %v4653_v11  ;;  %v734_v54 = vpop.permute.xlu0 %733  ;;  %v2150_v45 = vadd.f32 1.0, %v4542_v12 }
 0x1d8   : > { %6100 = vst [vmem:[#allocation67_spill] sm:$0xff] %v4648_v44  ;;  %v4655_v57 = vpop.eup %3469  ;;  %3483 = vtanh.f32 %v1910_v23  ;;  %v2152_v40 = vadd.f32 1.0, %v4560_v8  ;;  %v4660_v20 = vadd.f32 %v935_v42, %v4337_v62  ;;  %v1528_v15 = vmul.f32 %v1400_v55, %v934_v16  ;;  %v4665_v32 = vpop.f32.mrb[28].mxu0 }
 0x1d9   : > { %6102 = vst [vmem:[#allocation69_spill] sm:$0xff] %v4655_v57  ;;  %v4662_v59 = vpop.eup %3471  ;;  %3485 = vtanh.f32 %v1911_v60  ;;  %3119 = vmatprep.subr.bf16.mxu1 %v3118_v17  ;;  %v1733_v9 = vmul.f32 0.044715, %v1605_v48  ;;  %v1168_v51 = vadd.f32 %v4451_v61, %v734_v54  ;;  %v4667_v44 = vpop.f32.mrb[28].mxu1  ;;  %v2278_v12 = vmul.f32 %v2150_v45, %v4461_v52 }
 0x1da   : > { %6103 = vst [vmem:[#allocation70_spill] sm:$0xff] %v4660_v20  ;;  %6104 = vst [vmem:[#allocation71_spill] sm:$0xff] %v4667_v44  ;;  %v4669_v23 = vpop.eup %3473  ;;  %v2280_v8 = vmul.f32 %v2152_v40, %v4477_v47  ;;  %v1401_v62 = vmul.f32 %v4660_v20, %v4660_v20  ;;  %v4676_v42 = vadd.f32 %v4459_v10, %v734_v54  ;;  %v4678_v55 = vpop.f32.mrb[29].mxu0  ;;  %v1656_v48 = vmul.f32 0.044715, %v1528_v15 }
 0x1db   : > { %6105 = vst [vmem:[#allocation72_spill] sm:$0xff] %v4669_v23  ;;  %v4680_v60 = vpop.f32.mrb[29].mxu1  ;;  %v4682_v61 = vpop.eup %3475  ;;  %v1861_v23 = vadd.f32 %v1733_v9, %v4442_v56  ;;  %v4685_v44 = vmul.f32 0.5, %v1168_v51  ;;  %v1478_v52 = vmul.f32 %v1168_v51, %v1168_v51  ;;  %v940_v15 = vadd.f32 %v4623_v19, %v4339_v63 }
 0x1dc   : > { %6106 = vst [vmem:[#allocation73_spill] sm:$0xff] %v4676_v42  ;;  %6107 = vst [vmem:[#allocation74_spill] sm:$0xff] %v4680_v60  ;;  %v739_v17 = vpop.permute.xlu1 %738  ;;  %v3120_v47 = vpack.c.bf16 %v2280_v8, %v2278_v12  ;;  %v1529_v45 = vmul.f32 %v1401_v62, %v4660_v20  ;;  %v1479_v10 = vmul.f32 %v4676_v42, %v4676_v42  ;;  %v4695_v9 = vpop.f32.mrb[30].mxu0 }
 0x1dd   : > { %6108 = vst [vmem:[#allocation75_spill] sm:$0xff] %v4682_v61  ;;  %6109 = vst [vmem:[#allocation76_spill] sm:$0xff] %v4685_v44  ;;  %v1174_v54 = vadd.f32 %v4469_v6, %v739_v17  ;;  %v4691_v40 = vpop.eup %3477  ;;  %v1784_v60 = vadd.f32 %v1656_v48, %v934_v16  ;;  %v1989_v57 = vmul.f32 0.7978846, %v1861_v23  ;;  %v1606_v61 = vmul.f32 %v1478_v52, %v1168_v51  ;;  %v4697_v44 = vpop.f32.mrb[30].mxu1 }
 0x1de   : > { %6110 = vst [vmem:[#allocation77_spill] sm:$0xff] %v4691_v40  ;;  %6111 = vst [vmem:[#allocation78_spill] sm:$0xff] %v4697_v44  ;;  %3121 = vmatpush1.bf16.msra.mxu1 %v3120_v47  ;;  %v1657_v12 = vmul.f32 0.044715, %v1529_v45  ;;  %v1607_v8 = vmul.f32 %v1479_v10, %v4676_v42  ;;  %v4702_v6 = vpop.f32.mrb[31].mxu0  ;;  %v4704_v40 = vpop.f32.mrb[31].mxu1  ;;  %v1402_v44 = vmul.f32 %v940_v15, %v940_v15 }
 0x1df   : > { %v4700_v62 = vmul.f32 0.5, %v1174_v54  ;;  %v1480_v56 = vmul.f32 %v1174_v54, %v1174_v54  ;;  %6113 = vst [vmem:[#allocation80_spill] sm:$0xff] %v4704_v40  ;;  %v1912_v16 = vmul.f32 0.7978846, %v1784_v60  ;;  %3487 = vtanh.f32 %v1989_v57 }
 0x1e0   : > { %v1734_v23 = vmul.f32 0.044715, %v1606_v61  ;;  %v4706_v48 = vmul.f32 0.5, %v940_v15  ;;  %v4708_v19 = vpop.eup %3479  ;;  %v1785_v52 = vadd.f32 %v1657_v12, %v4660_v20  ;;  %v1735_v47 = vmul.f32 0.044715, %v1607_v8  ;;  %v4720_v60 = vpop.f32.mrb[32].mxu0 }
 0x1e1   : > { %6112 = vst [vmem:[#allocation79_spill] sm:$0xff] %v4700_v62  ;;  %6115 = vst [vmem:[#allocation82_spill] sm:$0xff] %v4708_v19  ;;  %v1608_v45 = vmul.f32 %v1480_v56, %v1174_v54  ;;  %v4711_v10 = vpop.eup %3481  ;;  %3489 = vtanh.f32 %v1912_v16  ;;  %v4714_v11 = vadd.f32 %v4475_v22, %v739_v17  ;;  %v4718_v57 = vadd.f32 %v4627_v41, %v4339_v63  ;;  %v744_v19 = vpop.permute.xlu0 %743 }
 0x1e2   : > { %6114 = vst [vmem:[#allocation81_spill] sm:$0xff] %v4706_v48  ;;  %6116 = vst [vmem:[#allocation83_spill] sm:$0xff] %v4711_v10  ;;  %v1862_v62 = vadd.f32 %v1734_v23, %v1168_v51  ;;  %v4722_v61 = vpop.eup %3483  ;;  %v1913_v12 = vmul.f32 0.7978846, %v1785_v52  ;;  %v1863_v56 = vadd.f32 %v1735_v47, %v4676_v42  ;;  %v1530_v48 = vmul.f32 %v1402_v44, %v940_v15  ;;  %v4725_v20 = vpop.f32.mrb[33].mxu0 }
 0x1e3   : > { %6117 = vst [vmem:[#allocation84_spill] sm:$0xff] %v4714_v11  ;;  %6118 = vst [vmem:[#allocation85_spill] sm:$0xff] %v4722_v61  ;;  %v1736_v8 = vmul.f32 0.044715, %v1608_v45  ;;  %v4727_v51 = vpop.eup %3485  ;;  %v1481_v17 = vmul.f32 %v4714_v11, %v4714_v11  ;;  %v1403_v63 = vmul.f32 %v4718_v57, %v4718_v57  ;;  %v1180_v41 = vadd.f32 %v4483_v46, %v744_v19  ;;  %v749_v42 = vpop.permute.xlu1 %748 }
 0x1e4   : > { %6119 = vst [vmem:[#allocation86_spill] sm:$0xff] %v4727_v51  ;;  %v1990_v22 = vmul.f32 0.7978846, %v1862_v62  ;;  %3491 = vtanh.f32 %v1913_v12  ;;  %v1991_v16 = vmul.f32 0.7978846, %v1863_v56  ;;  %v4738_v62 = vpop.f32.mrb[34].mxu0 }
 0x1e5   : > { %v1864_v23 = vadd.f32 %v1736_v8, %v1174_v54  ;;  %v1658_v52 = vmul.f32 0.044715, %v1530_v48  ;;  %v1609_v44 = vmul.f32 %v1481_v17, %v4714_v11  ;;  %v1531_v47 = vmul.f32 %v1403_v63, %v4718_v57  ;;  %v4740_v10 = vpop.f32.mrb[35].mxu0 }
 0x1e6   : > { %3493 = vtanh.f32 %v1990_v22  ;;  %v4736_v45 = vmul.f32 0.5, %v1180_v41  ;;  %v1482_v40 = vmul.f32 %v1180_v41, %v1180_v41  ;;  %v4743_v54 = vadd.f32 %v4486_v28, %v744_v19 }
 0x1e7   : > { %3495 = vtanh.f32 %v1991_v16  ;;  %v1992_v61 = vmul.f32 0.7978846, %v1864_v23  ;;  %v1786_v51 = vadd.f32 %v1658_v52, %v940_v15  ;;  %v1737_v46 = vmul.f32 0.044715, %v1609_v44 }
 0x1e8   : > { %6120 = vst [vmem:[#allocation87_spill] sm:$0xff] %v4736_v45  ;;  %v1659_v12 = vmul.f32 0.044715, %v1531_v47  ;;  %6121 = vst [vmem:[#allocation88_spill] sm:$0xff] %v4743_v54  ;;  %v1186_v48 = vadd.f32 %v4500_v2, %v749_v42  ;;  %v1610_v8 = vmul.f32 %v1482_v40, %v1180_v41  ;;  %v1259_v22 = vmul.f32 0.5, %v4491_v1  ;;  %v4755_v28 = vpop.f32.mrb[36].mxu0 }
 0x1e9   : > { %3497 = vtanh.f32 %v1992_v61  ;;  %v1914_v56 = vmul.f32 0.7978846, %v1786_v51  ;;  %v4747_v17 = vpop.eup %3487  ;;  %v1865_v63 = vadd.f32 %v1737_v46, %v4714_v11  ;;  %v1483_v16 = vmul.f32 %v4743_v54, %v4743_v54  ;;  %v4758_v61 = vpop.f32.mrb[37].mxu0 }
 0x1ea   : > { %6122 = vst [vmem:[#allocation89_spill] sm:$0xff] %v4747_v17  ;;  %v1787_v15 = vadd.f32 %v1659_v12, %v4718_v57  ;;  %v4753_v23 = vmul.f32 0.5, %v1186_v48  ;;  %v1738_v2 = vmul.f32 0.044715, %v1610_v8  ;;  %v1484_v19 = vmul.f32 %v1186_v48, %v1186_v48 }
 0x1eb   : > { %3499 = vtanh.f32 %v1914_v56  ;;  %v1261_v40 = vmul.f32 0.5, %v4508_v29  ;;  %v4760_v1 = vpop.eup %3489  ;;  %v1993_v51 = vmul.f32 0.7978846, %v1865_v63  ;;  %v1611_v44 = vmul.f32 %v1483_v16, %v4743_v54 }
 0x1ec   : > { %6123 = vst [vmem:[#allocation90_spill] sm:$0xff] %v4753_v23  ;;  %v1915_v52 = vmul.f32 0.7978846, %v1787_v15  ;;  %v2155_v47 = vadd.f32 1.0, %v4580_v37  ;;  %v1866_v46 = vadd.f32 %v1738_v2, %v1180_v41  ;;  %v1612_v12 = vmul.f32 %v1484_v19, %v1186_v48  ;;  %v4770_v11 = vpop.f32.mrb[38].mxu0 }
 0x1ed   : > { %v2157_v23 = vadd.f32 1.0, %v4601_v25  ;;  %v946_v56 = vadd.f32 %v4644_v26, %v4342_v4  ;;  %3501 = vtanh.f32 %v1993_v51  ;;  %v1739_v8 = vmul.f32 0.044715, %v1611_v44  ;;  %v4774_v16 = vpop.f32.mrb[39].mxu0 }
 0x1ee   : > { %v2283_v29 = vmul.f32 %v2155_v47, %v1259_v22  ;;  %v4768_v45 = vadd.f32 %v4503_v34, %v749_v42  ;;  %v4772_v63 = vpop.eup %3491  ;;  %3503 = vtanh.f32 %v1915_v52  ;;  %v1994_v15 = vmul.f32 0.7978846, %v1866_v46 }
 0x1ef   : > { %v1740_v37 = vmul.f32 0.044715, %v1612_v12  ;;  %v2285_v41 = vmul.f32 %v2157_v23, %v1261_v40  ;;  %v1867_v26 = vadd.f32 %v1739_v8, %v4743_v54  ;;  %v4779_v2 = vmul.f32 0.5, %v946_v56  ;;  %v754_v23 = vpop.permute.xlu0 %753 }
 0x1f0   : > { %6124 = vst [vmem:[#allocation91_spill] sm:$0xff] %v4768_v45  ;;  %v4776_v25 = vpop.eup %3493  ;;  %v1404_v22 = vmul.f32 %v946_v56, %v946_v56  ;;  %v1485_v34 = vmul.f32 %v4768_v45, %v4768_v45  ;;  %3505 = vtanh.f32 %v1994_v15  ;;  %v2154_v52 = vadd.f32 1.0, %v4577_v38  ;;  %v4788_v12 = vpop.f32.mrb[40].mxu0 }
 0x1f1   : > { %6125 = vst [vmem:[#allocation92_spill] sm:$0xff] %v4776_v25  ;;  %v4783_v42 = vpop.eup %3495  ;;  %v1868_v19 = vadd.f32 %v1740_v37, %v1186_v48  ;;  %v3122_v51 = vpack.c.bf16 %v2285_v41, %v2283_v29  ;;  %v1995_v40 = vmul.f32 0.7978846, %v1867_v26  ;;  %v2156_v46 = vadd.f32 1.0, %v4595_v27  ;;  %v4798_v29 = vpop.f32.mrb[41].mxu0 }
 0x1f2   : > { %6126 = vst [vmem:[#allocation93_spill] sm:$0xff] %v4783_v42  ;;  %v1532_v44 = vmul.f32 %v1404_v22, %v946_v56  ;;  %v1613_v47 = vmul.f32 %v1485_v34, %v4768_v45  ;;  %v2282_v25 = vmul.f32 %v2154_v52, %v4493_v30  ;;  %v4795_v48 = vadd.f32 %v4650_v39, %v4342_v4  ;;  %v759_v4 = vpop.permute.xlu1 %758 }
 0x1f3   : > { %v4790_v8 = vpop.eup %3497  ;;  %v1996_v54 = vmul.f32 0.7978846, %v1868_v19  ;;  %3123 = vmatprep.subr.bf16.mxu1 %v3122_v51  ;;  %v1192_v38 = vadd.f32 %v4517_v7, %v754_v23  ;;  %3507 = vtanh.f32 %v1995_v40  ;;  %v2284_v27 = vmul.f32 %v2156_v46, %v4510_v24 }
 0x1f4   : > { %6127 = vst [vmem:[#allocation94_spill] sm:$0xff] %v4790_v8  ;;  %v1660_v15 = vmul.f32 0.044715, %v1532_v44  ;;  %v1741_v37 = vmul.f32 0.044715, %v1613_v47  ;;  %v1405_v26 = vmul.f32 %v4795_v48, %v4795_v48  ;;  %v4809_v19 = vadd.f32 %v4524_v21, %v754_v23  ;;  %v4811_v51 = vpop.f32.mrb[42].mxu0 }
 0x1f5   : > { %v4801_v41 = vpop.eup %3499  ;;  %3509 = vtanh.f32 %v1996_v54  ;;  %v4805_v30 = vmul.f32 0.5, %v1192_v38  ;;  %v1486_v22 = vmul.f32 %v1192_v38, %v1192_v38  ;;  %v3124_v34 = vpack.c.bf16 %v2284_v27, %v2282_v25  ;;  %v4817_v44 = vpop.f32.mrb[43].mxu0  ;;  %v6131_v25 = vld [vmem:[#allocation56_spill] sm:$0xff] }
 0x1f6   : > { %v1788_v39 = vadd.f32 %v1660_v15, %v946_v56  ;;  %v1869_v7 = vadd.f32 %v1741_v37, %v4768_v45  ;;  %6129 = vst [vmem:[#allocation96_spill] sm:$0xff] %v4809_v19  ;;  %v1533_v24 = vmul.f32 %v1405_v26, %v4795_v48  ;;  %v1198_v54 = vadd.f32 %v4533_v14, %v759_v4 }
 0x1f7   : > { %6128 = vst [vmem:[#allocation95_spill] sm:$0xff] %v4805_v30  ;;  %v1614_v52 = vmul.f32 %v1486_v22, %v1192_v38  ;;  %v952_v40 = vadd.f32 %v4665_v32, %v4344_v5  ;;  %v4819_v47 = vpop.eup %3501  ;;  %3125 = vmatpush1.bf16.msra.mxu1 %v3124_v34  ;;  %v1487_v21 = vmul.f32 %v4809_v19, %v4809_v19 }
 0x1f8   : > { %6130 = vst [vmem:[#allocation97_spill] sm:$0xff] %v4819_v47  ;;  %v1916_v56 = vmul.f32 0.7978846, %v1788_v39  ;;  %v1997_v46 = vmul.f32 0.7978846, %v1869_v7  ;;  %v4824_v23 = vadd.f32 %v6131_v25, %v759_v4  ;;  %v4826_v15 = vpop.eup %3503  ;;  %v4828_v27 = vmul.f32 0.5, %v1198_v54 }
 0x1f9   : > { %v1661_v37 = vmul.f32 0.044715, %v1533_v24  ;;  %v1742_v14 = vmul.f32 0.044715, %v1614_v52  ;;  %v1488_v32 = vmul.f32 %v1198_v54, %v1198_v54  ;;  %v1615_v26 = vmul.f32 %v1487_v21, %v4809_v19  ;;  %v4833_v7 = vpop.f32.mrb[44].mxu0  ;;  %v764_v52 = vpop.permute.xlu0 %763 }
 0x1fa   : > { %6132 = vst [vmem:[#allocation56_spill] sm:$0xff] %v4824_v23  ;;  %6133 = vst [vmem:[#allocation98_spill] sm:$0xff] %v4828_v27  ;;  %3511 = vtanh.f32 %v1916_v56  ;;  %v4831_v22 = vmul.f32 0.5, %v952_v40  ;;  %v1406_v39 = vmul.f32 %v952_v40, %v952_v40  ;;  %v4835_v34 = vpop.eup %3505  ;;  %v4838_v24 = vpop.f32.mrb[45].mxu0  ;;  %v1489_v56 = vmul.f32 %v4824_v23, %v4824_v23 }
 0x1fb   : > { %6135 = vst [vmem:[#allocation100_spill] sm:$0xff] %v4835_v34  ;;  %3513 = vtanh.f32 %v1997_v46  ;;  %v1789_v4 = vadd.f32 %v1661_v37, %v4795_v48  ;;  %v1870_v25 = vadd.f32 %v1742_v14, %v1192_v38  ;;  %v1616_v30 = vmul.f32 %v1488_v32, %v1198_v54  ;;  %v6136_v46 = vld [vmem:[#allocation58_spill] sm:$0xff] }
 0x1fc   : > { %6134 = vst [vmem:[#allocation99_spill] sm:$0xff] %v4831_v22  ;;  %v1743_v27 = vmul.f32 0.044715, %v1615_v26  ;;  %v1534_v45 = vmul.f32 %v1406_v39, %v952_v40  ;;  %v4844_v21 = vadd.f32 %v4678_v55, %v4344_v5  ;;  %v1204_v42 = vadd.f32 %v6136_v46, %v764_v52  ;;  %v4853_v39 = vpop.f32.mrb[46].mxu0  ;;  %v769_v46 = vpop.permute.xlu1 %768  ;;  %v6141_v22 = vld [vmem:[#allocation60_spill] sm:$0xff] }
 0x1fd   : > { %v1917_v8 = vmul.f32 0.7978846, %v1789_v4  ;;  %v1998_v47 = vmul.f32 0.7978846, %v1870_v25  ;;  %v1744_v34 = vmul.f32 0.044715, %v1616_v30  ;;  %v4847_v37 = vpop.eup %3507  ;;  %v1617_v32 = vmul.f32 %v1489_v56, %v4824_v23 }
 0x1fe   : > { %6137 = vst [vmem:[#allocation58_spill] sm:$0xff] %v4847_v37  ;;  %v1871_v38 = vadd.f32 %v1743_v27, %v4809_v19  ;;  %v1662_v14 = vmul.f32 0.044715, %v1534_v45  ;;  %v1407_v26 = vmul.f32 %v4844_v21, %v4844_v21  ;;  %6138 = vst [vmem:[#allocation101_spill] sm:$0xff] %v4853_v39  ;;  %v4857_v55 = vmul.f32 0.5, %v1204_v42  ;;  %v4859_v4 = vpop.f32.mrb[47].mxu0 }
 0x1ff   : > { %v4855_v17 = vpop.eup %3509  ;;  %3515 = vtanh.f32 %v1917_v8  ;;  %v1872_v5 = vadd.f32 %v1744_v34, %v1198_v54  ;;  %v1490_v30 = vmul.f32 %v1204_v42, %v1204_v42  ;;  %v1745_v45 = vmul.f32 0.044715, %v1617_v32  ;;  %v6143_v34 = vld [vmem:[#allocation62_spill] sm:$0xff] }
 0x200   : > { %6139 = vst [vmem:[#allocation102_spill] sm:$0xff] %v4855_v17  ;;  %6140 = vst [vmem:[#allocation103_spill] sm:$0xff] %v4857_v55  ;;  %3517 = vtanh.f32 %v1998_v47  ;;  %v1999_v25 = vmul.f32 0.7978846, %v1871_v38  ;;  %v1790_v27 = vadd.f32 %v1662_v14, %v952_v40  ;;  %v1535_v19 = vmul.f32 %v1407_v26, %v4844_v21  ;;  %v4867_v17 = vpop.f32.mrb[48].mxu0 }
 0x201   : > { %v2000_v56 = vmul.f32 0.7978846, %v1872_v5  ;;  %v1618_v37 = vmul.f32 %v1490_v30, %v1204_v42  ;;  %v4863_v39 = vadd.f32 %v6141_v22, %v764_v52  ;;  %v1873_v54 = vadd.f32 %v1745_v45, %v4824_v23  ;;  %v4871_v14 = vpop.f32.mrb[49].mxu0 }
 0x202   : > { %3519 = vtanh.f32 %v1999_v25  ;;  %v1918_v8 = vmul.f32 0.7978846, %v1790_v27  ;;  %v1210_v55 = vadd.f32 %v6143_v34, %v769_v46  ;;  %v1663_v47 = vmul.f32 0.044715, %v1535_v19  ;;  %6144 = vst [vmem:[#allocation62_spill] sm:$0xff] %v4871_v14  ;;  %v6148_v14 = vld [vmem:[#allocation17_spill] sm:$0xff] }
 0x203   : > { %6142 = vst [vmem:[#allocation60_spill] sm:$0xff] %v4863_v39  ;;  %3521 = vtanh.f32 %v2000_v56  ;;  %v1746_v40 = vmul.f32 0.044715, %v1618_v37  ;;  %v1491_v38 = vmul.f32 %v4863_v39, %v4863_v39  ;;  %v2001_v22 = vmul.f32 0.7978846, %v1873_v54  ;;  %v6147_v37 = vld [vmem:[#allocation54_spill] sm:$0xff] }
 0x204   : > { %v4873_v32 = vpop.eup %3511  ;;  %3523 = vtanh.f32 %v1918_v8  ;;  %v4875_v52 = vmul.f32 0.5, %v1210_v55  ;;  %v1492_v26 = vmul.f32 %v1210_v55, %v1210_v55  ;;  %v1791_v30 = vadd.f32 %v1663_v47, %v4844_v21  ;;  %v4884_v8 = vpop.f32.mrb[50].mxu0 }
 0x205   : > { %v4877_v5 = vpop.eup %3513  ;;  %v1874_v25 = vadd.f32 %v1746_v40, %v1204_v42  ;;  %v1619_v19 = vmul.f32 %v1491_v38, %v4863_v39  ;;  %v1263_v27 = vmul.f32 0.5, %v6147_v37  ;;  %3525 = vtanh.f32 %v2001_v22  ;;  %v4892_v22 = vpop.f32.mrb[51].mxu0 }
 0x206   : > { %6145 = vst [vmem:[#allocation104_spill] sm:$0xff] %v4875_v52  ;;  %6146 = vst [vmem:[#allocation105_spill] sm:$0xff] %v4877_v5  ;;  %v1620_v45 = vmul.f32 %v1492_v26, %v1210_v55  ;;  %v1265_v56 = vmul.f32 0.5, %v4538_v43  ;;  %v2159_v34 = vadd.f32 1.0, %v4620_v13  ;;  %v1919_v54 = vmul.f32 0.7978846, %v1791_v30 }
 0x207   : > { %v2002_v52 = vmul.f32 0.7978846, %v1874_v25  ;;  %v1747_v23 = vmul.f32 0.044715, %v1619_v19  ;;  %v958_v5 = vadd.f32 %v4695_v9, %v6148_v14  ;;  %v2161_v42 = vadd.f32 1.0, %v4640_v53 }
 0x208   : > { %v1748_v47 = vmul.f32 0.044715, %v1620_v45  ;;  %v2287_v40 = vmul.f32 %v2159_v34, %v1263_v27  ;;  %v4890_v38 = vadd.f32 %v4572_v35, %v769_v46  ;;  %3527 = vtanh.f32 %v1919_v54  ;;  %v4903_v35 = vpop.f32.mrb[52].mxu0 }
 0x209   : > { %v4894_v43 = vpop.eup %3515  ;;  %v1875_v13 = vadd.f32 %v1747_v23, %v4863_v39  ;;  %v4897_v26 = vmul.f32 0.5, %v958_v5  ;;  %v1408_v30 = vmul.f32 %v958_v5, %v958_v5  ;;  %3529 = vtanh.f32 %v2002_v52  ;;  %v4907_v23 = vpop.f32.mrb[53].mxu0 }
 0x20a   : > { %6149 = vst [vmem:[#allocation54_spill] sm:$0xff] %v4890_v38  ;;  %v4899_v25 = vpop.eup %3517  ;;  %v1876_v9 = vadd.f32 %v1748_v47, %v1210_v55  ;;  %v2289_v19 = vmul.f32 %v2161_v42, %v1265_v56  ;;  %v1493_v53 = vmul.f32 %v4890_v38, %v4890_v38  ;;  %v2158_v27 = vadd.f32 1.0, %v4616_v0  ;;  %v774_v47 = vpop.permute.xlu0 %773  ;;  %v6153_v0 = vld [vmem:[#allocation55_spill] sm:$0xff] }
 0x20b   : > { %6150 = vst [vmem:[#allocation17_spill] sm:$0xff] %v4899_v25  ;;  %v2003_v46 = vmul.f32 0.7978846, %v1875_v13  ;;  %v1536_v37 = vmul.f32 %v1408_v30, %v958_v5  ;;  %v2160_v45 = vadd.f32 1.0, %v4634_v3  ;;  %v4914_v52 = vadd.f32 %v4702_v6, %v6148_v14  ;;  %v6154_v3 = vld [vmem:[#allocation57_spill] sm:$0xff] }
 0x20c   : > { %v4909_v34 = vpop.eup %3519  ;;  %v2004_v54 = vmul.f32 0.7978846, %v1876_v9  ;;  %v3126_v39 = vpack.c.bf16 %v2289_v19, %v2287_v40  ;;  %v1621_v55 = vmul.f32 %v1493_v53, %v4890_v38  ;;  %v2286_v13 = vmul.f32 %v2158_v27, %v6153_v0  ;;  %v4925_v14 = vpop.f32.mrb[54].mxu0 }
 0x20d   : > { %6151 = vst [vmem:[#allocation106_spill] sm:$0xff] %v4909_v34  ;;  %v4916_v56 = vpop.eup %3521  ;;  %3531 = vtanh.f32 %v2003_v46  ;;  %v1664_v42 = vmul.f32 0.044715, %v1536_v37  ;;  %v2288_v30 = vmul.f32 %v2160_v45, %v6154_v3  ;;  %v779_v34 = vpop.permute.xlu1 %778  ;;  %v1409_v9 = vmul.f32 %v4914_v52, %v4914_v52  ;;  %v6159_v3 = vld [vmem:[#allocation18_spill] sm:$0xff] }
 0x20e   : > { %6152 = vst [vmem:[#allocation107_spill] sm:$0xff] %v4916_v56  ;;  %v4920_v25 = vpop.eup %3523  ;;  %3533 = vtanh.f32 %v2004_v54  ;;  %3127 = vmatprep.subr.bf16.mxu1 %v3126_v39  ;;  %v1749_v40 = vmul.f32 0.044715, %v1621_v55  ;;  %v1216_v6 = vadd.f32 %v4587_v18, %v774_v47  ;;  %v4928_v46 = vadd.f32 %v4593_v50, %v774_v47  ;;  %v4931_v27 = vpop.f32.mrb[55].mxu0 }
 0x20f   : > { %v1792_v19 = vadd.f32 %v1664_v42, %v958_v5  ;;  %v3128_v53 = vpack.c.bf16 %v2288_v30, %v2286_v13  ;;  %v1222_v37 = vadd.f32 %v4610_v58, %v779_v34  ;;  %v4933_v45 = vpop.eup %3525  ;;  %v1537_v54 = vmul.f32 %v1409_v9, %v4914_v52 }
 0x210   : > { %6155 = vst [vmem:[#allocation55_spill] sm:$0xff] %v4928_v46  ;;  %6156 = vst [vmem:[#allocation57_spill] sm:$0xff] %v4933_v45  ;;  %v1877_v39 = vadd.f32 %v1749_v40, %v4890_v38  ;;  %v4937_v55 = vmul.f32 0.5, %v1216_v6  ;;  %v1494_v18 = vmul.f32 %v1216_v6, %v1216_v6  ;;  %v1495_v5 = vmul.f32 %v4928_v46, %v4928_v46  ;;  %v4945_v40 = vpop.f32.mrb[56].mxu0 }
 0x211   : > { %v1920_v0 = vmul.f32 0.7978846, %v1792_v19  ;;  %3129 = vmatpush1.bf16.msra.mxu1 %v3128_v53  ;;  %v4941_v50 = vmul.f32 0.5, %v1222_v37  ;;  %v1496_v47 = vmul.f32 %v1222_v37, %v1222_v37  ;;  %v1665_v42 = vmul.f32 0.044715, %v1537_v54  ;;  %6160 = vst [vmem:[#allocation18_spill] sm:$0xff] %v4945_v40 }
 0x212   : > { %6157 = vst [vmem:[#allocation108_spill] sm:$0xff] %v4937_v55  ;;  %v2005_v58 = vmul.f32 0.7978846, %v1877_v39  ;;  %v1622_v13 = vmul.f32 %v1494_v18, %v1216_v6  ;;  %v964_v30 = vadd.f32 %v4720_v60, %v6159_v3  ;;  %v4947_v9 = vpop.eup %3527  ;;  %v1623_v19 = vmul.f32 %v1495_v5, %v4928_v46  ;;  %v4953_v38 = vpop.f32.mrb[57].mxu0 }
 0x213   : > { %6158 = vst [vmem:[#allocation109_spill] sm:$0xff] %v4941_v50  ;;  %3535 = vtanh.f32 %v1920_v0  ;;  %v1624_v53 = vmul.f32 %v1496_v47, %v1222_v37  ;;  %v4951_v55 = vadd.f32 %v4614_v33, %v779_v34  ;;  %6162 = vst [vmem:[#allocation111_spill] sm:$0xff] %v4953_v38  ;;  %v4955_v50 = vpop.eup %3529  ;;  %v1793_v39 = vadd.f32 %v1665_v42, %v4914_v52  ;;  %v784_v18 = vpop.permute.xlu0 %783 }
 0x214   : > { %6163 = vst [vmem:[#allocation112_spill] sm:$0xff] %v4955_v50  ;;  %3537 = vtanh.f32 %v2005_v58  ;;  %v1750_v54 = vmul.f32 0.044715, %v1622_v13  ;;  %v4958_v60 = vmul.f32 0.5, %v964_v30  ;;  %v1751_v56 = vmul.f32 0.044715, %v1623_v19 }
 0x215   : > { %6161 = vst [vmem:[#allocation110_spill] sm:$0xff] %v4951_v55  ;;  %v1752_v45 = vmul.f32 0.044715, %v1624_v53  ;;  %v1410_v0 = vmul.f32 %v964_v30, %v964_v30  ;;  %v1497_v5 = vmul.f32 %v4951_v55, %v4951_v55  ;;  %v1921_v47 = vmul.f32 0.7978846, %v1793_v39  ;;  %v4967_v50 = vpop.f32.mrb[58].mxu0 }
 0x216   : > { %v1878_v33 = vadd.f32 %v1750_v54, %v1216_v6  ;;  %v4964_v34 = vadd.f32 %v4725_v20, %v6159_v3  ;;  %v1228_v58 = vadd.f32 %v4632_v36, %v784_v18  ;;  %6164 = vst [vmem:[#allocation113_spill] sm:$0xff] %v4967_v50  ;;  %v1879_v13 = vadd.f32 %v1751_v56, %v4928_v46  ;;  %v4973_v40 = vpop.f32.mrb[59].mxu0  ;;  %v789_v56 = vpop.permute.xlu1 %788 }
 0x217   : > { %v4969_v42 = vpop.eup %3531  ;;  %v1880_v19 = vadd.f32 %v1752_v45, %v1222_v37  ;;  %v1538_v53 = vmul.f32 %v1410_v0, %v964_v30  ;;  %v1625_v38 = vmul.f32 %v1497_v5, %v4951_v55  ;;  %6166 = vst [vmem:[#allocation115_spill] sm:$0xff] %v4973_v40  ;;  %3539 = vtanh.f32 %v1921_v47  ;;  %v6179_v40 = vld [vmem:[#allocation19_spill] sm:$0xff] }
 0x218   : > { %6165 = vst [vmem:[#allocation114_spill] sm:$0xff] %v4969_v42  ;;  %v4975_v39 = vpop.eup %3533  ;;  %v2006_v6 = vmul.f32 0.7978846, %v1878_v33  ;;  %v1411_v20 = vmul.f32 %v4964_v34, %v4964_v34  ;;  %v4979_v36 = vmul.f32 0.5, %v1228_v58  ;;  %v2007_v3 = vmul.f32 0.7978846, %v1879_v13 }
 0x219   : > { %6167 = vst [vmem:[#allocation116_spill] sm:$0xff] %v4975_v39  ;;  %v2008_v54 = vmul.f32 0.7978846, %v1880_v19  ;;  %v1666_v42 = vmul.f32 0.044715, %v1538_v53  ;;  %v1498_v50 = vmul.f32 %v1228_v58, %v1228_v58  ;;  %v4983_v0 = vadd.f32 %v4638_v31, %v784_v18  ;;  %v4985_v5 = vpop.f32.mrb[60].mxu0 }
 0x21a   : > { %6168 = vst [vmem:[#allocation117_spill] sm:$0xff] %v4979_v36  ;;  %3541 = vtanh.f32 %v2006_v6  ;;  %v1753_v37 = vmul.f32 0.044715, %v1625_v38  ;;  %v1539_v45 = vmul.f32 %v1411_v20, %v4964_v34  ;;  %6170 = vst [vmem:[#allocation119_spill] sm:$0xff] %v4985_v5  ;;  %v1234_v46 = vadd.f32 %v4646_v49, %v789_v56  ;;  %v4988_v36 = vpop.f32.mrb[61].mxu0  ;;  %v6176_v39 = vld [vmem:[#allocation64_spill] sm:$0xff] }
 0x21b   : > { %6169 = vst [vmem:[#allocation118_spill] sm:$0xff] %v4983_v0  ;;  %3543 = vtanh.f32 %v2007_v3  ;;  %v1794_v47 = vadd.f32 %v1666_v42, %v964_v30  ;;  %v1626_v33 = vmul.f32 %v1498_v50, %v1228_v58  ;;  %6171 = vst [vmem:[#allocation120_spill] sm:$0xff] %v4988_v36  ;;  %v1499_v38 = vmul.f32 %v4983_v0, %v4983_v0  ;;  %v6174_v3 = vld [vmem:[#allocation59_spill] sm:$0xff] }
 0x21c   : > { %3545 = vtanh.f32 %v2008_v54  ;;  %v1881_v13 = vadd.f32 %v1753_v37, %v4951_v55  ;;  %v1667_v19 = vmul.f32 0.044715, %v1539_v45  ;;  %v4995_v6 = vmul.f32 0.5, %v1234_v46  ;;  %v5002_v37 = vpop.f32.mrb[62].mxu0  ;;  %v6178_v5 = vld [vmem:[#allocation83_spill] sm:$0xff] }
 0x21d   : > { %v4993_v53 = vpop.eup %3535  ;;  %v1922_v31 = vmul.f32 0.7978846, %v1794_v47  ;;  %v1754_v18 = vmul.f32 0.044715, %v1626_v33  ;;  %v1500_v20 = vmul.f32 %v1234_v46, %v1234_v46  ;;  %v1627_v42 = vmul.f32 %v1499_v38, %v4983_v0  ;;  %6175 = vst [vmem:[#allocation59_spill] sm:$0xff] %v5002_v37  ;;  %v5005_v33 = vpop.f32.mrb[63].mxu0 }
 0x21e   : > { %6172 = vst [vmem:[#allocation121_spill] sm:$0xff] %v4995_v6  ;;  %v4997_v30 = vpop.eup %3537  ;;  %v2009_v50 = vmul.f32 0.7978846, %v1881_v13  ;;  %v1795_v49 = vadd.f32 %v1667_v19, %v4964_v34  ;;  %v1267_v54 = vmul.f32 0.5, %v6174_v3  ;;  %v1269_v47 = vmul.f32 0.5, %v6176_v39  ;;  %6177 = vst [vmem:[#allocation64_spill] sm:$0xff] %v5005_v33 }
 0x21f   : > { %6173 = vst [vmem:[#allocation122_spill] sm:$0xff] %v4997_v30  ;;  %3547 = vtanh.f32 %v1922_v31  ;;  %v1882_v45 = vadd.f32 %v1754_v18, %v1228_v58  ;;  %v1628_v55 = vmul.f32 %v1500_v20, %v1234_v46  ;;  %v1755_v36 = vmul.f32 0.044715, %v1627_v42  ;;  %v6180_v31 = vld [vmem:[#allocation68_spill] sm:$0xff] }
 0x220   : > { %3549 = vtanh.f32 %v2009_v50  ;;  %v1923_v6 = vmul.f32 0.7978846, %v1795_v49  ;;  %v2163_v13 = vadd.f32 1.0, %v4662_v59  ;;  %v2165_v38 = vadd.f32 1.0, %v6178_v5  ;;  %v5017_v20 = vpop.f32.mrb[64].mxu0 }
 0x221   : > { %v2010_v30 = vmul.f32 0.7978846, %v1882_v45  ;;  %v1756_v19 = vmul.f32 0.044715, %v1628_v55  ;;  %v970_v3 = vadd.f32 %v4738_v62, %v6179_v40  ;;  %v5011_v37 = vpop.eup %3539  ;;  %v1883_v58 = vadd.f32 %v1755_v36, %v4983_v0  ;;  %6182 = vst [vmem:[#allocation19_spill] sm:$0xff] %v5017_v20  ;;  %v5021_v5 = vpop.f32.mrb[65].mxu0 }
 0x222   : > { %3551 = vtanh.f32 %v1923_v6  ;;  %v2291_v39 = vmul.f32 %v2163_v13, %v1267_v54  ;;  %v5015_v18 = vadd.f32 %v6180_v31, %v789_v56  ;;  %v2293_v50 = vmul.f32 %v2165_v38, %v1269_v47  ;;  %6183 = vst [vmem:[#allocation68_spill] sm:$0xff] %v5021_v5  ;;  %v6185_v6 = vld [vmem:[#allocation69_spill] sm:$0xff]  ;;  %v794_v38 = vpop.permute.xlu0 %793 }
 0x223   : > { %3553 = vtanh.f32 %v2010_v30  ;;  %v1884_v59 = vadd.f32 %v1756_v19, %v1234_v46  ;;  %v5019_v55 = vmul.f32 0.5, %v970_v3  ;;  %v2011_v62 = vmul.f32 0.7978846, %v1883_v58  ;;  %v6187_v30 = vld [vmem:[#allocation77_spill] sm:$0xff] }
 0x224   : > { %6181 = vst [vmem:[#allocation83_spill] sm:$0xff] %v5015_v18  ;;  %v5023_v49 = vpop.eup %3541  ;;  %v1412_v42 = vmul.f32 %v970_v3, %v970_v3  ;;  %v1501_v36 = vmul.f32 %v5015_v18, %v5015_v18  ;;  %v2162_v54 = vadd.f32 1.0, %v6185_v6  ;;  %v3130_v13 = vpack.c.bf16 %v2293_v50, %v2291_v39  ;;  %v6189_v0 = vld [vmem:[#allocation61_spill] sm:$0xff]  ;;  %v5039_v6 = vpop.f32.mrb[66].mxu0  ;;  %v6191_v39 = vld [vmem:[#allocation63_spill] sm:$0xff] }
 0x225   : > { %6184 = vst [vmem:[#allocation123_spill] sm:$0xff] %v5023_v49  ;;  %v5028_v56 = vpop.eup %3543  ;;  %v2012_v45 = vmul.f32 0.7978846, %v1884_v59  ;;  %v2164_v46 = vadd.f32 1.0, %v6187_v30  ;;  %v5033_v47 = vadd.f32 %v4740_v10, %v6179_v40  ;;  %3555 = vtanh.f32 %v2011_v62  ;;  %6190 = vst [vmem:[#allocation61_spill] sm:$0xff] %v5039_v6  ;;  %v6192_v40 = vld [vmem:[#allocation71_spill] sm:$0xff] }
 0x226   : > { %6186 = vst [vmem:[#allocation69_spill] sm:$0xff] %v5028_v56  ;;  %v5035_v19 = vpop.eup %3545  ;;  %v1540_v58 = vmul.f32 %v1412_v42, %v970_v3  ;;  %v1629_v31 = vmul.f32 %v1501_v36, %v5015_v18  ;;  %v2290_v49 = vmul.f32 %v2162_v54, %v6189_v0  ;;  %v799_v56 = vpop.permute.xlu1 %798  ;;  %3131 = vmatprep.subr.bf16.mxu1 %v3130_v13  ;;  %v6196_v0 = vld [vmem:[#allocation78_spill] sm:$0xff] }
 0x227   : > { %6188 = vst [vmem:[#allocation77_spill] sm:$0xff] %v5035_v19  ;;  %3557 = vtanh.f32 %v2012_v45  ;;  %v2292_v59 = vmul.f32 %v2164_v46, %v6191_v39  ;;  %v1413_v10 = vmul.f32 %v5033_v47, %v5033_v47  ;;  %v1240_v50 = vadd.f32 %v6192_v40, %v794_v38  ;;  %v5045_v30 = vpop.f32.mrb[67].mxu0  ;;  %v6194_v19 = vld [vmem:[#allocation74_spill] sm:$0xff] }
 0x228   : > { %6193 = vst [vmem:[#allocation63_spill] sm:$0xff] %v5045_v30  ;;  %v1668_v62 = vmul.f32 0.044715, %v1540_v58  ;;  %v1757_v42 = vmul.f32 0.044715, %v1629_v31  ;;  %v5048_v36 = vadd.f32 %v6194_v19, %v794_v38  ;;  %v1246_v54 = vadd.f32 %v6196_v0, %v799_v56  ;;  %v5063_v38 = vpop.f32.mrb[68].mxu0 }
 0x229   : > { %v5051_v6 = vpop.eup %3547  ;;  %v3132_v45 = vpack.c.bf16 %v2292_v59, %v2290_v49  ;;  %v1541_v13 = vmul.f32 %v1413_v10, %v5033_v47  ;;  %v5054_v46 = vmul.f32 0.5, %v1240_v50  ;;  %v1502_v39 = vmul.f32 %v1240_v50, %v1240_v50  ;;  %6200 = vst [vmem:[#allocation125_spill] sm:$0xff] %v5063_v38  ;;  %v6201_v10 = vld [vmem:[#allocation20_spill] sm:$0xff] }
 0x22a   : > { %6195 = vst [vmem:[#allocation71_spill] sm:$0xff] %v5048_v36  ;;  %v5056_v5 = vpop.eup %3549  ;;  %v1796_v40 = vadd.f32 %v1668_v62, %v970_v3  ;;  %v1885_v30 = vadd.f32 %v1757_v42, %v5015_v18  ;;  %v1503_v58 = vmul.f32 %v5048_v36, %v5048_v36  ;;  %v5061_v19 = vmul.f32 0.5, %v1246_v54  ;;  %v6203_v18 = vld [vmem:[#allocation80_spill] sm:$0xff] }
 0x22b   : > { %6197 = vst [vmem:[#allocation74_spill] sm:$0xff] %v5054_v46  ;;  %6198 = vst [vmem:[#allocation78_spill] sm:$0xff] %v5056_v5  ;;  %3133 = vmatpush1.bf16.msra.mxu1 %v3132_v45  ;;  %v1669_v31 = vmul.f32 0.044715, %v1541_v13  ;;  %v1630_v49 = vmul.f32 %v1502_v39, %v1240_v50  ;;  %v1504_v59 = vmul.f32 %v1246_v54, %v1246_v54  ;;  %v5067_v46 = vpop.f32.mrb[69].mxu0 }
 0x22c   : > { %6199 = vst [vmem:[#allocation124_spill] sm:$0xff] %v5061_v19  ;;  %v976_v0 = vadd.f32 %v4755_v28, %v6201_v10  ;;  %6202 = vst [vmem:[#allocation20_spill] sm:$0xff] %v5067_v46  ;;  %v5069_v5 = vpop.eup %3551  ;;  %v1924_v3 = vmul.f32 0.7978846, %v1796_v40  ;;  %v2013_v62 = vmul.f32 0.7978846, %v1885_v30  ;;  %v1631_v42 = vmul.f32 %v1503_v58, %v5048_v36 }
 0x22d   : > { %v5073_v20 = vadd.f32 %v6203_v18, %v799_v56  ;;  %v5075_v19 = vpop.eup %3553  ;;  %v1797_v45 = vadd.f32 %v1669_v31, %v5033_v47  ;;  %v1758_v13 = vmul.f32 0.044715, %v1630_v49  ;;  %v1632_v39 = vmul.f32 %v1504_v59, %v1246_v54  ;;  %v5082_v30 = vpop.f32.mrb[70].mxu0 }
 0x22e   : > { %6205 = vst [vmem:[#allocation126_spill] sm:$0xff] %v5075_v19  ;;  %v5078_v38 = vmul.f32 0.5, %v976_v0  ;;  %3559 = vtanh.f32 %v1924_v3  ;;  %v1759_v28 = vmul.f32 0.044715, %v1631_v42  ;;  %v1414_v46 = vmul.f32 %v976_v0, %v976_v0  ;;  %6206 = vst [vmem:[#allocation127_spill] sm:$0xff] %v5082_v30  ;;  %v5084_v33 = vpop.f32.mrb[71].mxu0 }
 0x22f   : > { %6204 = vst [vmem:[#allocation80_spill] sm:$0xff] %v5073_v20  ;;  %v1505_v40 = vmul.f32 %v5073_v20, %v5073_v20  ;;  %3561 = vtanh.f32 %v2013_v62  ;;  %v1925_v58 = vmul.f32 0.7978846, %v1797_v45  ;;  %v1886_v18 = vadd.f32 %v1758_v13, %v1240_v50  ;;  %6207 = vst [vmem:[#allocation128_spill] sm:$0xff] %v5084_v33  ;;  %v2403_v19 = vld [vmem:[#allocation8 + $0x8] sm:$0xff]  ;;  %v5086_v31 = vpop.eup %3555  ;;  %v6210_v45 = vld [vmem:[#allocation65_spill] sm:$0xff] }
 0x230   : > { %v1760_v56 = vmul.f32 0.044715, %v1632_v39  ;;  %6208 = vst [vmem:[#allocation129_spill] sm:$0xff] %v5086_v31  ;;  %v1887_v49 = vadd.f32 %v1759_v28, %v5048_v36  ;;  %v1542_v59 = vmul.f32 %v1414_v46, %v976_v0  ;;  %v5092_v42 = vadd.f32 %v4758_v61, %v6201_v10  ;;  %2626 = vmatprep.mubr.f32.mxu1 %v2403_v19  ;;  %v6212_v61 = vld [vmem:[#allocation86_spill] sm:$0xff]  ;;  %v5101_v19 = vpop.f32.mrb[72].mxu0 }
 0x231   : > { %v1633_v3 = vmul.f32 %v1505_v40, %v5073_v20  ;;  %v5094_v30 = vpop.eup %3557  ;;  %3563 = vtanh.f32 %v1925_v58  ;;  %v2014_v50 = vmul.f32 0.7978846, %v1886_v18  ;;  %v1271_v13 = vmul.f32 0.5, %v6210_v45  ;;  %v6211_v40 = vld [vmem:[#allocation70_spill] sm:$0xff] }
 0x232   : > { %6209 = vst [vmem:[#allocation130_spill] sm:$0xff] %v5094_v30  ;;  %v1888_v62 = vadd.f32 %v1760_v56, %v1246_v54  ;;  %v2015_v39 = vmul.f32 0.7978846, %v1887_v49  ;;  %v1670_v33 = vmul.f32 0.044715, %v1542_v59  ;;  %v1415_v46 = vmul.f32 %v5092_v42, %v5092_v42  ;;  %v5105_v56 = vpop.f32.mrb[73].mxu0 }
 0x233   : > { %v1761_v31 = vmul.f32 0.044715, %v1633_v3  ;;  %3565 = vtanh.f32 %v2014_v50  ;;  %v1273_v36 = vmul.f32 0.5, %v6211_v40  ;;  %v2167_v10 = vadd.f32 1.0, %v6212_v61  ;;  %v6213_v3 = vld [vmem:[#allocation21_spill] sm:$0xff] }
 0x234   : > { %v2016_v28 = vmul.f32 0.7978846, %v1888_v62  ;;  %3567 = vtanh.f32 %v2015_v39  ;;  %v1798_v58 = vadd.f32 %v1670_v33, %v976_v0  ;;  %v1543_v18 = vmul.f32 %v1415_v46, %v5092_v42  ;;  %v6214_v46 = vld [vmem:[#allocation85_spill] sm:$0xff] }
 0x235   : > { %v1889_v54 = vadd.f32 %v1761_v31, %v5073_v20  ;;  %v2169_v49 = vadd.f32 1.0, %v4772_v63  ;;  %v2295_v59 = vmul.f32 %v2167_v10, %v1271_v13  ;;  %v982_v50 = vadd.f32 %v4770_v11, %v6213_v3 }
 0x236   : > { %3569 = vtanh.f32 %v2016_v28  ;;  %v1926_v62 = vmul.f32 0.7978846, %v1798_v58  ;;  %v1671_v40 = vmul.f32 0.044715, %v1543_v18  ;;  %v5112_v39 = vadd.f32 %v4774_v16, %v6213_v3  ;;  %v5117_v28 = vpop.f32.mrb[74].mxu0  ;;  %v6218_v18 = vld [vmem:[#allocation66_spill] sm:$0xff] }
 0x237   : > { %v2017_v45 = vmul.f32 0.7978846, %v1889_v54  ;;  %v2297_v33 = vmul.f32 %v2169_v49, %v1273_v36  ;;  %v5114_v0 = vmul.f32 0.5, %v982_v50  ;;  %v1416_v31 = vmul.f32 %v982_v50, %v982_v50  ;;  %6215 = vst [vmem:[#allocation65_spill] sm:$0xff] %v5117_v28  ;;  %v5125_v16 = vpop.f32.mrb[75].mxu0 }
 0x238   : > { %v2166_v61 = vadd.f32 1.0, %v6214_v46  ;;  %v5119_v63 = vpop.eup %3559  ;;  %3571 = vtanh.f32 %v1926_v62  ;;  %v1799_v11 = vadd.f32 %v1671_v40, %v5092_v42  ;;  %v2168_v13 = vadd.f32 1.0, %v4760_v1  ;;  %6216 = vst [vmem:[#allocation70_spill] sm:$0xff] %v5125_v16  ;;  %v6219_v46 = vld [vmem:[#allocation67_spill] sm:$0xff]  ;;  %v6220_v40 = vld [vmem:[#allocation22_spill] sm:$0xff]  ;;  %v5134_v30 = vpop.f32.mrb[76].mxu0 }
 0x239   : > { %v1417_v10 = vmul.f32 %v5112_v39, %v5112_v39  ;;  %v5127_v36 = vpop.eup %3561  ;;  %3573 = vtanh.f32 %v2017_v45  ;;  %v3134_v58 = vpack.c.bf16 %v2297_v33, %v2295_v59  ;;  %v1544_v54 = vmul.f32 %v1416_v31, %v982_v50  ;;  %v5144_v31 = vpop.f32.mrb[77].mxu0 }
 0x23a   : > { %6217 = vst [vmem:[#allocation86_spill] sm:$0xff] %v5127_v36  ;;  %v2294_v49 = vmul.f32 %v2166_v61, %v6218_v18  ;;  %v1927_v3 = vmul.f32 0.7978846, %v1799_v11  ;;  %v2296_v20 = vmul.f32 %v2168_v13, %v6219_v46  ;;  %v988_v1 = vadd.f32 %v4788_v12, %v6220_v40 }
 0x23b   : > { %v1545_v62 = vmul.f32 %v1417_v10, %v5112_v39  ;;  %v5136_v28 = vpop.eup %3563  ;;  %3135 = vmatprep.subr.bf16.mxu1 %v3134_v58  ;;  %v1672_v16 = vmul.f32 0.044715, %v1544_v54  ;;  %v5140_v59 = vadd.f32 %v4798_v29, %v6220_v40  ;;  %v1275_v45 = vmul.f32 0.5, %v4718_v57 }
 0x23c   : > { %v1277_v33 = vmul.f32 0.5, %v4795_v48  ;;  %3575 = vtanh.f32 %v1927_v3  ;;  %v3136_v61 = vpack.c.bf16 %v2296_v20, %v2294_v49  ;;  %v5146_v12 = vmul.f32 0.5, %v988_v1  ;;  %v6223_v20 = vld [vmem:[#allocation23_spill] sm:$0xff]  ;;  %v5160_v46 = vpop.f32.mrb[78].mxu0 }
 0x23d   : > { %v1673_v11 = vmul.f32 0.044715, %v1545_v62  ;;  %v5148_v13 = vpop.eup %3565  ;;  %v1800_v10 = vadd.f32 %v1672_v16, %v982_v50  ;;  %v1418_v58 = vmul.f32 %v988_v1, %v988_v1  ;;  %v1419_v54 = vmul.f32 %v5140_v59, %v5140_v59  ;;  %6224 = vst [vmem:[#allocation66_spill] sm:$0xff] %v5160_v46 }
 0x23e   : > { %6221 = vst [vmem:[#allocation21_spill] sm:$0xff] %v5148_v13  ;;  %v2171_v29 = vadd.f32 1.0, %v4826_v15  ;;  %v5153_v18 = vpop.eup %3567  ;;  %3137 = vmatpush1.bf16.msra.mxu1 %v3136_v61  ;;  %v2173_v48 = vadd.f32 1.0, %v4894_v43  ;;  %v994_v49 = vadd.f32 %v4811_v51, %v6223_v20  ;;  %v2170_v3 = vadd.f32 1.0, %v4801_v41  ;;  %v5165_v13 = vpop.f32.mrb[79].mxu0 }
 0x23f   : > { %6222 = vst [vmem:[#allocation85_spill] sm:$0xff] %v5153_v18  ;;  %v1801_v57 = vadd.f32 %v1673_v11, %v5112_v39  ;;  %v1928_v16 = vmul.f32 0.7978846, %v1800_v10  ;;  %v1546_v62 = vmul.f32 %v1418_v58, %v988_v1  ;;  %v1547_v15 = vmul.f32 %v1419_v54, %v5140_v59 }
 0x240   : > { %v5162_v50 = vpop.eup %3569  ;;  %v2299_v40 = vmul.f32 %v2171_v29, %v1275_v45  ;;  %v2301_v11 = vmul.f32 %v2173_v48, %v1277_v33  ;;  %v5167_v18 = vmul.f32 0.5, %v994_v49  ;;  %v1420_v43 = vmul.f32 %v994_v49, %v994_v49  ;;  %v5173_v45 = vpop.f32.mrb[80].mxu0 }
 0x241   : > { %6225 = vst [vmem:[#allocation67_spill] sm:$0xff] %v5162_v50  ;;  %v1929_v61 = vmul.f32 0.7978846, %v1801_v57  ;;  %3577 = vtanh.f32 %v1928_v16  ;;  %v1674_v51 = vmul.f32 0.044715, %v1546_v62  ;;  %v2172_v41 = vadd.f32 1.0, %v4873_v32 }
 0x242   : > { %v1675_v36 = vmul.f32 0.044715, %v1547_v15  ;;  %v5170_v46 = vpop.eup %3571  ;;  %v3138_v10 = vpack.c.bf16 %v2301_v11, %v2299_v40  ;;  %v1548_v58 = vmul.f32 %v1420_v43, %v994_v49  ;;  %v6226_v50 = vld [vmem:[#allocation81_spill] sm:$0xff]  ;;  %v5181_v16 = vadd.f32 %v4817_v44, %v6223_v20  ;;  %v5183_v32 = vpop.f32.mrb[81].mxu0  ;;  %v6228_v15 = vld [vmem:[#allocation24_spill] sm:$0xff] }
 0x243   : > { %3579 = vtanh.f32 %v1929_v61  ;;  %v2298_v54 = vmul.f32 %v2170_v3, %v6226_v50  ;;  %v5175_v29 = vpop.eup %3573  ;;  %v1802_v33 = vadd.f32 %v1674_v51, %v988_v1  ;;  %v2300_v48 = vmul.f32 %v2172_v41, %v4779_v2 }
 0x244   : > { %6227 = vst [vmem:[#allocation22_spill] sm:$0xff] %v5175_v29  ;;  %v1803_v57 = vadd.f32 %v1675_v36, %v5140_v59  ;;  %3139 = vmatprep.subr.bf16.mxu1 %v3138_v10  ;;  %v1676_v62 = vmul.f32 0.044715, %v1548_v58  ;;  %v1000_v3 = vadd.f32 %v4833_v7, %v6228_v15  ;;  %v5189_v50 = vadd.f32 %v4838_v24, %v6228_v15  ;;  %v5200_v51 = vpop.f32.mrb[82].mxu0  ;;  %v6231_v15 = vld [vmem:[#allocation101_spill] sm:$0xff] }
 0x245   : > { %v1279_v1 = vmul.f32 0.5, %v4844_v21  ;;  %v1930_v36 = vmul.f32 0.7978846, %v1802_v33  ;;  %v3140_v2 = vpack.c.bf16 %v2300_v48, %v2298_v54  ;;  %v1421_v44 = vmul.f32 %v5181_v16, %v5181_v16  ;;  %v5205_v10 = vpop.f32.mrb[83].mxu0 }
 0x246   : > { %v1931_v40 = vmul.f32 0.7978846, %v1803_v57  ;;  %v5194_v20 = vpop.eup %3575  ;;  %v1804_v61 = vadd.f32 %v1676_v62, %v994_v49  ;;  %v5196_v11 = vmul.f32 0.5, %v1000_v3  ;;  %v1422_v43 = vmul.f32 %v1000_v3, %v1000_v3  ;;  %6229 = vst [vmem:[#allocation23_spill] sm:$0xff] %v5205_v10  ;;  %v6230_v62 = vld [vmem:[#allocation25_spill] sm:$0xff]  ;;  %v6235_v10 = vld [vmem:[#allocation26_spill] sm:$0xff] }
 0x247   : > { %v1423_v7 = vmul.f32 %v5189_v50, %v5189_v50  ;;  %3581 = vtanh.f32 %v1930_v36  ;;  %3141 = vmatpush1.bf16.msra.mxu1 %v3140_v2  ;;  %v1549_v24 = vmul.f32 %v1421_v44, %v5181_v16  ;;  %v1281_v21 = vmul.f32 0.5, %v4914_v52 }
 0x248   : > { %v2175_v41 = vadd.f32 1.0, %v4947_v9  ;;  %3583 = vtanh.f32 %v1931_v40  ;;  %v1932_v49 = vmul.f32 0.7978846, %v1804_v61  ;;  %v1550_v58 = vmul.f32 %v1422_v43, %v1000_v3  ;;  %v5212_v9 = vpop.f32.mrb[84].mxu0 }
 0x249   : > { %v1551_v54 = vmul.f32 %v1423_v7, %v5189_v50  ;;  %v1677_v33 = vmul.f32 0.044715, %v1549_v24  ;;  %v2177_v57 = vadd.f32 1.0, %v5011_v37  ;;  %v1006_v36 = vadd.f32 %v6231_v15, %v6230_v62  ;;  %6232 = vst [vmem:[#allocation81_spill] sm:$0xff] %v5212_v9  ;;  %v5219_v37 = vpop.f32.mrb[85].mxu0 }
 0x24a   : > { %v2303_v48 = vmul.f32 %v2175_v41, %v1279_v1  ;;  %3585 = vtanh.f32 %v1932_v49  ;;  %v1678_v2 = vmul.f32 0.044715, %v1550_v58  ;;  %v2174_v52 = vadd.f32 1.0, %v4920_v25  ;;  %6233 = vst [vmem:[#allocation24_spill] sm:$0xff] %v5219_v37  ;;  %v6234_v25 = vld [vmem:[#allocation99_spill] sm:$0xff] }
 0x24b   : > { %v1679_v44 = vmul.f32 0.044715, %v1551_v54  ;;  %v5214_v29 = vpop.eup %3577  ;;  %v1805_v40 = vadd.f32 %v1677_v33, %v5181_v16  ;;  %v2305_v61 = vmul.f32 %v2177_v57, %v1281_v21  ;;  %v5217_v43 = vmul.f32 0.5, %v1006_v36 }
 0x24c   : > { %v1424_v7 = vmul.f32 %v1006_v36, %v1006_v36  ;;  %v1806_v24 = vadd.f32 %v1678_v2, %v1000_v3  ;;  %v2176_v49 = vadd.f32 1.0, %v4993_v53  ;;  %v2302_v58 = vmul.f32 %v2174_v52, %v6234_v25  ;;  %v5233_v2 = vpop.f32.mrb[86].mxu0 }
 0x24d   : > { %v5221_v1 = vpop.eup %3579  ;;  %v1807_v41 = vadd.f32 %v1679_v44, %v5189_v50  ;;  %v1933_v54 = vmul.f32 0.7978846, %v1805_v40  ;;  %v3142_v15 = vpack.c.bf16 %v2305_v61, %v2303_v48  ;;  %v5228_v21 = vadd.f32 %v4859_v4, %v6230_v62  ;;  %v6236_v44 = vld [vmem:[#allocation62_spill] sm:$0xff]  ;;  %v5241_v4 = vpop.f32.mrb[87].mxu0 }
 0x24e   : > { %v1552_v9 = vmul.f32 %v1424_v7, %v1006_v36  ;;  %v1934_v33 = vmul.f32 0.7978846, %v1806_v24  ;;  %v2304_v37 = vmul.f32 %v2176_v49, %v4897_v26  ;;  %v1012_v3 = vadd.f32 %v4867_v17, %v6235_v10 }
 0x24f   : > { %v1935_v57 = vmul.f32 0.7978846, %v1807_v41  ;;  %3587 = vtanh.f32 %v1933_v54  ;;  %3143 = vmatprep.subr.bf16.mxu1 %v3142_v15  ;;  %v1425_v48 = vmul.f32 %v5228_v21, %v5228_v21  ;;  %v5239_v52 = vadd.f32 %v6236_v44, %v6235_v10  ;;  %v6238_v44 = vld [vmem:[#allocation27_spill] sm:$0xff] }
 0x250   : > { %v1680_v53 = vmul.f32 0.044715, %v1552_v9  ;;  %3589 = vtanh.f32 %v1934_v33  ;;  %v3144_v62 = vpack.c.bf16 %v2304_v37, %v2302_v58  ;;  %v5243_v26 = vmul.f32 0.5, %v1012_v3  ;;  %v5255_v25 = vpop.f32.mrb[88].mxu0 }
 0x251   : > { %v1426_v40 = vmul.f32 %v1012_v3, %v1012_v3  ;;  %v5245_v17 = vpop.eup %3581  ;;  %3591 = vtanh.f32 %v1935_v57  ;;  %v1553_v9 = vmul.f32 %v1425_v48, %v5228_v21  ;;  %v1427_v7 = vmul.f32 %v5239_v52, %v5239_v52  ;;  %v5259_v33 = vpop.f32.mrb[89].mxu0 }
 0x252   : > { %v1808_v61 = vadd.f32 %v1680_v53, %v1006_v36  ;;  %v5250_v24 = vpop.eup %3583  ;;  %3145 = vmatpush1.bf16.msra.mxu1 %v3144_v62  ;;  %v1283_v41 = vmul.f32 0.5, %v4964_v34  ;;  %v1285_v37 = vmul.f32 0.5, %v5033_v47  ;;  %v2179_v49 = vadd.f32 1.0, %v5069_v5  ;;  %6237 = vst [vmem:[#allocation25_spill] sm:$0xff] %v5259_v33 }
 0x253   : > { %v1554_v10 = vmul.f32 %v1426_v40, %v1012_v3  ;;  %v1681_v54 = vmul.f32 0.044715, %v1553_v9  ;;  %v1555_v36 = vmul.f32 %v1427_v7, %v5239_v52  ;;  %v2181_v15 = vadd.f32 1.0, %v5136_v28 }
 0x254   : > { %v1936_v58 = vmul.f32 0.7978846, %v1808_v61  ;;  %v5261_v57 = vpop.eup %3585  ;;  %v2307_v48 = vmul.f32 %v2179_v49, %v1283_v41  ;;  %v1018_v34 = vadd.f32 %v4884_v8, %v6238_v44  ;;  %v2178_v47 = vadd.f32 1.0, %v5051_v6  ;;  %v5270_v33 = vpop.f32.mrb[90].mxu0 }
 0x255   : > { %v1682_v53 = vmul.f32 0.044715, %v1554_v10  ;;  %v1809_v5 = vadd.f32 %v1681_v54, %v5228_v21  ;;  %v1683_v62 = vmul.f32 0.044715, %v1555_v36  ;;  %v2309_v40 = vmul.f32 %v2181_v15, %v1285_v37  ;;  %v5274_v6 = vpop.f32.mrb[91].mxu0  ;;  %v6239_v15 = vld [vmem:[#allocation28_spill] sm:$0xff] }
 0x256   : > { %3593 = vtanh.f32 %v1936_v58  ;;  %v5267_v9 = vmul.f32 0.5, %v1018_v34  ;;  %v1428_v28 = vmul.f32 %v1018_v34, %v1018_v34  ;;  %v2180_v7 = vadd.f32 1.0, %v5119_v63 }
 0x257   : > { %v1810_v61 = vadd.f32 %v1682_v53, %v1012_v3  ;;  %v1937_v10 = vmul.f32 0.7978846, %v1809_v5  ;;  %v1811_v41 = vadd.f32 %v1683_v62, %v5239_v52  ;;  %v3146_v49 = vpack.c.bf16 %v2309_v40, %v2307_v48 }
 0x258   : > { %v2306_v8 = vmul.f32 %v2178_v47, %v4958_v60  ;;  %v1556_v54 = vmul.f32 %v1428_v28, %v1018_v34  ;;  %v2308_v37 = vmul.f32 %v2180_v7, %v5019_v55  ;;  %v5279_v3 = vadd.f32 %v4892_v22, %v6238_v44  ;;  %v5293_v44 = vpop.f32.mrb[92].mxu0 }
 0x259   : > { %v1938_v58 = vmul.f32 0.7978846, %v1810_v61  ;;  %v5281_v36 = vpop.eup %3587  ;;  %3595 = vtanh.f32 %v1937_v10  ;;  %v1939_v63 = vmul.f32 0.7978846, %v1811_v41  ;;  %3147 = vmatprep.subr.bf16.mxu1 %v3146_v49  ;;  %v1024_v53 = vadd.f32 %v4903_v35, %v6239_v15  ;;  %6240 = vst [vmem:[#allocation101_spill] sm:$0xff] %v5293_v44  ;;  %v5301_v40 = vpop.f32.mrb[93].mxu0 }
 0x25a   : > { %v5287_v60 = vadd.f32 %v4907_v23, %v6239_v15  ;;  %v5289_v48 = vpop.eup %3589  ;;  %v1684_v55 = vmul.f32 0.044715, %v1556_v54  ;;  %v3148_v47 = vpack.c.bf16 %v2308_v37, %v2306_v8  ;;  %v1429_v22 = vmul.f32 %v5279_v3, %v5279_v3  ;;  %6241 = vst [vmem:[#allocation99_spill] sm:$0xff] %v5301_v40 }
 0x25b   : > { %3597 = vtanh.f32 %v1938_v58  ;;  %v5295_v5 = vpop.eup %3591  ;;  %v5297_v62 = vmul.f32 0.5, %v1024_v53  ;;  %v1430_v35 = vmul.f32 %v1024_v53, %v1024_v53  ;;  %v1287_v7 = vmul.f32 0.5, %v5092_v42 }
 0x25c   : > { %3599 = vtanh.f32 %v1939_v63  ;;  %v1431_v23 = vmul.f32 %v5287_v60, %v5287_v60  ;;  %v1812_v61 = vadd.f32 %v1684_v55, %v1018_v34  ;;  %3149 = vmatpush1.bf16.msra.mxu1 %v3148_v47  ;;  %v1557_v28 = vmul.f32 %v1429_v22, %v5279_v3  ;;  %v6242_v63 = vld [vmem:[#allocation29_spill] sm:$0xff]  ;;  %v5312_v55 = vpop.f32.mrb[94].mxu0 }
 0x25d   : > { %v1289_v10 = vmul.f32 0.5, %v5112_v39  ;;  %v1558_v41 = vmul.f32 %v1430_v35, %v1024_v53  ;;  %v2183_v8 = vadd.f32 1.0, %v5194_v20  ;;  %v2185_v58 = vadd.f32 1.0, %v5221_v1  ;;  %6243 = vst [vmem:[#allocation26_spill] sm:$0xff] %v5312_v55 }
 0x25e   : > { %v1559_v49 = vmul.f32 %v1431_v23, %v5287_v60  ;;  %v1940_v54 = vmul.f32 0.7978846, %v1812_v61  ;;  %v1685_v37 = vmul.f32 0.044715, %v1557_v28  ;;  %v1030_v15 = vadd.f32 %v4925_v14, %v6242_v63  ;;  %v5316_v23 = vpop.f32.mrb[95].mxu0 }
 0x25f   : > { %v2182_v34 = vadd.f32 1.0, %v5170_v46  ;;  %v1686_v42 = vmul.f32 0.044715, %v1558_v41  ;;  %v2311_v22 = vmul.f32 %v2183_v8, %v1287_v7  ;;  %v2313_v35 = vmul.f32 %v2185_v58, %v1289_v10  ;;  %v6244_v58 = vld [vmem:[#allocation30_spill] sm:$0xff] }
 0x260   : > { %v5314_v47 = vpop.eup %3593  ;;  %v1687_v39 = vmul.f32 0.044715, %v1559_v49  ;;  %3601 = vtanh.f32 %v1940_v54  ;;  %v1813_v20 = vadd.f32 %v1685_v37, %v5279_v3  ;;  %v5319_v1 = vmul.f32 0.5, %v1030_v15  ;;  %v6245_v54 = vld [vmem:[#allocation18_spill] sm:$0xff] }
 0x261   : > { %v1432_v61 = vmul.f32 %v1030_v15, %v1030_v15  ;;  %v1814_v28 = vadd.f32 %v1686_v42, %v1024_v53  ;;  %v3150_v46 = vpack.c.bf16 %v2313_v35, %v2311_v22  ;;  %v2184_v55 = vadd.f32 1.0, %v5214_v29 }
 0x262   : > { %v1815_v14 = vadd.f32 %v1687_v39, %v5287_v60  ;;  %v1941_v40 = vmul.f32 0.7978846, %v1813_v20  ;;  %v2310_v41 = vmul.f32 %v2182_v34, %v5078_v38  ;;  %v5326_v7 = vadd.f32 %v4931_v27, %v6242_v63  ;;  %v6246_v27 = vld [vmem:[#allocation111_spill] sm:$0xff] }
 0x263   : > { %v1560_v44 = vmul.f32 %v1432_v61, %v1030_v15  ;;  %v5328_v10 = vpop.eup %3595  ;;  %v1942_v49 = vmul.f32 0.7978846, %v1814_v28  ;;  %3151 = vmatprep.subr.bf16.mxu1 %v3150_v46  ;;  %v2312_v53 = vmul.f32 %v2184_v55, %v5114_v0  ;;  %v1036_v37 = vadd.f32 %v6245_v54, %v6244_v58 }
 0x264   : > { %v1943_v8 = vmul.f32 0.7978846, %v1815_v14  ;;  %3603 = vtanh.f32 %v1941_v40  ;;  %v1433_v38 = vmul.f32 %v5326_v7, %v5326_v7  ;;  %v5339_v63 = vadd.f32 %v6246_v27, %v6244_v58  ;;  %v6248_v58 = vld [vmem:[#allocation113_spill] sm:$0xff] }
 0x265   : > { %v5333_v42 = vpop.eup %3597  ;;  %v1688_v29 = vmul.f32 0.044715, %v1560_v44  ;;  %3605 = vtanh.f32 %v1942_v49  ;;  %v3152_v39 = vpack.c.bf16 %v2312_v53, %v2310_v41  ;;  %v5343_v22 = vmul.f32 0.5, %v1036_v37  ;;  %v6247_v53 = vld [vmem:[#allocation31_spill] sm:$0xff] }
 0x266   : > { %v5341_v34 = vpop.eup %3599  ;;  %v1434_v0 = vmul.f32 %v1036_v37, %v1036_v37  ;;  %3607 = vtanh.f32 %v1943_v8  ;;  %v1561_v35 = vmul.f32 %v1433_v38, %v5326_v7  ;;  %v1435_v44 = vmul.f32 %v5339_v63, %v5339_v63 }
 0x267   : > { %v1816_v55 = vadd.f32 %v1688_v29, %v1030_v15  ;;  %3153 = vmatpush1.bf16.msra.mxu1 %v3152_v39  ;;  %v1291_v20 = vmul.f32 0.5, %v5140_v59  ;;  %v1293_v61 = vmul.f32 0.5, %v5181_v16  ;;  %v2187_v28 = vadd.f32 1.0, %v5250_v24 }
 0x268   : > { %v1562_v40 = vmul.f32 %v1434_v0, %v1036_v37  ;;  %v1689_v46 = vmul.f32 0.044715, %v1561_v35  ;;  %v1563_v41 = vmul.f32 %v1435_v44, %v5339_v63  ;;  %v2189_v49 = vadd.f32 1.0, %v5281_v36 }
 0x269   : > { %v1944_v14 = vmul.f32 0.7978846, %v1816_v55  ;;  %v2315_v8 = vmul.f32 %v2187_v28, %v1291_v20  ;;  %v1042_v54 = vadd.f32 %v6248_v58, %v6247_v53  ;;  %v2186_v29 = vadd.f32 1.0, %v5245_v17 }
 0x26a   : > { %v1690_v15 = vmul.f32 0.044715, %v1562_v40  ;;  %v5356_v38 = vpop.eup %3601  ;;  %v1817_v59 = vadd.f32 %v1689_v46, %v5326_v7  ;;  %v1691_v16 = vmul.f32 0.044715, %v1563_v41  ;;  %v2317_v24 = vmul.f32 %v2189_v49, %v1293_v61  ;;  %v6251_v41 = vld [vmem:[#allocation119_spill] sm:$0xff] }
 0x26b   : > { %3609 = vtanh.f32 %v1944_v14  ;;  %v5359_v39 = vmul.f32 0.5, %v1042_v54  ;;  %v1436_v0 = vmul.f32 %v1042_v54, %v1042_v54  ;;  %v2188_v36 = vadd.f32 1.0, %v5261_v57  ;;  %v6249_v14 = vld [vmem:[#allocation115_spill] sm:$0xff]  ;;  %v6250_v57 = vld [vmem:[#allocation32_spill] sm:$0xff] }
 0x26c   : > { %v1818_v27 = vadd.f32 %v1690_v15, %v1036_v37  ;;  %v1945_v55 = vmul.f32 0.7978846, %v1817_v59  ;;  %v1819_v35 = vadd.f32 %v1691_v16, %v5339_v63  ;;  %v3154_v44 = vpack.c.bf16 %v2317_v24, %v2315_v8  ;;  %v6252_v15 = vld [vmem:[#allocation120_spill] sm:$0xff] }
 0x26d   : > { %v2314_v40 = vmul.f32 %v2186_v29, %v5146_v12  ;;  %v1564_v20 = vmul.f32 %v1436_v0, %v1042_v54  ;;  %v2316_v28 = vmul.f32 %v2188_v36, %v5167_v18  ;;  %v5367_v46 = vadd.f32 %v6249_v14, %v6247_v53  ;;  %v6253_v14 = vld [vmem:[#allocation33_spill] sm:$0xff] }
 0x26e   : > { %v1946_v17 = vmul.f32 0.7978846, %v1818_v27  ;;  %v5369_v37 = vpop.eup %3603  ;;  %3611 = vtanh.f32 %v1945_v55  ;;  %v1947_v61 = vmul.f32 0.7978846, %v1819_v35  ;;  %3155 = vmatprep.subr.bf16.mxu1 %v3154_v44  ;;  %v1048_v49 = vadd.f32 %v6251_v41, %v6250_v57 }
 0x26f   : > { %v5375_v8 = vadd.f32 %v6252_v15, %v6250_v57  ;;  %v5377_v12 = vpop.eup %3605  ;;  %v1692_v18 = vmul.f32 0.044715, %v1564_v20  ;;  %v3156_v58 = vpack.c.bf16 %v2316_v28, %v2314_v40  ;;  %v1437_v53 = vmul.f32 %v5367_v46, %v5367_v46 }
 0x270   : > { %3613 = vtanh.f32 %v1946_v17  ;;  %v5381_v29 = vpop.eup %3607  ;;  %v5383_v59 = vmul.f32 0.5, %v1048_v49  ;;  %v1438_v16 = vmul.f32 %v1048_v49, %v1048_v49  ;;  %v1295_v36 = vmul.f32 0.5, %v5189_v50 }
 0x271   : > { %3615 = vtanh.f32 %v1947_v61  ;;  %v1439_v24 = vmul.f32 %v5375_v8, %v5375_v8  ;;  %v1820_v27 = vadd.f32 %v1692_v18, %v1042_v54  ;;  %3157 = vmatpush1.bf16.msra.mxu1 %v3156_v58  ;;  %v1565_v0 = vmul.f32 %v1437_v53, %v5367_v46  ;;  %v6254_v61 = vld [vmem:[#allocation59_spill] sm:$0xff] }
 0x272   : > { %v1297_v55 = vmul.f32 0.5, %v5228_v21  ;;  %v1566_v35 = vmul.f32 %v1438_v16, %v1048_v49  ;;  %v2191_v40 = vadd.f32 1.0, %v5295_v5  ;;  %v2193_v17 = vadd.f32 1.0, %v5328_v10 }
 0x273   : > { %v1567_v44 = vmul.f32 %v1439_v24, %v5375_v8  ;;  %v1948_v20 = vmul.f32 0.7978846, %v1820_v27  ;;  %v1693_v28 = vmul.f32 0.044715, %v1565_v0  ;;  %v1054_v57 = vadd.f32 %v6254_v61, %v6253_v14 }
 0x274   : > { %v2190_v54 = vadd.f32 1.0, %v5289_v48  ;;  %v1694_v15 = vmul.f32 0.044715, %v1566_v35  ;;  %v2319_v18 = vmul.f32 %v2191_v40, %v1295_v36  ;;  %v2321_v21 = vmul.f32 %v2193_v17, %v1297_v55  ;;  %v6255_v35 = vld [vmem:[#allocation64_spill] sm:$0xff]  ;;  %v6256_v17 = vld [vmem:[#allocation34_spill] sm:$0xff] }
 0x275   : > { %v5396_v41 = vpop.eup %3609  ;;  %v1695_v50 = vmul.f32 0.044715, %v1567_v44  ;;  %3617 = vtanh.f32 %v1948_v20  ;;  %v1821_v58 = vadd.f32 %v1693_v28, %v5367_v46  ;;  %v5399_v53 = vmul.f32 0.5, %v1054_v57  ;;  %v6257_v20 = vld [vmem:[#allocation19_spill] sm:$0xff] }
 0x276   : > { %v1440_v5 = vmul.f32 %v1054_v57, %v1054_v57  ;;  %v1822_v10 = vadd.f32 %v1694_v15, %v1048_v49  ;;  %v3158_v24 = vpack.c.bf16 %v2321_v21, %v2319_v18  ;;  %v2192_v27 = vadd.f32 1.0, %v5314_v47 }
 0x277   : > { %v1823_v16 = vadd.f32 %v1695_v50, %v5375_v8  ;;  %v1949_v0 = vmul.f32 0.7978846, %v1821_v58  ;;  %v2318_v61 = vmul.f32 %v2190_v54, %v5196_v11  ;;  %v5406_v36 = vadd.f32 %v6255_v35, %v6253_v14  ;;  %v6258_v14 = vld [vmem:[#allocation68_spill] sm:$0xff] }
 0x278   : > { %v1568_v48 = vmul.f32 %v1440_v5, %v1054_v57  ;;  %v5408_v55 = vpop.eup %3611  ;;  %v1950_v44 = vmul.f32 0.7978846, %v1822_v10  ;;  %3159 = vmatprep.subr.bf16.mxu1 %v3158_v24  ;;  %v2320_v49 = vmul.f32 %v2192_v27, %v5217_v43  ;;  %v1060_v28 = vadd.f32 %v6257_v20, %v6256_v17 }
 0x279   : > { %v1951_v40 = vmul.f32 0.7978846, %v1823_v16  ;;  %3619 = vtanh.f32 %v1949_v0  ;;  %v1441_v11 = vmul.f32 %v5406_v36, %v5406_v36  ;;  %v5419_v54 = vadd.f32 %v6258_v14, %v6256_v17  ;;  %v6260_v17 = vld [vmem:[#allocation61_spill] sm:$0xff] }
 0x27a   : > { %v5413_v15 = vpop.eup %3613  ;;  %v1696_v47 = vmul.f32 0.044715, %v1568_v48  ;;  %3621 = vtanh.f32 %v1950_v44  ;;  %v3160_v18 = vpack.c.bf16 %v2320_v49, %v2318_v61  ;;  %v5423_v21 = vmul.f32 0.5, %v1060_v28  ;;  %v6259_v49 = vld [vmem:[#allocation35_spill] sm:$0xff] }
 0x27b   : > { %v5421_v50 = vpop.eup %3615  ;;  %v1442_v43 = vmul.f32 %v1060_v28, %v1060_v28  ;;  %3623 = vtanh.f32 %v1951_v40  ;;  %v1569_v5 = vmul.f32 %v1441_v11, %v5406_v36  ;;  %v1443_v10 = vmul.f32 %v5419_v54, %v5419_v54 }
 0x27c   : > { %v1824_v58 = vadd.f32 %v1696_v47, %v1054_v57  ;;  %3161 = vmatpush1.bf16.msra.mxu1 %v3160_v18  ;;  %v1299_v24 = vmul.f32 0.5, %v5239_v52  ;;  %v1301_v27 = vmul.f32 0.5, %v5279_v3  ;;  %v2195_v0 = vadd.f32 1.0, %v5341_v34 }
 0x27d   : > { %v1570_v16 = vmul.f32 %v1442_v43, %v1060_v28  ;;  %v1697_v61 = vmul.f32 0.044715, %v1569_v5  ;;  %v1571_v35 = vmul.f32 %v1443_v10, %v5419_v54  ;;  %v2197_v44 = vadd.f32 1.0, %v5369_v37 }
 0x27e   : > { %v1952_v48 = vmul.f32 0.7978846, %v1824_v58  ;;  %v2323_v40 = vmul.f32 %v2195_v0, %v1299_v24  ;;  %v1066_v20 = vadd.f32 %v6260_v17, %v6259_v49  ;;  %v2194_v47 = vadd.f32 1.0, %v5333_v42 }
 0x27f   : > { %v1698_v57 = vmul.f32 0.044715, %v1570_v16  ;;  %v5436_v11 = vpop.eup %3617  ;;  %v1825_v52 = vadd.f32 %v1697_v61, %v5406_v36  ;;  %v1699_v3 = vmul.f32 0.044715, %v1571_v35  ;;  %v2325_v34 = vmul.f32 %v2197_v44, %v1301_v27  ;;  %v6263_v35 = vld [vmem:[#allocation125_spill] sm:$0xff] }
 0x280   : > { %3625 = vtanh.f32 %v1952_v48  ;;  %v5439_v18 = vmul.f32 0.5, %v1066_v20  ;;  %v1444_v43 = vmul.f32 %v1066_v20, %v1066_v20  ;;  %v2196_v37 = vadd.f32 1.0, %v5356_v38  ;;  %v6261_v48 = vld [vmem:[#allocation63_spill] sm:$0xff]  ;;  %v6262_v38 = vld [vmem:[#allocation36_spill] sm:$0xff] }
 0x281   : > { %v1826_v14 = vadd.f32 %v1698_v57, %v1060_v28  ;;  %v1953_v58 = vmul.f32 0.7978846, %v1825_v52  ;;  %v1827_v5 = vadd.f32 %v1699_v3, %v5419_v54  ;;  %v3162_v10 = vpack.c.bf16 %v2325_v34, %v2323_v40  ;;  %v6264_v57 = vld [vmem:[#allocation20_spill] sm:$0xff] }
 0x282   : > { %v2322_v16 = vmul.f32 %v2194_v47, %v5243_v26  ;;  %v1572_v24 = vmul.f32 %v1444_v43, %v1066_v20  ;;  %v2324_v0 = vmul.f32 %v2196_v37, %v5267_v9  ;;  %v5447_v61 = vadd.f32 %v6261_v48, %v6259_v49  ;;  %v6265_v48 = vld [vmem:[#allocation37_spill] sm:$0xff] }
 0x283   : > { %v1954_v42 = vmul.f32 0.7978846, %v1826_v14  ;;  %v5449_v28 = vpop.eup %3619  ;;  %3627 = vtanh.f32 %v1953_v58  ;;  %v1955_v27 = vmul.f32 0.7978846, %v1827_v5  ;;  %3163 = vmatprep.subr.bf16.mxu1 %v3162_v10  ;;  %v1072_v44 = vadd.f32 %v6263_v35, %v6262_v38 }
 0x284   : > { %v5455_v40 = vadd.f32 %v6264_v57, %v6262_v38  ;;  %v5457_v26 = vpop.eup %3621  ;;  %v1700_v9 = vmul.f32 0.044715, %v1572_v24  ;;  %v3164_v17 = vpack.c.bf16 %v2324_v0, %v2322_v16  ;;  %v1445_v49 = vmul.f32 %v5447_v61, %v5447_v61 }
 0x285   : > { %3629 = vtanh.f32 %v1954_v42  ;;  %v5461_v47 = vpop.eup %3623  ;;  %v5463_v52 = vmul.f32 0.5, %v1072_v44  ;;  %v1446_v3 = vmul.f32 %v1072_v44, %v1072_v44  ;;  %v1303_v37 = vmul.f32 0.5, %v5287_v60 }
 0x286   : > { %3631 = vtanh.f32 %v1955_v27  ;;  %v1447_v34 = vmul.f32 %v5455_v40, %v5455_v40  ;;  %v1828_v14 = vadd.f32 %v1700_v9, %v1066_v20  ;;  %3165 = vmatpush1.bf16.msra.mxu1 %v3164_v17  ;;  %v1573_v43 = vmul.f32 %v1445_v49, %v5447_v61  ;;  %v6266_v27 = vld [vmem:[#allocation127_spill] sm:$0xff] }
 0x287   : > { %v1305_v58 = vmul.f32 0.5, %v5326_v7  ;;  %v1574_v5 = vmul.f32 %v1446_v3, %v1072_v44  ;;  %v2199_v16 = vadd.f32 1.0, %v5381_v29  ;;  %v2201_v42 = vadd.f32 1.0, %v5408_v55 }
 0x288   : > { %v1575_v10 = vmul.f32 %v1447_v34, %v5455_v40  ;;  %v1956_v24 = vmul.f32 0.7978846, %v1828_v14  ;;  %v1701_v0 = vmul.f32 0.044715, %v1573_v43  ;;  %v1078_v38 = vadd.f32 %v6266_v27, %v6265_v48 }
 0x289   : > { %v2198_v20 = vadd.f32 1.0, %v5377_v12  ;;  %v1702_v57 = vmul.f32 0.044715, %v1574_v5  ;;  %v2327_v9 = vmul.f32 %v2199_v16, %v1303_v37  ;;  %v2329_v7 = vmul.f32 %v2201_v42, %v1305_v58  ;;  %v6267_v5 = vld [vmem:[#allocation128_spill] sm:$0xff]  ;;  %v6268_v42 = vld [vmem:[#allocation38_spill] sm:$0xff] }
 0x28a   : > { %v5476_v35 = vpop.eup %3625  ;;  %v1703_v60 = vmul.f32 0.044715, %v1575_v10  ;;  %3633 = vtanh.f32 %v1956_v24  ;;  %v1829_v17 = vadd.f32 %v1701_v0, %v5447_v61  ;;  %v5479_v49 = vmul.f32 0.5, %v1078_v38 }
 0x28b   : > { %v1448_v29 = vmul.f32 %v1078_v38, %v1078_v38  ;;  %v1830_v55 = vadd.f32 %v1702_v57, %v1072_v44  ;;  %v3166_v34 = vpack.c.bf16 %v2329_v7, %v2327_v9  ;;  %v2200_v14 = vadd.f32 1.0, %v5396_v41 }
 0x28c   : > { %v1831_v3 = vadd.f32 %v1703_v60, %v5455_v40  ;;  %v1957_v43 = vmul.f32 0.7978846, %v1829_v17  ;;  %v2326_v27 = vmul.f32 %v2198_v20, %v5297_v62  ;;  %v5486_v37 = vadd.f32 %v6267_v5, %v6265_v48  ;;  %v6270_v5 = vld [vmem:[#allocation65_spill] sm:$0xff] }
 0x28d   : > { %v1576_v12 = vmul.f32 %v1448_v29, %v1078_v38  ;;  %v5488_v58 = vpop.eup %3627  ;;  %v1958_v10 = vmul.f32 0.7978846, %v1830_v55  ;;  %3167 = vmatprep.subr.bf16.mxu1 %v3166_v34  ;;  %v2328_v44 = vmul.f32 %v2200_v14, %v5319_v1  ;;  %v1084_v24 = vadd.f32 %v5101_v19, %v6268_v42 }
 0x28e   : > { %v1959_v16 = vmul.f32 0.7978846, %v1831_v3  ;;  %3635 = vtanh.f32 %v1957_v43  ;;  %v1449_v62 = vmul.f32 %v5486_v37, %v5486_v37  ;;  %v5499_v48 = vadd.f32 %v5105_v56, %v6268_v42 }
 0x28f   : > { %v5493_v0 = vpop.eup %3629  ;;  %v1704_v41 = vmul.f32 0.044715, %v1576_v12  ;;  %3637 = vtanh.f32 %v1958_v10  ;;  %v3168_v57 = vpack.c.bf16 %v2328_v44, %v2326_v27  ;;  %v5503_v60 = vmul.f32 0.5, %v1084_v24  ;;  %v6269_v27 = vld [vmem:[#allocation39_spill] sm:$0xff] }
 0x290   : > { %v5501_v20 = vpop.eup %3631  ;;  %v1450_v1 = vmul.f32 %v1084_v24, %v1084_v24  ;;  %3639 = vtanh.f32 %v1959_v16  ;;  %v1577_v9 = vmul.f32 %v1449_v62, %v5486_v37  ;;  %v1451_v7 = vmul.f32 %v5499_v48, %v5499_v48 }
 0x291   : > { %v1832_v19 = vadd.f32 %v1704_v41, %v1078_v38  ;;  %3169 = vmatpush1.bf16.msra.mxu1 %v3168_v57  ;;  %v1307_v29 = vmul.f32 0.5, %v5339_v63  ;;  %v1309_v56 = vmul.f32 0.5, %v5367_v46  ;;  %v2203_v55 = vadd.f32 1.0, %v5421_v50 }
 0x292   : > { %v1578_v17 = vmul.f32 %v1450_v1, %v1084_v24  ;;  %v1705_v34 = vmul.f32 0.044715, %v1577_v9  ;;  %v1579_v14 = vmul.f32 %v1451_v7, %v5499_v48  ;;  %v2205_v43 = vadd.f32 1.0, %v5449_v28 }
 0x293   : > { %v1960_v3 = vmul.f32 0.7978846, %v1832_v19  ;;  %v2331_v12 = vmul.f32 %v2203_v55, %v1307_v29  ;;  %v1090_v10 = vadd.f32 %v6270_v5, %v6269_v27  ;;  %v2202_v16 = vadd.f32 1.0, %v5413_v15  ;;  %v6271_v29 = vld [vmem:[#allocation70_spill] sm:$0xff] }
 0x294   : > { %v1706_v38 = vmul.f32 0.044715, %v1578_v17  ;;  %v5516_v44 = vpop.eup %3633  ;;  %v1833_v63 = vadd.f32 %v1705_v34, %v5486_v37  ;;  %v1707_v46 = vmul.f32 0.044715, %v1579_v14  ;;  %v2333_v50 = vmul.f32 %v2205_v43, %v1309_v56 }
 0x295   : > { %3641 = vtanh.f32 %v1960_v3  ;;  %v5519_v41 = vmul.f32 0.5, %v1090_v10  ;;  %v1452_v62 = vmul.f32 %v1090_v10, %v1090_v10  ;;  %v2204_v28 = vadd.f32 1.0, %v5436_v11  ;;  %v6272_v11 = vld [vmem:[#allocation40_spill] sm:$0xff] }
 0x296   : > { %v1834_v42 = vadd.f32 %v1706_v38, %v1084_v24  ;;  %v1961_v57 = vmul.f32 0.7978846, %v1833_v63  ;;  %v1835_v1 = vadd.f32 %v1707_v46, %v5499_v48  ;;  %v3170_v19 = vpack.c.bf16 %v2333_v50, %v2331_v12 }
 0x297   : > { %v2330_v9 = vmul.f32 %v2202_v16, %v5343_v22  ;;  %v1580_v7 = vmul.f32 %v1452_v62, %v1090_v10  ;;  %v2332_v17 = vmul.f32 %v2204_v28, %v5359_v39  ;;  %v5527_v55 = vadd.f32 %v6271_v29, %v6269_v27 }
 0x298   : > { %v1962_v15 = vmul.f32 0.7978846, %v1834_v42  ;;  %v5529_v24 = vpop.eup %3635  ;;  %3643 = vtanh.f32 %v1961_v57  ;;  %v1963_v56 = vmul.f32 0.7978846, %v1835_v1  ;;  %3171 = vmatprep.subr.bf16.mxu1 %v3170_v19  ;;  %v1096_v3 = vadd.f32 %v5134_v30, %v6272_v11  ;;  %v6273_v1 = vld [vmem:[#allocation41_spill] sm:$0xff]  ;;  %v6274_v19 = vld [vmem:[#allocation66_spill] sm:$0xff] }
 0x299   : > { %v5535_v34 = vadd.f32 %v5144_v31, %v6272_v11  ;;  %v5537_v22 = vpop.eup %3637  ;;  %v1708_v39 = vmul.f32 0.044715, %v1580_v7  ;;  %v3172_v14 = vpack.c.bf16 %v2332_v17, %v2330_v9  ;;  %v1453_v43 = vmul.f32 %v5527_v55, %v5527_v55 }
 0x29a   : > { %3645 = vtanh.f32 %v1962_v15  ;;  %v5541_v38 = vpop.eup %3639  ;;  %v5543_v12 = vmul.f32 0.5, %v1096_v3  ;;  %v1454_v27 = vmul.f32 %v1096_v3, %v1096_v3  ;;  %v1311_v16 = vmul.f32 0.5, %v5375_v8 }
 0x29b   : > { %3647 = vtanh.f32 %v1963_v56  ;;  %v1455_v30 = vmul.f32 %v5535_v34, %v5535_v34  ;;  %v1836_v5 = vadd.f32 %v1708_v39, %v1090_v10  ;;  %3173 = vmatpush1.bf16.msra.mxu1 %v3172_v14  ;;  %v1581_v31 = vmul.f32 %v1453_v43, %v5527_v55 }
 0x29c   : > { %v1313_v63 = vmul.f32 0.5, %v5406_v36  ;;  %v1582_v46 = vmul.f32 %v1454_v27, %v1096_v3  ;;  %v2207_v42 = vadd.f32 1.0, %v5461_v47  ;;  %v2209_v62 = vadd.f32 1.0, %v5488_v58 }
 0x29d   : > { %v1583_v50 = vmul.f32 %v1455_v30, %v5535_v34  ;;  %v1964_v28 = vmul.f32 0.7978846, %v1836_v5  ;;  %v1709_v57 = vmul.f32 0.044715, %v1581_v31  ;;  %v1102_v9 = vadd.f32 %v6274_v19, %v6273_v1 }
 0x29e   : > { %v2206_v10 = vadd.f32 1.0, %v5457_v26  ;;  %v1710_v7 = vmul.f32 0.044715, %v1582_v46  ;;  %v2335_v17 = vmul.f32 %v2207_v42, %v1311_v16  ;;  %v2337_v36 = vmul.f32 %v2209_v62, %v1313_v63  ;;  %v6275_v63 = vld [vmem:[#allocation42_spill] sm:$0xff] }
 0x29f   : > { %v5556_v15 = vpop.eup %3641  ;;  %v1711_v8 = vmul.f32 0.044715, %v1583_v50  ;;  %3649 = vtanh.f32 %v1964_v28  ;;  %v1837_v29 = vadd.f32 %v1709_v57, %v5527_v55  ;;  %v5559_v56 = vmul.f32 0.5, %v1102_v9 }
 0x2a0   : > { %v1456_v47 = vmul.f32 %v1102_v9, %v1102_v9  ;;  %v1838_v58 = vadd.f32 %v1710_v7, %v1096_v3  ;;  %v3174_v39 = vpack.c.bf16 %v2337_v36, %v2335_v17  ;;  %v2208_v14 = vadd.f32 1.0, %v5476_v35 }
 0x2a1   : > { %v1839_v11 = vadd.f32 %v1711_v8, %v5535_v34  ;;  %v1965_v43 = vmul.f32 0.7978846, %v1837_v29  ;;  %v2334_v27 = vmul.f32 %v2206_v10, %v5383_v59  ;;  %v5566_v30 = vadd.f32 %v5165_v13, %v6273_v1  ;;  %v2402_v8 = vld [vmem:[#allocation8] sm:$0xff] }
 0x2a2   : > { %v1584_v26 = vmul.f32 %v1456_v47, %v1102_v9  ;;  %v5568_v5 = vpop.eup %3643  ;;  %v1966_v31 = vmul.f32 0.7978846, %v1838_v58  ;;  %3175 = vmatprep.subr.bf16.mxu1 %v3174_v39  ;;  %v2336_v3 = vmul.f32 %v2208_v14, %v5399_v53  ;;  %v1108_v46 = vadd.f32 %v5173_v45, %v6275_v63  ;;  %v2407_v47 = vld [vmem:[#allocation8 + $0x28] sm:$0xff]  ;;  %v6276_v39 = vld [vmem:[#allocation43_spill] sm:$0xff] }
 0x2a3   : > { %v1967_v16 = vmul.f32 0.7978846, %v1839_v11  ;;  %3651 = vtanh.f32 %v1965_v43  ;;  %v1457_v59 = vmul.f32 %v5566_v30, %v5566_v30  ;;  %v5579_v13 = vadd.f32 %v5183_v32, %v6275_v63 }
 0x2a4   : > { %v5573_v50 = vpop.eup %3645  ;;  %v1712_v35 = vmul.f32 0.044715, %v1584_v26  ;;  %3653 = vtanh.f32 %v1966_v31  ;;  %v3176_v62 = vpack.c.bf16 %v2336_v3, %v2334_v27  ;;  %v5583_v28 = vmul.f32 0.5, %v1108_v46  ;;  %v2406_v3 = vld [vmem:[#allocation8 + $0x20] sm:$0xff] }
 0x2a5   : > { %v5581_v42 = vpop.eup %3647  ;;  %v1458_v53 = vmul.f32 %v1108_v46, %v1108_v46  ;;  %3655 = vtanh.f32 %v1967_v16  ;;  %v1585_v57 = vmul.f32 %v1457_v59, %v5566_v30  ;;  %v1459_v1 = vmul.f32 %v5579_v13, %v5579_v13  ;;  %v2411_v59 = vld [vmem:[#allocation8 + $0x48] sm:$0xff] }
 0x2a6   : > { %v1840_v45 = vadd.f32 %v1712_v35, %v1102_v9  ;;  %3177 = vmatpush1.bf16.msra.mxu1 %v3176_v62  ;;  %v1315_v10 = vmul.f32 0.5, %v5419_v54  ;;  %v1317_v32 = vmul.f32 0.5, %v5447_v61  ;;  %v2211_v7 = vadd.f32 1.0, %v5501_v20 }
 0x2a7   : > { %v1586_v19 = vmul.f32 %v1458_v53, %v1108_v46  ;;  %v1713_v36 = vmul.f32 0.044715, %v1585_v57  ;;  %v1587_v29 = vmul.f32 %v1459_v1, %v5579_v13  ;;  %v2213_v9 = vadd.f32 1.0, %v5529_v24 }
 0x2a8   : > { %v1968_v17 = vmul.f32 0.7978846, %v1840_v45  ;;  %v2339_v11 = vmul.f32 %v2211_v7, %v1315_v10  ;;  %v1114_v14 = vadd.f32 %v5200_v51, %v6276_v39  ;;  %v2210_v43 = vadd.f32 1.0, %v5493_v0  ;;  %v6279_v10 = vld [vmem:[#allocation81_spill] sm:$0xff]  ;;  %v6280_v7 = vld [vmem:[#allocation24_spill] sm:$0xff] }
 0x2a9   : > { %v1714_v58 = vmul.f32 0.044715, %v1586_v19  ;;  %v5596_v54 = vpop.eup %3649  ;;  %v1841_v61 = vadd.f32 %v1713_v36, %v5566_v30  ;;  %v1715_v20 = vmul.f32 0.044715, %v1587_v29  ;;  %v2341_v26 = vmul.f32 %v2213_v9, %v1317_v32  ;;  %2627 = vmatmul.mubr.f32.vlgmr.msra.gmra.mrb[32].mxu1 %v2402_v8  ;;  %v6278_v19 = vld [vmem:[#allocation44_spill] sm:$0xff]  ;;  %v2410_v29 = vld [vmem:[#allocation8 + $0x40] sm:$0xff] }
 0x2aa   : > { %3657 = vtanh.f32 %v1968_v17  ;;  %v5599_v31 = vmul.f32 0.5, %v1114_v14  ;;  %v1460_v24 = vmul.f32 %v1114_v14, %v1114_v14  ;;  %v2212_v16 = vadd.f32 1.0, %v5516_v44  ;;  %2632 = vmatprep.mubr.f32.mxu1 %v2407_v47 }
 0x2ab   : > { %v1842_v27 = vadd.f32 %v1714_v58, %v1108_v46  ;;  %v1969_v63 = vmul.f32 0.7978846, %v1841_v61  ;;  %v1843_v51 = vadd.f32 %v1715_v20, %v5579_v13  ;;  %v3178_v0 = vpack.c.bf16 %v2341_v26, %v2339_v11  ;;  %v6277_v46 = vld [vmem:[#allocation23_spill] sm:$0xff] }
 0x2ac   : > { %v2338_v35 = vmul.f32 %v2210_v43, %v5423_v21  ;;  %v1588_v53 = vmul.f32 %v1460_v24, %v1114_v14  ;;  %v2340_v45 = vmul.f32 %v2212_v16, %v5439_v18  ;;  %v5607_v57 = vadd.f32 %v6277_v46, %v6276_v39  ;;  %v2415_v39 = vld [vmem:[#allocation8 + $0x68] sm:$0xff] }
 0x2ad   : > { %v1970_v62 = vmul.f32 0.7978846, %v1842_v27  ;;  %v5609_v1 = vpop.eup %3651  ;;  %3659 = vtanh.f32 %v1969_v63  ;;  %v1971_v44 = vmul.f32 0.7978846, %v1843_v51  ;;  %3179 = vmatprep.subr.bf16.mxu1 %v3178_v0  ;;  %v1120_v32 = vadd.f32 %v6279_v10, %v6278_v19  ;;  %2633 = vmatmul.mubr.f32.gmra.mrb[34].mxu1 %v2406_v3  ;;  %v6281_v0 = vld [vmem:[#allocation45_spill] sm:$0xff]  ;;  %v2419_v46 = vld [vmem:[#allocation8 + $0x88] sm:$0xff] }
 0x2ae   : > { %v5615_v21 = vadd.f32 %v6280_v7, %v6278_v19  ;;  %v5617_v8 = vpop.eup %3653  ;;  %v1716_v18 = vmul.f32 0.044715, %v1588_v53  ;;  %v3180_v17 = vpack.c.bf16 %v2340_v45, %v2338_v35  ;;  %v1461_v36 = vmul.f32 %v5607_v57, %v5607_v57  ;;  %2638 = vmatprep.mubr.f32.mxu1 %v2411_v59  ;;  %v2414_v59 = vld [vmem:[#allocation8 + $0x60] sm:$0xff] }
 0x2af   : > { %3661 = vtanh.f32 %v1970_v62  ;;  %v5621_v9 = vpop.eup %3655  ;;  %v5623_v47 = vmul.f32 0.5, %v1120_v32  ;;  %v1462_v58 = vmul.f32 %v1120_v32, %v1120_v32  ;;  %v1319_v20 = vmul.f32 0.5, %v5455_v40 }
 0x2b0   : > { %3663 = vtanh.f32 %v1971_v44  ;;  %v1463_v11 = vmul.f32 %v5615_v21, %v5615_v21  ;;  %v1844_v43 = vadd.f32 %v1716_v18, %v1114_v14  ;;  %3181 = vmatpush1.bf16.msra.mxu1 %v3180_v17  ;;  %v1589_v61 = vmul.f32 %v1461_v36, %v5607_v57 }
 0x2b1   : > { %v1321_v26 = vmul.f32 0.5, %v5486_v37  ;;  %v1590_v27 = vmul.f32 %v1462_v58, %v1120_v32  ;;  %v2215_v16 = vadd.f32 1.0, %v5541_v38  ;;  %v2217_v3 = vadd.f32 1.0, %v5568_v5  ;;  %2639 = vmatmul.mubr.f32.gmra.mrb[36].mxu1 %v2410_v29  ;;  %v2418_v29 = vld [vmem:[#allocation8 + $0x80] sm:$0xff] }
 0x2b2   : > { %v1591_v24 = vmul.f32 %v1463_v11, %v5615_v21  ;;  %v1972_v63 = vmul.f32 0.7978846, %v1844_v43  ;;  %v1717_v51 = vmul.f32 0.044715, %v1589_v61  ;;  %v1126_v14 = vadd.f32 %v5233_v2, %v6281_v0  ;;  %2644 = vmatprep.mubr.f32.mxu1 %v2415_v39  ;;  %v6282_v43 = vld [vmem:[#allocation46_spill] sm:$0xff] }
 0x2b3   : > { %v2214_v35 = vadd.f32 1.0, %v5537_v22  ;;  %v1718_v37 = vmul.f32 0.044715, %v1590_v27  ;;  %v2343_v53 = vmul.f32 %v2215_v16, %v1319_v20  ;;  %v2345_v45 = vmul.f32 %v2217_v3, %v1321_v26  ;;  %v2423_v61 = vld [vmem:[#allocation8 + $0xa8] sm:$0xff]  ;;  %v6283_v26 = vld [vmem:[#allocation25_spill] sm:$0xff] }
 0x2b4   : > { %v5636_v40 = vpop.eup %3657  ;;  %v1719_v62 = vmul.f32 0.044715, %v1591_v24  ;;  %3665 = vtanh.f32 %v1972_v63  ;;  %v1845_v38 = vadd.f32 %v1717_v51, %v5607_v57  ;;  %v5639_v5 = vmul.f32 0.5, %v1126_v14 }
 0x2b5   : > { %v1464_v44 = vmul.f32 %v1126_v14, %v1126_v14  ;;  %v1846_v19 = vadd.f32 %v1718_v37, %v1120_v32  ;;  %v3182_v10 = vpack.c.bf16 %v2345_v45, %v2343_v53  ;;  %v2216_v22 = vadd.f32 1.0, %v5556_v15  ;;  %2645 = vmatmul.mubr.f32.gmra.mrb[38].mxu1 %v2414_v59  ;;  %v2427_v53 = vld [vmem:[#allocation8 + $0xc8] sm:$0xff] }
 0x2b6   : > { %v1847_v2 = vadd.f32 %v1719_v62, %v5615_v21  ;;  %v1973_v7 = vmul.f32 0.7978846, %v1845_v38  ;;  %v2342_v17 = vmul.f32 %v2214_v35, %v5463_v52  ;;  %v5646_v36 = vadd.f32 %v5241_v4, %v6281_v0  ;;  %2650 = vmatprep.mubr.f32.mxu1 %v2419_v46  ;;  %v2422_v0 = vld [vmem:[#allocation8 + $0xa0] sm:$0xff] }
 0x2b7   : > { %v1592_v18 = vmul.f32 %v1464_v44, %v1126_v14  ;;  %v5648_v58 = vpop.eup %3659  ;;  %v1974_v11 = vmul.f32 0.7978846, %v1846_v19  ;;  %3183 = vmatprep.subr.bf16.mxu1 %v3182_v10  ;;  %v2344_v39 = vmul.f32 %v2216_v22, %v5479_v49  ;;  %v1132_v15 = vadd.f32 %v5255_v25, %v6282_v43 }
 0x2b8   : > { %v1975_v32 = vmul.f32 0.7978846, %v1847_v2  ;;  %3667 = vtanh.f32 %v1973_v7  ;;  %v1465_v4 = vmul.f32 %v5646_v36, %v5646_v36  ;;  %v5659_v27 = vadd.f32 %v6283_v26, %v6282_v43  ;;  %v6284_v2 = vld [vmem:[#allocation47_spill] sm:$0xff] }
 0x2b9   : > { %v5653_v20 = vpop.eup %3661  ;;  %v1720_v52 = vmul.f32 0.044715, %v1592_v18  ;;  %3669 = vtanh.f32 %v1974_v11  ;;  %v3184_v16 = vpack.c.bf16 %v2344_v39, %v2342_v17  ;;  %v5663_v49 = vmul.f32 0.5, %v1132_v15  ;;  %2651 = vmatmul.mubr.f32.gmra.mrb[40].mxu1 %v2418_v29  ;;  %v2426_v18 = vld [vmem:[#allocation8 + $0xc0] sm:$0xff] }
 0x2ba   : > { %v5661_v24 = vpop.eup %3663  ;;  %v1466_v3 = vmul.f32 %v1132_v15, %v1132_v15  ;;  %3671 = vtanh.f32 %v1975_v32  ;;  %v1593_v63 = vmul.f32 %v1465_v4, %v5646_v36  ;;  %v1467_v51 = vmul.f32 %v5659_v27, %v5659_v27  ;;  %2656 = vmatprep.mubr.f32.mxu1 %v2423_v61  ;;  %v2431_v32 = vld [vmem:[#allocation8 + $0xe8] sm:$0xff] }
 0x2bb   : > { %v1848_v25 = vadd.f32 %v1720_v52, %v1126_v14  ;;  %3185 = vmatpush1.bf16.msra.mxu1 %v3184_v16  ;;  %v1323_v59 = vmul.f32 0.5, %v5499_v48  ;;  %v1325_v37 = vmul.f32 0.5, %v5527_v55  ;;  %v2219_v62 = vadd.f32 1.0, %v5581_v42  ;;  %v6285_v16 = vld [vmem:[#allocation48_spill] sm:$0xff] }
 0x2bc   : > { %v1594_v35 = vmul.f32 %v1466_v3, %v1132_v15  ;;  %v1721_v46 = vmul.f32 0.044715, %v1593_v63  ;;  %v1595_v14 = vmul.f32 %v1467_v51, %v5659_v27  ;;  %v2221_v38 = vadd.f32 1.0, %v5609_v1  ;;  %v6286_v3 = vld [vmem:[#allocation101_spill] sm:$0xff]  ;;  %v6287_v63 = vld [vmem:[#allocation99_spill] sm:$0xff] }
 0x2bd   : > { %v1976_v45 = vmul.f32 0.7978846, %v1848_v25  ;;  %v2347_v19 = vmul.f32 %v2219_v62, %v1323_v59  ;;  %v1138_v10 = vadd.f32 %v5270_v33, %v6284_v2  ;;  %v2218_v22 = vadd.f32 1.0, %v5573_v50  ;;  %2657 = vmatmul.mubr.f32.gmra.mrb[42].mxu1 %v2422_v0 }
 0x2be   : > { %v1722_v44 = vmul.f32 0.044715, %v1594_v35  ;;  %v5676_v48 = vpop.eup %3665  ;;  %v1849_v55 = vadd.f32 %v1721_v46, %v5646_v36  ;;  %v1723_v42 = vmul.f32 0.044715, %v1595_v14  ;;  %v2349_v7 = vmul.f32 %v2221_v38, %v1325_v37  ;;  %2662 = vmatprep.mubr.f32.mxu1 %v2427_v53  ;;  %v2430_v35 = vld [vmem:[#allocation8 + $0xe0] sm:$0xff] }
 0x2bf   : > { %3673 = vtanh.f32 %v1976_v45  ;;  %v5679_v29 = vmul.f32 0.5, %v1138_v10  ;;  %v1468_v1 = vmul.f32 %v1138_v10, %v1138_v10  ;;  %v2220_v11 = vadd.f32 1.0, %v5596_v54  ;;  %v2435_v45 = vld [vmem:[#allocation8 + $0x108] sm:$0xff] }
 0x2c0   : > { %v1850_v17 = vadd.f32 %v1722_v44, %v1132_v15  ;;  %v1977_v33 = vmul.f32 0.7978846, %v1849_v55  ;;  %v1851_v50 = vadd.f32 %v1723_v42, %v5659_v27  ;;  %v3186_v39 = vpack.c.bf16 %v2349_v7, %v2347_v19 }
 0x2c1   : > { %v2346_v43 = vmul.f32 %v2218_v22, %v5503_v60  ;;  %v1596_v52 = vmul.f32 %v1468_v1, %v1138_v10  ;;  %v2348_v4 = vmul.f32 %v2220_v11, %v5519_v41  ;;  %v5687_v26 = vadd.f32 %v5274_v6, %v6284_v2  ;;  %2663 = vmatmul.mubr.f32.gmra.mrb[44].mxu1 %v2426_v18  ;;  %v6288_v18 = vld [vmem:[#allocation49_spill] sm:$0xff] }
 0x2c2   : > { %v1978_v61 = vmul.f32 0.7978846, %v1850_v17  ;;  %v5689_v15 = vpop.eup %3667  ;;  %3675 = vtanh.f32 %v1977_v33  ;;  %v1979_v54 = vmul.f32 0.7978846, %v1851_v50  ;;  %3187 = vmatprep.subr.bf16.mxu1 %v3186_v39  ;;  %v1144_v25 = vadd.f32 %v6286_v3, %v6285_v16  ;;  %2668 = vmatprep.mubr.f32.mxu1 %v2431_v32  ;;  %v6289_v17 = vld [vmem:[#allocation26_spill] sm:$0xff]  ;;  %v2434_v11 = vld [vmem:[#allocation8 + $0x100] sm:$0xff] }
 0x2c3   : > { %v5695_v60 = vadd.f32 %v6287_v63, %v6285_v16  ;;  %v5697_v51 = vpop.eup %3669  ;;  %v1724_v41 = vmul.f32 0.044715, %v1596_v52  ;;  %v3188_v6 = vpack.c.bf16 %v2348_v4, %v2346_v43  ;;  %v1469_v0 = vmul.f32 %v5687_v26, %v5687_v26  ;;  %v2439_v39 = vld [vmem:[#allocation8 + $0x128] sm:$0xff] }
 0x2c4   : > { %3677 = vtanh.f32 %v1978_v61  ;;  %v5701_v59 = vpop.eup %3671  ;;  %v5703_v37 = vmul.f32 0.5, %v1144_v25  ;;  %v1470_v62 = vmul.f32 %v1144_v25, %v1144_v25  ;;  %v1327_v38 = vmul.f32 0.5, %v5535_v34 }
 0x2c5   : > { %3679 = vtanh.f32 %v1979_v54  ;;  %v1471_v53 = vmul.f32 %v5695_v60, %v5695_v60  ;;  %v1852_v46 = vadd.f32 %v1724_v41, %v1138_v10  ;;  %3189 = vmatpush1.bf16.msra.mxu1 %v3188_v6  ;;  %v1597_v14 = vmul.f32 %v1469_v0, %v5687_v26  ;;  %v2438_v41 = vld [vmem:[#allocation8 + $0x120] sm:$0xff] }
 0x2c6   : > { %v1329_v44 = vmul.f32 0.5, %v5566_v30  ;;  %v1598_v19 = vmul.f32 %v1470_v62, %v1144_v25  ;;  %v2223_v22 = vadd.f32 1.0, %v5621_v9  ;;  %v2225_v55 = vadd.f32 1.0, %v5648_v58  ;;  %2669 = vmatmul.mubr.f32.gmra.mrb[46].mxu1 %v2430_v35 }
 0x2c7   : > { %v1599_v2 = vmul.f32 %v1471_v53, %v5695_v60  ;;  %v1980_v42 = vmul.f32 0.7978846, %v1852_v46  ;;  %v1725_v7 = vmul.f32 0.044715, %v1597_v14  ;;  %v1150_v10 = vadd.f32 %v6289_v17, %v6288_v18  ;;  %2674 = vmatprep.mubr.f32.mxu1 %v2435_v45 }
 0x2c8   : > { %v2222_v1 = vadd.f32 1.0, %v5617_v8  ;;  %v1726_v30 = vmul.f32 0.044715, %v1598_v19  ;;  %v2351_v33 = vmul.f32 %v2223_v22, %v1327_v38  ;;  %v2353_v50 = vmul.f32 %v2225_v55, %v1329_v44 }
 0x2c9   : > { %v5716_v34 = vpop.eup %3673  ;;  %v1727_v32 = vmul.f32 0.044715, %v1599_v2  ;;  %3681 = vtanh.f32 %v1980_v42  ;;  %v1853_v9 = vadd.f32 %v1725_v7, %v5687_v26  ;;  %v5719_v58 = vmul.f32 0.5, %v1150_v10  ;;  %v2442_v2 = vld [vmem:[#allocation8 + $0x140] sm:$0xff]  ;;  %v2447_v7 = vld [vmem:[#allocation8 + $0x168] sm:$0xff] }
 0x2ca   : > { %v1472_v43 = vmul.f32 %v1150_v10, %v1150_v10  ;;  %v1854_v61 = vadd.f32 %v1726_v30, %v1144_v25  ;;  %v3190_v4 = vpack.c.bf16 %v2353_v50, %v2351_v33  ;;  %v2224_v8 = vadd.f32 1.0, %v5636_v40  ;;  %2675 = vmatmul.mubr.f32.gmra.mrb[48].mxu1 %v2434_v11  ;;  %v2443_v40 = vld [vmem:[#allocation8 + $0x148] sm:$0xff] }
 0x2cb   : > { %v1855_v52 = vadd.f32 %v1727_v32, %v5695_v60  ;;  %v1981_v54 = vmul.f32 0.7978846, %v1853_v9  ;;  %v2350_v3 = vmul.f32 %v2222_v1, %v5543_v12  ;;  %v5726_v63 = vadd.f32 %v5316_v23, %v6288_v18  ;;  %2680 = vmatprep.mubr.f32.mxu1 %v2439_v39 }
 0x2cc   : > { %v1600_v16 = vmul.f32 %v1472_v43, %v1150_v10  ;;  %v3676_v6 = vpop.eup %3675  ;;  %v1982_v0 = vmul.f32 0.7978846, %v1854_v61  ;;  %3191 = vmatprep.subr.bf16.mxu1 %v3190_v4  ;;  %v2352_v25 = vmul.f32 %v2224_v8, %v5559_v56  ;;  %v1331_v62 = vmul.f32 0.5, %v5579_v13  ;;  %v2451_v61 = vld [vmem:[#allocation8 + $0x188] sm:$0xff] }
 0x2cd   : > { %v1983_v35 = vmul.f32 0.7978846, %v1855_v52  ;;  %3683 = vtanh.f32 %v1981_v54  ;;  %v1473_v12 = vmul.f32 %v5726_v63, %v5726_v63  ;;  %v1333_v23 = vmul.f32 0.5, %v5607_v57 }
 0x2ce   : > { %v3678_v53 = vpop.eup %3677  ;;  %v1728_v45 = vmul.f32 0.044715, %v1600_v16  ;;  %3685 = vtanh.f32 %v1982_v0  ;;  %v3192_v14 = vpack.c.bf16 %v2352_v25, %v2350_v3  ;;  %v2227_v38 = vadd.f32 1.0, %v5661_v24  ;;  %2681 = vmatmul.mubr.f32.gmra.mrb[50].mxu1 %v2438_v41  ;;  %v6290_v25 = vld [vmem:[#allocation50_spill] sm:$0xff] }
 0x2cf   : > { %v3680_v46 = vpop.eup %3679  ;;  %v2229_v44 = vadd.f32 1.0, %v5689_v15  ;;  %3687 = vtanh.f32 %v1983_v35  ;;  %v1601_v13 = vmul.f32 %v1473_v12, %v5726_v63  ;;  %v2226_v19 = vadd.f32 1.0, %v5653_v20  ;;  %2686 = vmatprep.mubr.f32.mxu1 %v2443_v40  ;;  %v6291_v40 = vld [vmem:[#allocation52_spill] sm:$0xff] }
 0x2d0   : > { %v1856_v56 = vadd.f32 %v1728_v45, %v1150_v10  ;;  %3193 = vmatpush1.bf16.msra.mxu1 %v3192_v14  ;;  %v2355_v22 = vmul.f32 %v2227_v38, %v1331_v62  ;;  %v2228_v57 = vadd.f32 1.0, %v5676_v48  ;;  %v1335_v42 = vmul.f32 0.5, %v5615_v21  ;;  %v2455_v45 = vld [vmem:[#allocation8 + $0x1a8] sm:$0xff]  ;;  %v6293_v14 = vld [vmem:[#allocation89_spill] sm:$0xff] }
 0x2d1   : > { %v2357_v55 = vmul.f32 %v2229_v44, %v1333_v23  ;;  %v1729_v18 = vmul.f32 0.044715, %v1601_v13  ;;  %v2354_v15 = vmul.f32 %v2226_v19, %v5583_v28  ;;  %v1337_v17 = vmul.f32 0.5, %v5646_v36  ;;  %v6294_v44 = vld [vmem:[#allocation72_spill] sm:$0xff]  ;;  %v6295_v13 = vld [vmem:[#allocation82_spill] sm:$0xff] }
 0x2d2   : > { %v1984_v24 = vmul.f32 0.7978846, %v1856_v56  ;;  %v2356_v1 = vmul.f32 %v2228_v57, %v5599_v31  ;;  %v2231_v20 = vadd.f32 1.0, %v5701_v59  ;;  %v2233_v11 = vadd.f32 1.0, %v3676_v6  ;;  %2687 = vmatmul.mubr.f32.gmra.mrb[52].mxu1 %v2442_v2  ;;  %v2446_v31 = vld [vmem:[#allocation8 + $0x160] sm:$0xff] }
 0x2d3   : > { %v3194_v10 = vpack.c.bf16 %v2357_v55, %v2355_v22  ;;  %v3682_v30 = vpop.eup %3681  ;;  %v1857_v48 = vadd.f32 %v1729_v18, %v5726_v63  ;;  %v2230_v21 = vadd.f32 1.0, %v5697_v51  ;;  %v2232_v32 = vadd.f32 1.0, %v5716_v34  ;;  %2692 = vmatprep.mubr.f32.mxu1 %v2447_v7  ;;  %v2450_v6 = vld [vmem:[#allocation8 + $0x180] sm:$0xff] }
 0x2d4   : > { %3689 = vtanh.f32 %v1984_v24  ;;  %v3196_v28 = vpack.c.bf16 %v2356_v1, %v2354_v15  ;;  %v2359_v33 = vmul.f32 %v2231_v20, %v1335_v42  ;;  %v2361_v36 = vmul.f32 %v2233_v11, %v1337_v17  ;;  %v6296_v57 = vld [vmem:[#allocation73_spill] sm:$0xff]  ;;  %v6297_v24 = vld [vmem:[#allocation51_spill] sm:$0xff]  ;;  %v6299_v17 = vld [vmem:[#allocation84_spill] sm:$0xff] }
 0x2d5   : > { %3195 = vmatprep.subr.bf16.mxu1 %v3194_v10  ;;  %v1339_v50 = vmul.f32 0.5, %v5659_v27  ;;  %v1985_v39 = vmul.f32 0.7978846, %v1857_v48  ;;  %v2358_v59 = vmul.f32 %v2230_v21, %v5623_v47  ;;  %v2360_v9 = vmul.f32 %v2232_v32, %v5639_v5  ;;  %v6300_v1 = vld [vmem:[#allocation93_spill] sm:$0xff] }
 0x2d6   : > { %v1341_v43 = vmul.f32 0.5, %v5687_v26  ;;  %3197 = vmatpush1.bf16.msra.mxu1 %v3196_v28  ;;  %v3198_v51 = vpack.c.bf16 %v2361_v36, %v2359_v33  ;;  %v2235_v52 = vadd.f32 1.0, %v3680_v46  ;;  %v2234_v34 = vadd.f32 1.0, %v3678_v53  ;;  %v6292_v53 = vld [vmem:[#allocation75_spill] sm:$0xff]  ;;  %v2454_v11 = vld [vmem:[#allocation8 + $0x1a0] sm:$0xff]  ;;  %v6302_v28 = vld [vmem:[#allocation92_spill] sm:$0xff] }
 0x2d7   : > { %v2236_v4 = vadd.f32 1.0, %v3682_v30  ;;  %v3684_v8 = vpop.eup %3683  ;;  %3691 = vtanh.f32 %v1985_v39  ;;  %v3200_v54 = vpack.c.bf16 %v2360_v9, %v2358_v59  ;;  %v1343_v16 = vmul.f32 0.5, %v5695_v60  ;;  %2693 = vmatmul.mubr.f32.gmra.mrb[54].mxu1 %v2446_v31  ;;  %v6301_v21 = vld [vmem:[#allocation97_spill] sm:$0xff]  ;;  %v2459_v36 = vld [vmem:[#allocation8 + $0x1c8] sm:$0xff]  ;;  %v6304_v9 = vld [vmem:[#allocation88_spill] sm:$0xff] }
 0x2d8   : > { %v5752_v27 = vmul.f32 0.5, %v5726_v63  ;;  %v3686_v47 = vpop.eup %3685  ;;  %3199 = vmatprep.subr.bf16.mxu1 %v3198_v51  ;;  %v2237_v5 = vadd.f32 1.0, %v3684_v8  ;;  %v2363_v3 = vmul.f32 %v2235_v52, %v1339_v50  ;;  %v2362_v26 = vmul.f32 %v2234_v34, %v5663_v49  ;;  %2698 = vmatprep.mubr.f32.mxu1 %v2451_v61  ;;  %v6303_v39 = vld [vmem:[#allocation94_spill] sm:$0xff]  ;;  %v6305_v52 = vld [vmem:[#allocation76_spill] sm:$0xff] }
 0x2d9   : > { %v2364_v41 = vmul.f32 %v2236_v4, %v5679_v29  ;;  %v3688_v0 = vpop.eup %3687  ;;  %v2238_v35 = vadd.f32 1.0, %v3686_v47  ;;  %v1347_v62 = vmul.f32 0.5, %v6290_v25  ;;  %v1349_v60 = vmul.f32 0.5, %v6291_v40  ;;  %v6306_v4 = vld [vmem:[#allocation91_spill] sm:$0xff]  ;;  %v6311_v40 = vld [vmem:[#allocation102_spill] sm:$0xff] }
 0x2da   : > { %v2243_v63 = vadd.f32 1.0, %v6292_v53  ;;  %3201 = vmatpush1.bf16.msra.mxu1 %v3200_v54  ;;  %v2365_v12 = vmul.f32 %v2237_v5, %v1341_v43  ;;  %v2239_v46 = vadd.f32 1.0, %v3688_v0  ;;  %v2245_v38 = vadd.f32 1.0, %v6293_v14  ;;  %v6308_v5 = vld [vmem:[#allocation58_spill] sm:$0xff] }
 0x2db   : > { %v3204_v23 = vpack.c.bf16 %v2364_v41, %v2362_v26  ;;  %v5761_v49 = vmul.f32 %v2238_v35, %v5703_v37  ;;  %v2242_v56 = vadd.f32 1.0, %v6294_v44  ;;  %v2244_v19 = vadd.f32 1.0, %v6295_v13  ;;  %2699 = vmatmul.mubr.f32.gmra.mrb[56].mxu1 %v2450_v6  ;;  %v6298_v37 = vld [vmem:[#allocation53_spill] sm:$0xff]  ;;  %v6310_v6 = vld [vmem:[#allocation100_spill] sm:$0xff]  ;;  %v2463_v53 = vld [vmem:[#allocation8 + $0x1e8] sm:$0xff] }
 0x2dc   : > { %v5763_v29 = vmul.f32 %v2243_v63, %v1347_v62  ;;  %v3202_v2 = vpack.c.bf16 %v2365_v12, %v2363_v3  ;;  %v2367_v22 = vmul.f32 %v2239_v46, %v1343_v16  ;;  %v5767_v55 = vmul.f32 %v2245_v38, %v1349_v60  ;;  %2704 = vmatprep.mubr.f32.mxu1 %v2455_v45  ;;  %v6307_v16 = vld [vmem:[#allocation79_spill] sm:$0xff]  ;;  %v6309_v26 = vld [vmem:[#allocation105_spill] sm:$0xff]  ;;  %v6313_v38 = vld [vmem:[#allocation90_spill] sm:$0xff] }
 0x2dd   : > { %v1351_v42 = vmul.f32 0.5, %v6296_v57  ;;  %v5771_v18 = vmul.f32 %v2242_v56, %v6297_v24  ;;  %v5774_v15 = vmul.f32 %v2244_v19, %v6298_v37  ;;  %v1353_v10 = vmul.f32 0.5, %v6299_v17  ;;  %v6315_v56 = vld [vmem:[#allocation56_spill] sm:$0xff]  ;;  %v6317_v57 = vld [vmem:[#allocation57_spill] sm:$0xff] }
 0x2de   : > { %v3690_v7 = vpop.eup %3689  ;;  %v2247_v20 = vadd.f32 1.0, %v6300_v1  ;;  %3203 = vmatprep.subr.bf16.mxu1 %v3202_v2  ;;  %v3210_v48 = vpack.c.bf16 %v5767_v55, %v5763_v29  ;;  %v2249_v32 = vadd.f32 1.0, %v6301_v21  ;;  %v2246_v33 = vadd.f32 1.0, %v6302_v28  ;;  %v6314_v29 = vld [vmem:[#allocation96_spill] sm:$0xff]  ;;  %v6316_v2 = vld [vmem:[#allocation106_spill] sm:$0xff]  ;;  %v2462_v37 = vld [vmem:[#allocation8 + $0x1e0] sm:$0xff] }
 0x2df   : > { %v2240_v30 = vadd.f32 1.0, %v3690_v7  ;;  %3205 = vmatpush1.bf16.msra.mxu1 %v3204_v23  ;;  %v3212_v50 = vpack.c.bf16 %v5774_v15, %v5771_v18  ;;  %v2248_v59 = vadd.f32 1.0, %v6303_v39  ;;  %v1355_v43 = vmul.f32 0.5, %v6304_v9  ;;  %v6312_v23 = vld [vmem:[#allocation87_spill] sm:$0xff]  ;;  %v6318_v7 = vld [vmem:[#allocation17_spill] sm:$0xff]  ;;  %v6323_v39 = vld [vmem:[#allocation98_spill] sm:$0xff] }
 0x2e0   : > { %v5784_v31 = vmul.f32 %v2247_v20, %v1351_v42  ;;  %v5789_v51 = vmul.f32 %v2249_v32, %v1353_v10  ;;  %v5792_v34 = vmul.f32 %v2246_v33, %v6305_v52  ;;  %v1357_v8 = vmul.f32 0.5, %v6306_v4  ;;  %2705 = vmatmul.mubr.f32.gmra.mrb[58].mxu1 %v2454_v11  ;;  %v6319_v10 = vld [vmem:[#allocation107_spill] sm:$0xff]  ;;  %v6320_v20 = vld [vmem:[#allocation60_spill] sm:$0xff]  ;;  %v6324_v9 = vld [vmem:[#allocation114_spill] sm:$0xff] }
 0x2e1   : > { %v2368_v61 = vmul.f32 %v2240_v30, %v5719_v58  ;;  %v3692_v54 = vpop.eup %3691  ;;  %v5796_v47 = vmul.f32 %v2248_v59, %v6307_v16  ;;  %v2251_v3 = vadd.f32 1.0, %v6308_v5  ;;  %v2253_v41 = vadd.f32 1.0, %v6309_v26  ;;  %2710 = vmatprep.mubr.f32.mxu1 %v2459_v36  ;;  %v2458_v58 = vld [vmem:[#allocation8 + $0x1c0] sm:$0xff]  ;;  %v2405_v30 = vld [vmem:[#allocation8 + $0x18] sm:$0xff]  ;;  %v6321_v28 = vld [vmem:[#allocation95_spill] sm:$0xff] }
 0x2e2   : > { %v2250_v0 = vadd.f32 1.0, %v6310_v6  ;;  %v2241_v35 = vadd.f32 1.0, %v3692_v54  ;;  %v3214_v62 = vpack.c.bf16 %v5789_v51, %v5784_v31  ;;  %v2252_v60 = vadd.f32 1.0, %v6311_v40  ;;  %v6322_v36 = vld [vmem:[#allocation54_spill] sm:$0xff]  ;;  %v6326_v51 = vld [vmem:[#allocation112_spill] sm:$0xff]  ;;  %v6328_v16 = vld [vmem:[#allocation55_spill] sm:$0xff] }
 0x2e3   : > { %v3208_v25 = vpack.c.bf16 %v2368_v61, %v5761_v49  ;;  %v3216_v63 = vpack.c.bf16 %v5796_v47, %v5792_v34  ;;  %v5807_v45 = vmul.f32 %v2251_v3, %v1355_v43  ;;  %v5809_v12 = vmul.f32 %v2253_v41, %v1357_v8  ;;  %v6327_v8 = vld [vmem:[#allocation116_spill] sm:$0xff]  ;;  %v6329_v3 = vld [vmem:[#allocation110_spill] sm:$0xff] }
 0x2e4   : > { %v5812_v46 = vmul.f32 %v2250_v0, %v6312_v23  ;;  %v2369_v14 = vmul.f32 %v2241_v35, %v5752_v27  ;;  %v5816_v49 = vmul.f32 %v2252_v60, %v6313_v38  ;;  %v1359_v44 = vmul.f32 0.5, %v6314_v29  ;;  %2711 = vmatmul.mubr.f32.gmra.mrb[60].mxu1 %v2458_v58  ;;  %v6330_v58 = vld [vmem:[#allocation103_spill] sm:$0xff]  ;;  %v6331_v40 = vld [vmem:[#allocation104_spill] sm:$0xff]  ;;  %v6335_v29 = vld [vmem:[#allocation77_spill] sm:$0xff] }
 0x2e5   : > { %v1361_v13 = vmul.f32 0.5, %v6315_v56  ;;  %v3218_v19 = vpack.c.bf16 %v5809_v12, %v5807_v45  ;;  %v2255_v55 = vadd.f32 1.0, %v6316_v2  ;;  %v2257_v42 = vadd.f32 1.0, %v6317_v57  ;;  %2716 = vmatprep.mubr.f32.mxu1 %v2463_v53  ;;  %v6332_v53 = vld [vmem:[#allocation69_spill] sm:$0xff]  ;;  %v6333_v12 = vld [vmem:[#allocation78_spill] sm:$0xff]  ;;  %v6334_v23 = vld [vmem:[#allocation123_spill] sm:$0xff] }
 0x2e6   : > { %v2254_v24 = vadd.f32 1.0, %v6318_v7  ;;  %v3206_v27 = vpack.c.bf16 %v2369_v14, %v2367_v22  ;;  %v3220_v17 = vpack.c.bf16 %v5816_v49, %v5812_v46  ;;  %v2256_v1 = vadd.f32 1.0, %v6319_v10  ;;  %v6325_v22 = vld [vmem:[#allocation122_spill] sm:$0xff]  ;;  %v6337_v2 = vld [vmem:[#allocation83_spill] sm:$0xff]  ;;  %v6338_v7 = vld [vmem:[#allocation108_spill] sm:$0xff] }
 0x2e7   : > { %v1363_v11 = vmul.f32 0.5, %v6320_v20  ;;  %v2383_v21 = vmul.f32 %v2255_v55, %v1359_v44  ;;  %v2385_v32 = vmul.f32 %v2257_v42, %v1361_v13  ;;  %v1365_v31 = vmul.f32 0.5, %v6322_v36  ;;  %v6336_v56 = vld [vmem:[#allocation118_spill] sm:$0xff]  ;;  %v6340_v10 = vld [vmem:[#allocation129_spill] sm:$0xff]  ;;  %v6344_v36 = vld [vmem:[#allocation71_spill] sm:$0xff] }
 0x2e8   : > { %v2382_v33 = vmul.f32 %v2254_v24, %v6321_v28  ;;  %3207 = vmatprep.subr.bf16.mxu1 %v3206_v27  ;;  %v2384_v59 = vmul.f32 %v2256_v1, %v6323_v39  ;;  %v2259_v43 = vadd.f32 1.0, %v6324_v9  ;;  %v2261_v61 = vadd.f32 1.0, %v6325_v22  ;;  %2717 = vmatmul.mubr.f32.gmra.mrb[62].mxu1 %v2462_v37  ;;  %v6339_v37 = vld [vmem:[#allocation109_spill] sm:$0xff]  ;;  %v6341_v20 = vld [vmem:[#allocation86_spill] sm:$0xff]  ;;  %v6345_v15 = vld [vmem:[#allocation80_spill] sm:$0xff] }
 0x2e9   : > { %v2258_v52 = vadd.f32 1.0, %v6326_v51  ;;  %3209 = vmatpush1.bf16.msra.mxu1 %v3208_v25  ;;  %v3222_v4 = vpack.c.bf16 %v2385_v32, %v2383_v21  ;;  %v2260_v54 = vadd.f32 1.0, %v6327_v8  ;;  %v1367_v5 = vmul.f32 0.5, %v6328_v16  ;;  %2787 = vmatprep.mubr.f32.mxu1 %v2405_v30  ;;  %v6342_v30 = vld [vmem:[#allocation126_spill] sm:$0xff]  ;;  %v6346_v9 = vld [vmem:[#allocation117_spill] sm:$0xff]  ;;  %v2412_v46 = vld [vmem:[#allocation8 + $0x50] sm:$0xff] }
 0x2ea   : > { %v1369_v26 = vmul.f32 0.5, %v6329_v3  ;;  %3211 = vmatprep.subr.bf16.mxu1 %v3210_v48  ;;  %v3224_v41 = vpack.c.bf16 %v2384_v59, %v2382_v33  ;;  %v2387_v6 = vmul.f32 %v2259_v43, %v1363_v11  ;;  %v2389_v0 = vmul.f32 %v2261_v61, %v1365_v31  ;;  %v6343_v28 = vld [vmem:[#allocation130_spill] sm:$0xff]  ;;  %v6347_v43 = vld [vmem:[#allocation121_spill] sm:$0xff]  ;;  %v6351_v3 = vld [vmem:[#allocation67_spill] sm:$0xff] }
 0x2eb   : > { %v2386_v35 = vmul.f32 %v2258_v52, %v6330_v58  ;;  %v2388_v60 = vmul.f32 %v2260_v54, %v6331_v40  ;;  %v2263_v45 = vadd.f32 1.0, %v6332_v53  ;;  %v2265_v25 = vadd.f32 1.0, %v6333_v12  ;;  %v6348_v61 = vld [vmem:[#allocation85_spill] sm:$0xff]  ;;  %v6349_v52 = vld [vmem:[#allocation22_spill] sm:$0xff]  ;;  %v2409_v53 = vld [vmem:[#allocation8 + $0x38] sm:$0xff] }
 0x2ec   : > { %v2262_v14 = vadd.f32 1.0, %v6334_v23  ;;  %v3226_v38 = vpack.c.bf16 %v2389_v0, %v2387_v6  ;;  %v2264_v44 = vadd.f32 1.0, %v6335_v29  ;;  %v1371_v13 = vmul.f32 0.5, %v6336_v56  ;;  %v6350_v54 = vld [vmem:[#allocation21_spill] sm:$0xff]  ;;  %v2413_v12 = vld [vmem:[#allocation8 + $0x58] sm:$0xff]  ;;  %v2424_v23 = vld [vmem:[#allocation8 + $0xb0] sm:$0xff] }
 0x2ed   : > { %v1373_v48 = vmul.f32 0.5, %v6337_v2  ;;  %3213 = vmatpush1.bf16.msra.mxu1 %v3212_v50  ;;  %v3228_v55 = vpack.c.bf16 %v2388_v60, %v2386_v35  ;;  %v2391_v57 = vmul.f32 %v2263_v45, %v1367_v5  ;;  %v2393_v42 = vmul.f32 %v2265_v25, %v1369_v26  ;;  %v6352_v35 = vld [vmem:[#allocation74_spill] sm:$0xff]  ;;  %v6353_v60 = vld [vmem:[#allocation124_spill] sm:$0xff]  ;;  %v2408_v45 = vld [vmem:[#allocation8 + $0x30] sm:$0xff] }
 0x2ee   : > { %v2390_v24 = vmul.f32 %v2262_v14, %v6338_v7  ;;  %3215 = vmatprep.subr.bf16.mxu1 %v3214_v62  ;;  %v2392_v27 = vmul.f32 %v2264_v44, %v6339_v37  ;;  %v2267_v1 = vadd.f32 1.0, %v6340_v10  ;;  %v2269_v11 = vadd.f32 1.0, %v6341_v20  ;;  %v2417_v49 = vld [vmem:[#allocation8 + $0x78] sm:$0xff]  ;;  %v2432_v44 = vld [vmem:[#allocation8 + $0xf0] sm:$0xff] }
 0x2ef   : > { %v2266_v21 = vadd.f32 1.0, %v6342_v30  ;;  %v3230_v32 = vpack.c.bf16 %v2393_v42, %v2391_v57  ;;  %v2268_v33 = vadd.f32 1.0, %v6343_v28  ;;  %v1375_v18 = vmul.f32 0.5, %v6344_v36  ;;  %v2425_v25 = vld [vmem:[#allocation8 + $0xb8] sm:$0xff]  ;;  %v2444_v57 = vld [vmem:[#allocation8 + $0x150] sm:$0xff] }
 0x2f0   : > { %v1377_v50 = vmul.f32 0.5, %v6345_v15  ;;  %v3232_v31 = vpack.c.bf16 %v2392_v27, %v2390_v24  ;;  %v2395_v39 = vmul.f32 %v2267_v1, %v1371_v13  ;;  %v2397_v59 = vmul.f32 %v2269_v11, %v1373_v48  ;;  %v2429_v14 = vld [vmem:[#allocation8 + $0xd8] sm:$0xff]  ;;  %v2436_v13 = vld [vmem:[#allocation8 + $0x110] sm:$0xff] }
 0x2f1   : > { %v2394_v62 = vmul.f32 %v2266_v21, %v6346_v9  ;;  %3217 = vmatpush1.bf16.msra.mxu1 %v3216_v63  ;;  %v2396_v22 = vmul.f32 %v2268_v33, %v6347_v43  ;;  %v2271_v51 = vadd.f32 1.0, %v6348_v61  ;;  %v2273_v8 = vadd.f32 1.0, %v6349_v52  ;;  %v2433_v29 = vld [vmem:[#allocation8 + $0xf8] sm:$0xff]  ;;  %v2440_v48 = vld [vmem:[#allocation8 + $0x130] sm:$0xff]  ;;  %v2485_v21 = vpop.permute.xlu0 %2484 }
 0x2f2   : > { %v2270_v16 = vadd.f32 1.0, %v6350_v54  ;;  %3219 = vmatprep.subr.bf16.mxu1 %v3218_v19  ;;  %v3234_v5 = vpack.c.bf16 %v2397_v59, %v2395_v39  ;;  %v2272_v26 = vadd.f32 1.0, %v6351_v3  ;;  %v2404_v19 = vld [vmem:[#allocation8 + $0x10] sm:$0xff]  ;;  %v2437_v56 = vld [vmem:[#allocation8 + $0x118] sm:$0xff] }
 0x2f3   : > { %v3236_v6 = vpack.c.bf16 %v2396_v22, %v2394_v62  ;;  %v2399_v0 = vmul.f32 %v2271_v51, %v1375_v18  ;;  %v2401_v58 = vmul.f32 %v2273_v8, %v1377_v50  ;;  %v2441_v2 = vld [vmem:[#allocation8 + $0x138] sm:$0xff]  ;;  %v2448_v7 = vld [vmem:[#allocation8 + $0x170] sm:$0xff]  ;;  %v2490_v18 = vpop.permute.xlu1 %2489 }
 0x2f4   : > { %v2398_v40 = vmul.f32 %v2270_v16, %v6352_v35  ;;  %v2400_v34 = vmul.f32 %v2272_v26, %v6353_v60  ;;  %v2449_v42 = vld [vmem:[#allocation8 + $0x178] sm:$0xff]  ;;  %v2452_v37 = vld [vmem:[#allocation8 + $0x190] sm:$0xff] }
 0x2f5   : > { %3221 = vmatpush1.bf16.msra.mxu1 %v3220_v17  ;;  %v3238_v47 = vpack.c.bf16 %v2401_v58, %v2399_v0  ;;  %v2416_v17 = vld [vmem:[#allocation8 + $0x70] sm:$0xff]  ;;  %v2453_v24 = vld [vmem:[#allocation8 + $0x198] sm:$0xff]  ;;  %v2495_v59 = vpop.permute.xlu0 %2494 }
 0x2f6   : > { %3223 = vmatprep.subr.bf16.mxu1 %v3222_v4  ;;  %v3240_v63 = vpack.c.bf16 %v2400_v34, %v2398_v40  ;;  %v2421_v4 = vld [vmem:[#allocation8 + $0x98] sm:$0xff]  ;;  %v2456_v10 = vld [vmem:[#allocation8 + $0x1b0] sm:$0xff] }
 0x2f7   : > { %v2457_v27 = vld [vmem:[#allocation8 + $0x1b8] sm:$0xff]  ;;  %v2460_v20 = vld [vmem:[#allocation8 + $0x1d0] sm:$0xff]  ;;  %v2500_v61 = vpop.permute.xlu1 %2499 }
 0x2f8   : > { %v2461_v1 = vld [vmem:[#allocation8 + $0x1d8] sm:$0xff]  ;;  %v2464_v30 = vld [vmem:[#allocation8 + $0x1f0] sm:$0xff] }
 0x2f9   : > { %3225 = vmatpush1.bf16.msra.mxu1 %v3224_v41  ;;  %v2420_v41 = vld [vmem:[#allocation8 + $0x90] sm:$0xff]  ;;  %v2465_v11 = vld [vmem:[#allocation8 + $0x1f8] sm:$0xff]  ;;  %v2505_v16 = vpop.permute.xlu0 %2504 }
 0x2fa   : > { %3227 = vmatprep.subr.bf16.mxu1 %v3226_v38  ;;  %v2428_v38 = vld [vmem:[#allocation8 + $0xd0] sm:$0xff] }
 0x2fb   : > { %v2510_v0 = vpop.permute.xlu1 %2509 }
 0x2fd   : > { %3229 = vmatpush1.bf16.msra.mxu1 %v3228_v55  ;;  %v2445_v55 = vld [vmem:[#allocation8 + $0x158] sm:$0xff]  ;;  %v2515_v34 = vpop.permute.xlu0 %2514 }
 0x2fe   : > { %3231 = vmatprep.subr.bf16.mxu1 %v3230_v32 }
 0x301   : > { %3233 = vmatpush1.bf16.msra.mxu1 %v3232_v31 }
 0x302   : > { %3235 = vmatprep.subr.bf16.mxu1 %v3234_v5 }
 0x305   : > { %3237 = vmatpush1.bf16.msra.mxu1 %v3236_v6 }
 0x306   : > { %3239 = vmatprep.subr.bf16.mxu1 %v3238_v47 }
 0x309   : > { %3241 = vmatpush1.bf16.msra.mxu1 %v3240_v63 }
 0x30c   : > { %2788 = vmatmul.mubr.f32.vlgmr.msra.gmra.mrb[32].mxu1 %v2404_v19 }
 0x30d   : > { %2793 = vmatprep.mubr.f32.mxu1 %v2409_v53 }
 0x310   : > { %2794 = vmatmul.mubr.f32.gmra.mrb[34].mxu1 %v2408_v45  ;;  %v2520_v45 = vpop.permute.xlu1 %2519 }
 0x311   : > { %2799 = vmatprep.mubr.f32.mxu1 %v2413_v12 }
 0x314   : > { %2800 = vmatmul.mubr.f32.gmra.mrb[36].mxu1 %v2412_v46 }
 0x315   : > { %2805 = vmatprep.mubr.f32.mxu1 %v2417_v49 }
 0x318   : > { %2806 = vmatmul.mubr.f32.gmra.mrb[38].mxu1 %v2416_v17 }
 0x319   : > { %2811 = vmatprep.mubr.f32.mxu1 %v2421_v4  ;;  %v2525_v4 = vpop.permute.xlu0 %2524 }
 0x31c   : > { %2812 = vmatmul.mubr.f32.gmra.mrb[40].mxu1 %v2420_v41 }
 0x31d   : > { %2817 = vmatprep.mubr.f32.mxu1 %v2425_v25 }
 0x320   : > { %2818 = vmatmul.mubr.f32.gmra.mrb[42].mxu1 %v2424_v23 }
 0x321   : > { %2823 = vmatprep.mubr.f32.mxu1 %v2429_v14 }
 0x324   : > { %2824 = vmatmul.mubr.f32.gmra.mrb[44].mxu1 %v2428_v38  ;;  %v2530_v38 = vpop.permute.xlu1 %2529 }
 0x325   : > { %2829 = vmatprep.mubr.f32.mxu1 %v2433_v29 }
 0x328   : > { %2830 = vmatmul.mubr.f32.gmra.mrb[46].mxu1 %v2432_v44 }
 0x329   : > { %2835 = vmatprep.mubr.f32.mxu1 %v2437_v56 }
 0x32c   : > { %2836 = vmatmul.mubr.f32.gmra.mrb[48].mxu1 %v2436_v13 }
 0x32d   : > { %2841 = vmatprep.mubr.f32.mxu1 %v2441_v2  ;;  %v2535_v2 = vpop.permute.xlu0 %2534 }
 0x330   : > { %2842 = vmatmul.mubr.f32.gmra.mrb[50].mxu1 %v2440_v48 }
 0x331   : > { %2847 = vmatprep.mubr.f32.mxu1 %v2445_v55 }
 0x334   : > { %2848 = vmatmul.mubr.f32.gmra.mrb[52].mxu1 %v2444_v57 }
 0x335   : > { %2853 = vmatprep.mubr.f32.mxu1 %v2449_v42 }
 0x338   : > { %2854 = vmatmul.mubr.f32.gmra.mrb[54].mxu1 %v2448_v7  ;;  %v2540_v7 = vpop.permute.xlu1 %2539 }
 0x339   : > { %2859 = vmatprep.mubr.f32.mxu1 %v2453_v24 }
 0x33c   : > { %2860 = vmatmul.mubr.f32.gmra.mrb[56].mxu1 %v2452_v37 }
 0x33d   : > { %2865 = vmatprep.mubr.f32.mxu1 %v2457_v27 }
 0x340   : > { %2866 = vmatmul.mubr.f32.gmra.mrb[58].mxu1 %v2456_v10 }
 0x341   : > { %2871 = vmatprep.mubr.f32.mxu1 %v2461_v1  ;;  %v2545_v1 = vpop.permute.xlu0 %2544 }
 0x344   : > { %2872 = vmatmul.mubr.f32.gmra.mrb[60].mxu1 %v2460_v20 }
 0x345   : > { %2877 = vmatprep.mubr.f32.mxu1 %v2465_v11 }
 0x348   : > { %2878 = vmatmul.mubr.f32.gmra.mrb[62].mxu1 %v2464_v30 }
 0x3df   : > { %v2789_v32 = vpop.f32.mrb[32].mxu1 }
 0x3e0   : > { %v3258_v28 = vadd.f32 %v2789_v32, %v2485_v21  ;;  %v2791_v33 = vpop.f32.mrb[33].mxu1  ;;  %v2550_v32 = vpop.permute.xlu1 %2549 }
 0x3e1   : > { %v3259_v36 = vadd.f32 %v2791_v33, %v2485_v21 }
 0x3e2   : > { %2884 = vst [vmem:[%s5873_s26] sm:$0xff] %v3258_v28 }
 0x3e3   : > { %2885 = vst [vmem:[%s5873_s26 + $0x8] sm:$0xff] %v3259_v36  ;;  %v2795_v15 = vpop.f32.mrb[34].mxu1 }
 0x3e4   : > { %v3260_v50 = vadd.f32 %v2795_v15, %v2490_v18  ;;  %v2797_v31 = vpop.f32.mrb[35].mxu1  ;;  %v2555_v15 = vpop.permute.xlu0 %2554 }
 0x3e5   : > { %v3261_v39 = vadd.f32 %v2797_v31, %v2490_v18 }
 0x3e6   : > { %2886 = vst [vmem:[%s5873_s26 + $0x10] sm:$0xff] %v3260_v50 }
 0x3e7   : > { %2887 = vst [vmem:[%s5873_s26 + $0x18] sm:$0xff] %v3261_v39  ;;  %v2801_v9 = vpop.f32.mrb[36].mxu1 }
 0x3e8   : > { %v3262_v62 = vadd.f32 %v2801_v9, %v2495_v59  ;;  %v2803_v43 = vpop.f32.mrb[37].mxu1  ;;  %v2560_v9 = vpop.permute.xlu1 %2559 }
 0x3e9   : > { %v3263_v22 = vadd.f32 %v2803_v43, %v2495_v59 }
 0x3ea   : > { %2888 = vst [vmem:[%s5873_s26 + $0x20] sm:$0xff] %v3262_v62 }
 0x3eb   : > { %2889 = vst [vmem:[%s5873_s26 + $0x28] sm:$0xff] %v3263_v22  ;;  %v2807_v51 = vpop.f32.mrb[38].mxu1 }
 0x3ec   : > { %v3264_v52 = vadd.f32 %v2807_v51, %v2500_v61  ;;  %v2809_v8 = vpop.f32.mrb[39].mxu1 }
 0x3ed   : > { %v3265_v54 = vadd.f32 %v2809_v8, %v2500_v61 }
 0x3ee   : > { %2890 = vst [vmem:[%s5873_s26 + $0x30] sm:$0xff] %v3264_v52 }
 0x3ef   : > { %2891 = vst [vmem:[%s5873_s26 + $0x38] sm:$0xff] %v3265_v54  ;;  %v2813_v5 = vpop.f32.mrb[40].mxu1 }
 0x3f0   : > { %v3266_v3 = vadd.f32 %v2813_v5, %v2505_v16  ;;  %v2815_v26 = vpop.f32.mrb[41].mxu1 }
 0x3f1   : > { %v3267_v6 = vadd.f32 %v2815_v26, %v2505_v16 }
 0x3f2   : > { %2892 = vst [vmem:[%s5873_s26 + $0x40] sm:$0xff] %v3266_v3 }
 0x3f3   : > { %2893 = vst [vmem:[%s5873_s26 + $0x48] sm:$0xff] %v3267_v6  ;;  %v2819_v58 = vpop.f32.mrb[42].mxu1 }
 0x3f4   : > { %v3268_v35 = vadd.f32 %v2819_v58, %v2510_v0  ;;  %v2821_v40 = vpop.f32.mrb[43].mxu1 }
 0x3f5   : > { %v3269_v60 = vadd.f32 %v2821_v40, %v2510_v0 }
 0x3f6   : > { %2894 = vst [vmem:[%s5873_s26 + $0x50] sm:$0xff] %v3268_v35 }
 0x3f7   : > { %2895 = vst [vmem:[%s5873_s26 + $0x58] sm:$0xff] %v3269_v60  ;;  %v2825_v47 = vpop.f32.mrb[44].mxu1 }
 0x3f8   : > { %v3270_v63 = vadd.f32 %v2825_v47, %v2515_v34  ;;  %v2827_v19 = vpop.f32.mrb[45].mxu1 }
 0x3f9   : > { %v3271_v53 = vadd.f32 %v2827_v19, %v2515_v34 }
 0x3fa   : > { %2896 = vst [vmem:[%s5873_s26 + $0x60] sm:$0xff] %v3270_v63 }
 0x3fb   : > { %2897 = vst [vmem:[%s5873_s26 + $0x68] sm:$0xff] %v3271_v53  ;;  %v2831_v12 = vpop.f32.mrb[46].mxu1 }
 0x3fc   : > { %v3272_v46 = vadd.f32 %v2831_v12, %v2520_v45  ;;  %v2833_v49 = vpop.f32.mrb[47].mxu1 }
 0x3fd   : > { %v3273_v17 = vadd.f32 %v2833_v49, %v2520_v45 }
 0x3fe   : > { %2898 = vst [vmem:[%s5873_s26 + $0x70] sm:$0xff] %v3272_v46 }
 0x3ff   : > { %2899 = vst [vmem:[%s5873_s26 + $0x78] sm:$0xff] %v3273_v17  ;;  %v2837_v41 = vpop.f32.mrb[48].mxu1 }
 0x400   : > { %v3274_v25 = vadd.f32 %v2837_v41, %v2525_v4  ;;  %v2839_v23 = vpop.f32.mrb[49].mxu1 }
 0x401   : > { %v3275_v14 = vadd.f32 %v2839_v23, %v2525_v4 }
 0x402   : > { %2900 = vst [vmem:[%s5873_s26 + $0x80] sm:$0xff] %v3274_v25 }
 0x403   : > { %2901 = vst [vmem:[%s5873_s26 + $0x88] sm:$0xff] %v3275_v14  ;;  %v2843_v29 = vpop.f32.mrb[50].mxu1 }
 0x404   : > { %v3276_v44 = vadd.f32 %v2843_v29, %v2530_v38  ;;  %v2845_v56 = vpop.f32.mrb[51].mxu1 }
 0x405   : > { %v3277_v13 = vadd.f32 %v2845_v56, %v2530_v38 }
 0x406   : > { %2902 = vst [vmem:[%s5873_s26 + $0x90] sm:$0xff] %v3276_v44 }
 0x407   : > { %2903 = vst [vmem:[%s5873_s26 + $0x98] sm:$0xff] %v3277_v13  ;;  %v2849_v48 = vpop.f32.mrb[52].mxu1 }
 0x408   : > { %v3278_v55 = vadd.f32 %v2849_v48, %v2535_v2  ;;  %v2851_v57 = vpop.f32.mrb[53].mxu1 }
 0x409   : > { %v3279_v42 = vadd.f32 %v2851_v57, %v2535_v2 }
 0x40a   : > { %2904 = vst [vmem:[%s5873_s26 + $0xa0] sm:$0xff] %v3278_v55 }
 0x40b   : > { %2905 = vst [vmem:[%s5873_s26 + $0xa8] sm:$0xff] %v3279_v42  ;;  %v2855_v24 = vpop.f32.mrb[54].mxu1 }
 0x40c   : > { %v3280_v37 = vadd.f32 %v2855_v24, %v2540_v7  ;;  %v2857_v27 = vpop.f32.mrb[55].mxu1 }
 0x40d   : > { %v3281_v10 = vadd.f32 %v2857_v27, %v2540_v7 }
 0x40e   : > { %2906 = vst [vmem:[%s5873_s26 + $0xb0] sm:$0xff] %v3280_v37 }
 0x40f   : > { %2907 = vst [vmem:[%s5873_s26 + $0xb8] sm:$0xff] %v3281_v10  ;;  %v2861_v20 = vpop.f32.mrb[56].mxu1 }
 0x410   : > { %v3282_v11 = vadd.f32 %v2861_v20, %v2545_v1  ;;  %v2863_v30 = vpop.f32.mrb[57].mxu1 }
 0x411   : > { %v3283_v21 = vadd.f32 %v2863_v30, %v2545_v1 }
 0x412   : > { %2908 = vst [vmem:[%s5873_s26 + $0xc0] sm:$0xff] %v3282_v11 }
 0x413   : > { %2909 = vst [vmem:[%s5873_s26 + $0xc8] sm:$0xff] %v3283_v21  ;;  %v2867_v28 = vpop.f32.mrb[58].mxu1 }
 0x414   : > { %v3284_v33 = vadd.f32 %v2867_v28, %v2550_v32  ;;  %v2869_v36 = vpop.f32.mrb[59].mxu1 }
 0x415   : > { %v3285_v18 = vadd.f32 %v2869_v36, %v2550_v32 }
 0x416   : > { %2910 = vst [vmem:[%s5873_s26 + $0xd0] sm:$0xff] %v3284_v33 }
 0x417   : > { %2911 = vst [vmem:[%s5873_s26 + $0xd8] sm:$0xff] %v3285_v18  ;;  %v2873_v50 = vpop.f32.mrb[60].mxu1 }
 0x418   : > { %v3286_v31 = vadd.f32 %v2873_v50, %v2555_v15  ;;  %v2875_v39 = vpop.f32.mrb[61].mxu1 }
 0x419   : > { %v3287_v59 = vadd.f32 %v2875_v39, %v2555_v15 }
 0x41a   : > { %2912 = vst [vmem:[%s5873_s26 + $0xe0] sm:$0xff] %v3286_v31 }
 0x41b   : > { %2913 = vst [vmem:[%s5873_s26 + $0xe8] sm:$0xff] %v3287_v59  ;;  %v2879_v62 = vpop.f32.mrb[62].mxu1 }
 0x41c   : > { %v3288_v43 = vadd.f32 %v2879_v62, %v2560_v9  ;;  %v2881_v22 = vpop.f32.mrb[63].mxu1 }
 0x41d   : > { %v3289_v61 = vadd.f32 %v2881_v22, %v2560_v9 }
 0x41e   : > { %2914 = vst [vmem:[%s5873_s26 + $0xf0] sm:$0xff] %v3288_v43 }
 0x41f   : > { %2915 = vst [vmem:[%s5873_s26 + $0xf8] sm:$0xff] %v3289_v61 }
 0x420   : > { %3848 = shalt.err (!%p3845_p0)
}
 0x421   : > { %s3849_s27 = scalar_lea.hbm %s5910_s10, 4096  ;;  %s3853_s13 = scalar_lea.hbm %s5968_s5, 8192 }
 0x422   : > { %p3850_p4 = scmp.ne.s32.totalorder %s5910_s10, %s3849_s27  ;;  %p3854_p12 = scmp.lt.u32.totalorder %s5910_s10, %s5968_s5 }
 0x423   : > { %p3855_p1 = scmp.lt.u32.totalorder %s3853_s13, %s3849_s27  ;;  %p3857_p2 = scmp.lt.u32.totalorder %s3849_s27, %s5910_s10 }
 0x424   : > { %p3851_p13 = pnand %p3850_p4, %p4158_p5 }
 0x425   : > { %p3856_p11 = por %p3855_p1, %p3854_p12 }
 0x426   : > { %p3852_p6 = pneg %p3851_p13 }
 0x427   : > { %p3858_p8 = por %p3857_p2, %p3856_p11 }
 0x429   : > { %p3859_p10 = pnand %p3858_p8, %p3852_p6 }
 0x42b   : > { %3862 = shalt.err (!%p3859_p10)
}
 0x42c   : > { %s3941_s26 = smov 256   ;;  %s3942_s28 = smov 16  }
 0x42d   : > { %3340 = dma.vmem_to_hbm [thread:$0]  (%p4158_p5), %s5912_s30, 4096, %s5910_s10, %s2917_s21, %s3941_s26, %s3941_s26, %s3942_s28  }
 0x42e PF: > { %s6354_s7 = sld [smem:[#allocation16_spill]]  ;;  %s2947_s12 = sand.u32 1, %s3905_s18  }
 0x42f   : > { %p6356_p7 = scmp.ge.s32.totalorder %s3925_s23, 2  ;;  %s2948_s15 = scalar_lea.sflag [#allocation4], %s2947_s12 }
 0x434   : > { %p6355_p3 = scmp.ne.s32.totalorder %s6354_s7, 0 }
 0x436   : > { %p3360_p9 = pnand %p6356_p7, %p6355_p3 }
 0x438   : > { %3900 = dma.done.wait (!%p3360_p9), %s2948_s15, 4096  }
 0x439   : > { %3902 = vsyncadd (!%p3360_p9), %s2948_s15, 4294963200  ;;  %s23_s23 = sadd.s32 1, %s3925_s23   ;;  %s6357_s18 = smov %s3909_s19 }
 0x43a   : > { %p20_p0 = scmp.ge.s32.totalorder %s23_s23, 4   ;;  %s6358_s19 = smov %s3913_s20 }
 0x43b   : > { %s6359_s20 = smov %s4167_s9  ;;  %s6360_s21 = smov %s3921_s22 }
 0x43c   : > { %s6361_s22 = smov %s6363_s8  ;;  %22 = sbr.rel (!%p20_p0) target bundleno = 10 (0xa), region = 101 }
 0x443   :  { %2953 = vsyncpa [#allocation3], 1 }
 0x444   :  { %2955 = vsyncpa [#allocation3 + $0x1], 1 }
 0x445   :  { %2956 = vsyncpa [#allocation6], 1 }
 0x446   :  { %2957 = vsyncpa [#allocation9], 1 }
 0x447   :  { %2958 = vsyncpa [#allocation4], 1 }
 0x448   :  { %2960 = vsyncpa [#allocation4 + $0x1], 1 }

</bundles_post_ra>
